<compile_context>
chip_gen: v6e
topology: v6e:2x2x1
jax: 0.10.0
libtpu: 0.0.40
codegen_flags: <defaults>
</compile_context>

<pallas_src>
import jax
import jax.numpy as jnp
from jax.experimental import pallas as pl
from jax.experimental.pallas import tpu as pltpu

# ----------------------------- configuration --------------------------------
B = 4                   # batch
S = 16                  # sequence length (>= largest conv kernel = 10)
EMB_DIM = 32            # emb_dim
MLP_DIMS = [64]         # mlp_dims
NUM_EXPERT = 3
DOMAIN_NUM = 5
KERNEL_SIZES = (1, 2, 3, 5, 10)
N_FILTER = 64
NK = len(KERNEL_SIZES)
K_MAX = max(KERNEL_SIZES)
UNF_COLS = K_MAX * EMB_DIM           # 320  im2col columns (zero-padded per kernel size)
F_PAD = 128                          # per-expert filter block padded 64 -> 128 (lane-dense)
EXP_PAD = NUM_EXPERT * F_PAD         # 384  padded conv-output width
SHARED_PAD = NK * F_PAD              # 640  padded shared-feature width
H_PAD = 128                          # padded hidden width (gate hidden / classifier dims)
DOM_PAD = 16                         # domain one-hot width padded 5 -> 16
TOTAL_FILTERS = NK * N_FILTER        # 320  natural shared width
BN_EPS = 1e-5
OUT_PAD = 128                        # lane-dense padded output width

assert all(h <= H_PAD for h in MLP_DIMS)
assert EMB_DIM % 16 == 0 and S >= K_MAX

# bf16 weight-slab row offsets (all multiples of 16 -> clean bf16 (16,128) tiles).
W_ROW_DOM = 0                                   # (16, 128)  domain_emb @ gate_w1[:D]  (folded)
W_ROW_FEAT = W_ROW_DOM + DOM_PAD                # (32, 128)  gate_w1[D:2D]
W_ROW_GW2 = W_ROW_FEAT + EMB_DIM                # (128,128)  gate_w2 (padded)
W_ROW_CLS0 = W_ROW_GW2 + H_PAD                  # (640,128)  classifier layer-0 weight
W_ROW_CLSF = W_ROW_CLS0 + SHARED_PAD + H_PAD * (len(MLP_DIMS) - 1)   # (128,128) final weight
W_ROWS = W_ROW_CLSF + H_PAD

# f32 parameter-slab rows (width EXP_PAD = 384).
P_ROW_ATTW = 0
P_ROW_ATTB = 1
P_ROW_GB1 = 2
P_ROW_GB2 = 3           # lanes [0:E] = bias, lanes [E:128] = -1e30 (softmax pad mask baked in)
P_ROW_CONVB = 4         # NK rows, expert-major 128-padded conv biases
P_ROW_CLS = P_ROW_CONVB + NK        # per hidden layer: b, gamma, beta, rm, rv (5 rows)
P_ROW_CLSBF = P_ROW_CLS + 5 * len(MLP_DIMS)
P_ROWS = ((P_ROW_CLSBF + 1 + 7) // 8) * 8


# ------------------------------ fused kernel --------------------------------
def mdfend_fused_kernel(x_ref, idx_ref, unf_ref, convw_ref, wslab_ref, pslab_ref, out_ref):
    f32 = jnp.float32
    bf16 = jnp.bfloat16

    x = x_ref[...].astype(f32)                                   # (B, S, D)
    b_sz, s_len, d = x.shape

    # ---- 1) MaskAttention: Linear(D,1) scores + masked softmax + weighted sum (f32)
    att_w = pslab_ref[P_ROW_ATTW:P_ROW_ATTW + 1, 0:d]            # (1, D)
    att_b = pslab_ref[P_ROW_ATTB:P_ROW_ATTB + 1, 0:1]            # (1, 1)
    scores = jnp.sum(x * att_w[:, None, :], axis=-1) + att_b     # (B, S)
    row_sum = jnp.sum(x, axis=-1)                                # (B, S)
    scores = jnp.where(row_sum != 0.0, scores, -jnp.inf)         # masked_fill(mask==0, -inf)
    m = jnp.max(scores, axis=-1, keepdims=True)
    exp_s = jnp.exp(scores - m)
    att = exp_s / jnp.sum(exp_s, axis=-1, keepdims=True)
    feature = jnp.sum(att[:, :, None] * x, axis=1)               # (B, D)

    # ---- 2+3) Gate (domain embedding pre-folded into the first Linear's weight slab)
    idx = idx_ref[...]                                           # (B, 1) int32
    dom_iota = jax.lax.broadcasted_iota(jnp.int32, (b_sz, DOM_PAD), 1)
    onehot = (dom_iota == idx).astype(bf16)                      # (B, 16)
    w_dom = wslab_ref[W_ROW_DOM:W_ROW_DOM + DOM_PAD, :]          # (16, 128) bf16
    w_feat = wslab_ref[W_ROW_FEAT:W_ROW_FEAT + EMB_DIM, :]       # (32, 128) bf16
    gb1 = pslab_ref[P_ROW_GB1:P_ROW_GB1 + 1, 0:H_PAD]            # (1, 128)
    h = (jnp.dot(onehot, w_dom, preferred_element_type=f32)
         + jnp.dot(feature.astype(bf16), w_feat, preferred_element_type=f32)
         + gb1)
    h = jnp.maximum(h, 0.0)                                      # (B, 128), pad lanes are 0
    gw2 = wslab_ref[W_ROW_GW2:W_ROW_GW2 + H_PAD, :]              # (128, 128) bf16
    gb2 = pslab_ref[P_ROW_GB2:P_ROW_GB2 + 1, 0:H_PAD]            # (1, 128), -1e30 in pad lanes
    g = jnp.dot(h.astype(bf16), gw2, preferred_element_type=f32) + gb2
    g = g - jnp.max(g, axis=-1, keepdims=True)
    eg = jnp.exp(g)
    gate = eg / jnp.sum(eg, axis=-1, keepdims=True)              # (B, 128), lanes >= E are 0

    # Hoisted gate mixture tensor (feedback #1): built ONCE, 128-lane-aligned blocks.
    gate_expanded = jnp.concatenate(
        [jnp.broadcast_to(gate[:, e_i:e_i + 1], (b_sz, F_PAD)) for e_i in range(NUM_EXPERT)],
        axis=-1)                                                 # (B, 384)

    # ---- 4) Expert Conv1d banks: pre-unfolded im2col matmuls, max-pool, gate mixture
    shared_parts = []
    for ki in range(NK):
        y = jnp.dot(unf_ref[ki], convw_ref[ki], preferred_element_type=f32)   # (B*S, 384)
        pooled = jnp.max(y.reshape(b_sz, s_len, EXP_PAD), axis=1)             # (B, 384)
        # bias is position-invariant -> add after the max-pool (identical result)
        pooled = pooled + pslab_ref[P_ROW_CONVB + ki:P_ROW_CONVB + ki + 1, :]
        mixed = pooled * gate_expanded
        shared_parts.append(mixed[:, 0:F_PAD]
                            + mixed[:, F_PAD:2 * F_PAD]
                            + mixed[:, 2 * F_PAD:3 * F_PAD])                  # (B, 128)
    shared = jnp.concatenate(shared_parts, axis=-1)              # (B, 640), pad lanes are 0

    # ---- 5) Classifier MLP: [Linear -> BatchNorm1d(eval) -> ReLU -> Dropout(id)]* -> Linear -> sigmoid
    hcl = shared
    w_row, in_rows, p_row = W_ROW_CLS0, SHARED_PAD, P_ROW_CLS
    for _ in MLP_DIMS:
        w = wslab_ref[w_row:w_row + in_rows, :]                  # (in_rows, 128) bf16
        bb = pslab_ref[p_row + 0:p_row + 1, 0:H_PAD]
        gamma = pslab_ref[p_row + 1:p_row + 2, 0:H_PAD]
        beta = pslab_ref[p_row + 2:p_row + 3, 0:H_PAD]
        rm = pslab_ref[p_row + 3:p_row + 4, 0:H_PAD]
        rv = pslab_ref[p_row + 4:p_row + 5, 0:H_PAD]
        hcl = jnp.dot(hcl.astype(bf16), w, preferred_element_type=f32) + bb
        hcl = (hcl - rm) * jax.lax.rsqrt(rv + BN_EPS) * gamma + beta
        hcl = jnp.maximum(hcl, 0.0)
        # Dropout: identity in eval mode.
        w_row += in_rows
        in_rows = H_PAD
        p_row += 5
    wf = wslab_ref[w_row:w_row + H_PAD, :]                       # column-replicated final weight
    bf = pslab_ref[P_ROW_CLSBF:P_ROW_CLSBF + 1, 0:H_PAD]
    logit = jnp.dot(hcl.astype(bf16), wf, preferred_element_type=f32) + bf    # (B, 128), identical cols
    out_ref[...] = jax.nn.sigmoid(logit)                         # lane-dense, unmasked store


# ------------------------------ wrapper glue ---------------------------------
def _full_spec(a):
    nd = a.ndim
    return pl.BlockSpec(a.shape, lambda i, _nd=nd: (0,) * _nd)


def _build_unfold(x):
    """im2col slabs (NK, B*S, 320) bf16; invalid positions edge-padded (duplicates of a valid
    window) so the in-kernel max-pool needs no masking; pad columns are zero."""
    b, s, d = x.shape
    slabs = []
    for k in KERNEL_SIZES:
        length = s - k + 1
        u = jnp.concatenate([x[:, j:j + length, :] for j in range(k)], axis=-1)  # (B, L, k*D)
        u = jnp.pad(u, ((0, 0), (0, s - length), (0, 0)), mode="edge")
        u = jnp.pad(u, ((0, 0), (0, 0), (0, UNF_COLS - k * d)))
        slabs.append(u.reshape(b * s, UNF_COLS))
    return jnp.stack(slabs, axis=0).astype(jnp.bfloat16)


def multidomain_fend_forward(packed, init_feature, A, idxs):
    del A  # accepted for signature parity; unused in the reference forward()
    x = init_feature.astype(jnp.float32)
    b = x.shape[0]
    unf = _build_unfold(x)
    args = [x, idxs.astype(jnp.int32), unf,
            packed["conv_w"], packed["wslab"], packed["pslab"]]
    out_padded = pl.pallas_call(
        mdfend_fused_kernel,
        grid=(1,),
        in_specs=[_full_spec(a) for a in args],
        out_specs=pl.BlockSpec((b, OUT_PAD), lambda i: (0, 0)),
        out_shape=jax.ShapeDtypeStruct((b, OUT_PAD), jnp.float32),
        compiler_params=pltpu.CompilerParams(dimension_semantics=("arbitrary",)),
    )(*args)
    return out_padded[:, 0]


# ------------------------------ parameter packing -----------------------------
def pack_params(p):
    """Pack natural-layout (PyTorch-like) params into lane-dense kernel slabs (one-time)."""
    f32 = jnp.float32

    # Conv weight slab (NK, 320, 384): row j*D+d, col e*128+f  <->  torch W_e[f, d, j].
    conv_slabs, convb_rows = [], []
    for ki, k in enumerate(KERNEL_SIZES):
        w = p["conv_w"][ki]                                      # (E, F, D, k)
        w = jnp.transpose(w, (3, 2, 0, 1))                       # (k, D, E, F)
        w = jnp.pad(w, ((0, 0), (0, 0), (0, 0), (0, F_PAD - N_FILTER)))
        w = w.reshape(k * EMB_DIM, EXP_PAD)
        w = jnp.pad(w, ((0, UNF_COLS - k * EMB_DIM), (0, 0)))
        conv_slabs.append(w)
        convb_rows.append(
            jnp.pad(p["conv_b"][ki], ((0, 0), (0, F_PAD - N_FILTER))).reshape(EXP_PAD))
    conv_w = jnp.stack(conv_slabs, axis=0).astype(jnp.bfloat16)

    # bf16 matmul-weight slab (W_ROWS, 128).
    def pad2(a, rows, cols):
        return jnp.pad(a, ((0, rows - a.shape[0]), (0, cols - a.shape[1])))

    h0 = MLP_DIMS[0]
    pieces = [
        pad2(p["domain_emb"] @ p["gate_w1"][:EMB_DIM, :], DOM_PAD, H_PAD),  # folded dom path
        pad2(p["gate_w1"][EMB_DIM:, :], EMB_DIM, H_PAD),
        pad2(p["gate_w2"], H_PAD, H_PAD),
    ]
    w0 = p["cls_layers"][0]["w"].reshape(NK, N_FILTER, h0)
    w0 = jnp.pad(w0, ((0, 0), (0, F_PAD - N_FILTER), (0, H_PAD - h0)))
    pieces.append(w0.reshape(SHARED_PAD, H_PAD))
    for layer in p["cls_layers"][1:]:
        pieces.append(pad2(layer["w"], H_PAD, H_PAD))
    wf_rep = jnp.broadcast_to(p["cls_wf"], (p["cls_wf"].shape[0], H_PAD))   # replicate columns
    pieces.append(pad2(wf_rep, H_PAD, H_PAD))
    wslab = jnp.concatenate(pieces, axis=0).astype(jnp.bfloat16)
    assert wslab.shape == (W_ROWS, H_PAD), wslab.shape

    # f32 vector-parameter slab (P_ROWS, 384).
    def vec_row(v):
        v = jnp.asarray(v, f32).reshape(-1)
        return jnp.pad(v, (0, EXP_PAD - v.shape[0]))

    rows = [vec_row(p["att_w"]),
            vec_row(jnp.reshape(p["att_b"], (1,))),
            vec_row(p["gate_b1"]),
            vec_row(jnp.concatenate(
                [p["gate_b2"], jnp.full((H_PAD - NUM_EXPERT,), -1e30, f32)]))]
    rows += convb_rows
    for layer in p["cls_layers"]:
        for name in ("b", "gamma", "beta", "rm", "rv"):
            rows.append(vec_row(layer[name]))
    rows.append(vec_row(jnp.full((H_PAD,), p["cls_bf"][0], f32)))
    assert len(rows) == P_ROW_CLSBF + 1
    while len(rows) < P_ROWS:
        rows.append(jnp.zeros((EXP_PAD,), f32))
    pslab = jnp.stack(rows, axis=0)

    return {"conv_w": conv_w, "wslab": wslab, "pslab": pslab}


# ------------------------------ parameter init -------------------------------
def init_params(key):
    keys = iter(jax.random.split(key, 64))
    f32 = jnp.float32

    def nrm(shape, scale=0.1):
        return (scale * jax.random.normal(next(keys), shape)).astype(f32)

    p = {}
    p["att_w"] = nrm((EMB_DIM,))
    p["att_b"] = nrm((), 0.05)
    p["domain_emb"] = nrm((DOMAIN_NUM, EMB_DIM), 1.0)
    hidden = MLP_DIMS[-1]
    p["gate_w1"] = nrm((2 * EMB_DIM, hidden))
    p["gate_b1"] = nrm((hidden,), 0.05)
    p["gate_w2"] = nrm((hidden, NUM_EXPERT))
    p["gate_b2"] = nrm((NUM_EXPERT,), 0.05)
    # torch Conv1d weights per kernel size, stacked over experts: (E, F, D, k), bias (E, F).
    p["conv_w"] = [nrm((NUM_EXPERT, N_FILTER, EMB_DIM, k)) for k in KERNEL_SIZES]
    p["conv_b"] = [nrm((NUM_EXPERT, N_FILTER), 0.05) for _ in KERNEL_SIZES]
    # Classifier MLP(320, mlp_dims): [Linear -> BN -> ReLU -> Dropout]* -> Linear(->1).
    in_dim = TOTAL_FILTERS
    layers = []
    for dim in MLP_DIMS:
        layers.append(dict(
            w=nrm((in_dim, dim)), b=nrm((dim,), 0.05),
            gamma=1.0 + nrm((dim,), 0.05), beta=nrm((dim,), 0.05),
            rm=nrm((dim,), 0.05),
            rv=1.0 + 0.2 * jax.random.uniform(next(keys), (dim,), dtype=f32)))
        in_dim = dim
    p["cls_layers"] = layers
    p["cls_wf"] = nrm((in_dim, 1))
    p["cls_bf"] = nrm((1,), 0.05)
    return p


# ------------------------------ pure-JAX reference ----------------------------
def reference_forward(p, init_feature, idxs):
    x = init_feature.astype(jnp.float32)
    b, s, d = x.shape
    scores = jnp.einsum("bsd,d->bs", x, p["att_w"]) + p["att_b"]
    mask = jnp.sum(x, axis=-1) != 0
    scores = jnp.where(mask, scores, -jnp.inf)
    att = jax.nn.softmax(scores, axis=-1)
    feature = jnp.einsum("bs,bsd->bd", att, x)
    dom = p["domain_emb"][idxs[:, 0]]
    gate_in = jnp.concatenate([dom, feature], axis=-1)
    h = jax.nn.relu(gate_in @ p["gate_w1"] + p["gate_b1"])
    gate = jax.nn.softmax(h @ p["gate_w2"] + p["gate_b2"], axis=-1)
    outs = []
    for e in range(NUM_EXPERT):
        feats = []
        for ki, k in enumerate(KERNEL_SIZES):
            w = p["conv_w"][ki][e]                               # (F, D, k)
            bias = p["conv_b"][ki][e]                            # (F,)
            length = s - k + 1
            unf = jnp.stack([x[:, j:j + length, :] for j in range(k)], axis=-1)  # (B, L, D, k)
            y = jnp.einsum("bldj,fdj->blf", unf, w) + bias
            feats.append(jnp.max(y, axis=1))
        outs.append(jnp.concatenate(feats, axis=-1))             # (B, 320)
    shared = sum(gate[:, e:e + 1] * outs[e] for e in range(NUM_EXPERT))
    hcl = shared
    for layer in p["cls_layers"]:
        hcl = hcl @ layer["w"] + layer["b"]
        hcl = (hcl - layer["rm"]) * jax.lax.rsqrt(layer["rv"] + BN_EPS) * layer["gamma"] + layer["beta"]
        hcl = jax.nn.relu(hcl)
    logit = hcl @ p["cls_wf"] + p["cls_bf"]
    return jax.nn.sigmoid(logit[:, 0])


# ----------------------------------- main ------------------------------------
if __name__ == "__main__":
    root = jax.random.PRNGKey(0)
    k_par, k_x, k_idx = jax.random.split(root, 3)

    params = init_params(k_par)
    packed = pack_params(params)

    init_feature = jax.random.normal(k_x, (B, S, EMB_DIM), dtype=jnp.float32)
    # Zero one sequence position to exercise the mask path (sum(dim=-1) == 0).
    init_feature = init_feature.at[0, 5, :].set(0.0)

    A = jnp.zeros((B, S, S), dtype=jnp.float32)   # unused by the reference forward
    idxs = jax.random.randint(k_idx, (B, 1), 0, DOMAIN_NUM, dtype=jnp.int32)

    fwd = jax.jit(multidomain_fend_forward)
    out = jax.block_until_ready(fwd(params := packed, init_feature, A, idxs))

    assert out.shape == (B,), out.shape
    assert bool(jnp.all(jnp.isfinite(out)))
    assert bool(jnp.all((out >= 0.0) & (out <= 1.0)))

    # Numerics check vs. f32 pure-JAX reference (kernel uses bf16 matmul operands).
    ref = jax.block_until_ready(reference_forward(init_params(k_par), init_feature, idxs))
    assert float(jnp.max(jnp.abs(out - ref))) < 8e-2, (out, ref)

    print("KERNEL_OK")
</pallas_src>

<mosaic_0001>
module attributes {stable_mosaic.version = 11 : i64} {
  func.func @mdfend_fused_kernel(%arg0: i32, %arg1: memref<4x16x32xf32, #tpu.memory_space<vmem>>, %arg2: memref<4x1xi32, #tpu.memory_space<vmem>>, %arg3: memref<5x64x320xbf16, #tpu.memory_space<vmem>>, %arg4: memref<5x320x384xbf16, #tpu.memory_space<vmem>>, %arg5: memref<944x128xbf16, #tpu.memory_space<vmem>>, %arg6: memref<16x384xf32, #tpu.memory_space<vmem>>, %arg7: memref<4x128xf32, #tpu.memory_space<vmem>>) attributes {dimension_semantics = [#tpu.dimension_semantics<arbitrary>], iteration_bounds = array<i64: 1>, scalar_prefetch = 0 : i64, scratch_operands = 0 : i64, tpu.core_type = #tpu.core_type<tc>, window_params = [{pipeline_mode = #tpu.pipeline_mode<synchronous>, transform_indices = @transform_0, window_bounds = array<i64: 4, 16, 32>}, {pipeline_mode = #tpu.pipeline_mode<synchronous>, transform_indices = @transform_1, window_bounds = array<i64: 4, 1>}, {pipeline_mode = #tpu.pipeline_mode<synchronous>, transform_indices = @transform_2, window_bounds = array<i64: 5, 64, 320>}, {pipeline_mode = #tpu.pipeline_mode<synchronous>, transform_indices = @transform_3, window_bounds = array<i64: 5, 320, 384>}, {pipeline_mode = #tpu.pipeline_mode<synchronous>, transform_indices = @transform_4, window_bounds = array<i64: 944, 128>}, {pipeline_mode = #tpu.pipeline_mode<synchronous>, transform_indices = @transform_5, window_bounds = array<i64: 16, 384>}, {pipeline_mode = #tpu.pipeline_mode<synchronous>, transform_indices = @transform_6, window_bounds = array<i64: 4, 128>}]} {
    %c0 = arith.constant 0 : index
    %c0_0 = arith.constant 0 : index
    %c0_1 = arith.constant 0 : index
    %0 = vector.load %arg1[%c0, %c0_0, %c0_1] : memref<4x16x32xf32, #tpu.memory_space<vmem>>, vector<4x16x32xf32>
    %c0_2 = arith.constant 0 : index
    %c0_3 = arith.constant 0 : index
    %1 = vector.load %arg6[%c0_2, %c0_3] : memref<16x384xf32, #tpu.memory_space<vmem>>, vector<1x32xf32>
    %c1 = arith.constant 1 : index
    %c0_4 = arith.constant 0 : index
    %2 = vector.load %arg6[%c1, %c0_4] : memref<16x384xf32, #tpu.memory_space<vmem>>, vector<1x1xf32>
    %3 = vector.shape_cast %1 : vector<1x32xf32> to vector<1x1x32xf32>
    %4 = vector.broadcast %3 : vector<1x1x32xf32> to vector<4x16x32xf32>
    %5 = arith.mulf %0, %4 : vector<4x16x32xf32>
    %cst = arith.constant dense<0.000000e+00> : vector<4x16xf32>
    %6 = vector.multi_reduction <add>, %5, %cst [2] : vector<4x16x32xf32> to vector<4x16xf32>
    %7 = vector.broadcast %2 : vector<1x1xf32> to vector<4x16xf32>
    %8 = arith.addf %6, %7 : vector<4x16xf32>
    %cst_5 = arith.constant dense<0.000000e+00> : vector<4x16xf32>
    %9 = vector.multi_reduction <add>, %0, %cst_5 [2] : vector<4x16x32xf32> to vector<4x16xf32>
    %cst_6 = arith.constant 0.000000e+00 : f32
    %10 = vector.broadcast %cst_6 : f32 to vector<4x16xf32>
    %11 = arith.cmpf one, %9, %10 : vector<4x16xf32>
    %cst_7 = arith.constant 0xFF800000 : f32
    %12 = vector.broadcast %cst_7 : f32 to vector<4x16xf32>
    %13 = arith.select %11, %8, %12 : vector<4x16xi1>, vector<4x16xf32>
    %cst_8 = arith.constant dense<0xFF800000> : vector<4xf32>
    %14 = vector.multi_reduction <maximumf>, %13, %cst_8 [1] : vector<4x16xf32> to vector<4xf32>
    %15 = vector.shape_cast %14 : vector<4xf32> to vector<4x1xf32>
    %16 = vector.broadcast %15 : vector<4x1xf32> to vector<4x16xf32>
    %17 = arith.subf %13, %16 : vector<4x16xf32>
    %18 = math.exp %17 : vector<4x16xf32>
    %cst_9 = arith.constant dense<0.000000e+00> : vector<4xf32>
    %19 = vector.multi_reduction <add>, %18, %cst_9 [1] : vector<4x16xf32> to vector<4xf32>
    %20 = vector.shape_cast %19 : vector<4xf32> to vector<4x1xf32>
    %21 = vector.broadcast %20 : vector<4x1xf32> to vector<4x16xf32>
    %22 = arith.divf %18, %21 : vector<4x16xf32>
    %23 = vector.shape_cast %22 : vector<4x16xf32> to vector<4x16x1xf32>
    %24 = vector.broadcast %23 : vector<4x16x1xf32> to vector<4x16x32xf32>
    %25 = arith.mulf %24, %0 : vector<4x16x32xf32>
    %cst_10 = arith.constant dense<0.000000e+00> : vector<4x32xf32>
    %26 = vector.multi_reduction <add>, %25, %cst_10 [1] : vector<4x16x32xf32> to vector<4x32xf32>
    %c0_11 = arith.constant 0 : index
    %c0_12 = arith.constant 0 : index
    %27 = vector.load %arg2[%c0_11, %c0_12] : memref<4x1xi32, #tpu.memory_space<vmem>>, vector<4x1xi32>
    %28 = tpu.iota {dimensions = array<i32: 1>} : vector<4x16xi32>
    %29 = vector.broadcast %27 : vector<4x1xi32> to vector<4x16xi32>
    %30 = arith.cmpi eq, %28, %29 : vector<4x16xi32>
    %31 = arith.extui %30 : vector<4x16xi1> to vector<4x16xi32>
    %32 = arith.sitofp %31 : vector<4x16xi32> to vector<4x16xf32>
    %33 = arith.truncf %32 : vector<4x16xf32> to vector<4x16xbf16>
    %c0_13 = arith.constant 0 : index
    %c0_14 = arith.constant 0 : index
    %34 = vector.load %arg5[%c0_13, %c0_14] : memref<944x128xbf16, #tpu.memory_space<vmem>>, vector<16x128xbf16>
    %c16 = arith.constant 16 : index
    %c0_15 = arith.constant 0 : index
    %35 = vector.load %arg5[%c16, %c0_15] : memref<944x128xbf16, #tpu.memory_space<vmem>>, vector<32x128xbf16>
    %c2 = arith.constant 2 : index
    %c0_16 = arith.constant 0 : index
    %36 = vector.load %arg6[%c2, %c0_16] : memref<16x384xf32, #tpu.memory_space<vmem>>, vector<1x128xf32>
    %cst_17 = arith.constant dense<0.000000e+00> : vector<4x128xf32>
    %37 = tpu.matmul %33, %34, %cst_17 {dimension_numbers = #tpu.dot_dimension_numbers<[1], [0], [0], [1], [0, 0, 1, 1], [], []>} : vector<4x16xbf16>, vector<16x128xbf16>, vector<4x128xf32> -> vector<4x128xf32>
    %38 = arith.truncf %26 : vector<4x32xf32> to vector<4x32xbf16>
    %cst_18 = arith.constant dense<0.000000e+00> : vector<4x128xf32>
    %39 = tpu.matmul %38, %35, %cst_18 {dimension_numbers = #tpu.dot_dimension_numbers<[1], [0], [0], [1], [0, 0, 1, 1], [], []>} : vector<4x32xbf16>, vector<32x128xbf16>, vector<4x128xf32> -> vector<4x128xf32>
    %40 = arith.addf %37, %39 : vector<4x128xf32>
    %41 = vector.broadcast %36 : vector<1x128xf32> to vector<4x128xf32>
    %42 = arith.addf %40, %41 : vector<4x128xf32>
    %cst_19 = arith.constant 0.000000e+00 : f32
    %43 = vector.broadcast %cst_19 : f32 to vector<4x128xf32>
    %44 = arith.maximumf %42, %43 : vector<4x128xf32>
    %c48 = arith.constant 48 : index
    %c0_20 = arith.constant 0 : index
    %45 = vector.load %arg5[%c48, %c0_20] : memref<944x128xbf16, #tpu.memory_space<vmem>>, vector<128x128xbf16>
    %c3 = arith.constant 3 : index
    %c0_21 = arith.constant 0 : index
    %46 = vector.load %arg6[%c3, %c0_21] : memref<16x384xf32, #tpu.memory_space<vmem>>, vector<1x128xf32>
    %47 = arith.truncf %44 : vector<4x128xf32> to vector<4x128xbf16>
    %cst_22 = arith.constant dense<0.000000e+00> : vector<4x128xf32>
    %48 = tpu.matmul %47, %45, %cst_22 {dimension_numbers = #tpu.dot_dimension_numbers<[1], [0], [0], [1], [0, 0, 1, 1], [], []>} : vector<4x128xbf16>, vector<128x128xbf16>, vector<4x128xf32> -> vector<4x128xf32>
    %49 = vector.broadcast %46 : vector<1x128xf32> to vector<4x128xf32>
    %50 = arith.addf %48, %49 : vector<4x128xf32>
    %cst_23 = arith.constant dense<0xFF800000> : vector<4xf32>
    %51 = vector.multi_reduction <maximumf>, %50, %cst_23 [1] : vector<4x128xf32> to vector<4xf32>
    %52 = vector.shape_cast %51 : vector<4xf32> to vector<4x1xf32>
    %53 = vector.broadcast %52 : vector<4x1xf32> to vector<4x128xf32>
    %54 = arith.subf %50, %53 : vector<4x128xf32>
    %55 = math.exp %54 : vector<4x128xf32>
    %cst_24 = arith.constant dense<0.000000e+00> : vector<4xf32>
    %56 = vector.multi_reduction <add>, %55, %cst_24 [1] : vector<4x128xf32> to vector<4xf32>
    %57 = vector.shape_cast %56 : vector<4xf32> to vector<4x1xf32>
    %58 = vector.broadcast %57 : vector<4x1xf32> to vector<4x128xf32>
    %59 = arith.divf %55, %58 : vector<4x128xf32>
    %60 = vector.extract_strided_slice %59 {offsets = [0, 0], sizes = [4, 1], strides = [1, 1]} : vector<4x128xf32> to vector<4x1xf32>
    %61 = vector.shape_cast %60 : vector<4x1xf32> to vector<4x1xf32>
    %62 = vector.broadcast %61 : vector<4x1xf32> to vector<4x128xf32>
    %63 = vector.extract_strided_slice %59 {offsets = [0, 1], sizes = [4, 1], strides = [1, 1]} : vector<4x128xf32> to vector<4x1xf32>
    %64 = vector.shape_cast %63 : vector<4x1xf32> to vector<4x1xf32>
    %65 = vector.broadcast %64 : vector<4x1xf32> to vector<4x128xf32>
    %66 = vector.extract_strided_slice %59 {offsets = [0, 2], sizes = [4, 1], strides = [1, 1]} : vector<4x128xf32> to vector<4x1xf32>
    %67 = vector.shape_cast %66 : vector<4x1xf32> to vector<4x1xf32>
    %68 = vector.broadcast %67 : vector<4x1xf32> to vector<4x128xf32>
    %69 = tpu.concatenate %62, %65, %68 in 1 : vector<4x128xf32>, vector<4x128xf32>, vector<4x128xf32> -> vector<4x384xf32>
    %c0_25 = arith.constant 0 : index
    %c0_26 = arith.constant 0 : index
    %c0_27 = arith.constant 0 : index
    %70 = vector.load %arg3[%c0_25, %c0_26, %c0_27] : memref<5x64x320xbf16, #tpu.memory_space<vmem>>, vector<1x64x320xbf16>
    %71 = vector.shape_cast %70 : vector<1x64x320xbf16> to vector<64x320xbf16>
    %c0_28 = arith.constant 0 : index
    %c0_29 = arith.constant 0 : index
    %c0_30 = arith.constant 0 : index
    %72 = vector.load %arg4[%c0_28, %c0_29, %c0_30] : memref<5x320x384xbf16, #tpu.memory_space<vmem>>, vector<1x320x384xbf16>
    %73 = vector.shape_cast %72 : vector<1x320x384xbf16> to vector<320x384xbf16>
    %cst_31 = arith.constant dense<0.000000e+00> : vector<64x384xf32>
    %74 = tpu.matmul %71, %73, %cst_31 {dimension_numbers = #tpu.dot_dimension_numbers<[1], [0], [0], [1], [0, 0, 1, 1], [], []>} : vector<64x320xbf16>, vector<320x384xbf16>, vector<64x384xf32> -> vector<64x384xf32>
    %75 = vector.shape_cast %74 : vector<64x384xf32> to vector<4x16x384xf32>
    %cst_32 = arith.constant dense<0xFF800000> : vector<4x384xf32>
    %76 = vector.multi_reduction <maximumf>, %75, %cst_32 [1] : vector<4x16x384xf32> to vector<4x384xf32>
    %c4 = arith.constant 4 : index
    %c0_33 = arith.constant 0 : index
    %77 = vector.load %arg6[%c4, %c0_33] : memref<16x384xf32, #tpu.memory_space<vmem>>, vector<1x384xf32>
    %78 = vector.broadcast %77 : vector<1x384xf32> to vector<4x384xf32>
    %79 = arith.addf %76, %78 : vector<4x384xf32>
    %80 = arith.mulf %79, %69 : vector<4x384xf32>
    %81 = vector.extract_strided_slice %80 {offsets = [0, 0], sizes = [4, 128], strides = [1, 1]} : vector<4x384xf32> to vector<4x128xf32>
    %82 = vector.extract_strided_slice %80 {offsets = [0, 128], sizes = [4, 128], strides = [1, 1]} : vector<4x384xf32> to vector<4x128xf32>
    %83 = arith.addf %81, %82 : vector<4x128xf32>
    %84 = vector.extract_strided_slice %80 {offsets = [0, 256], sizes = [4, 128], strides = [1, 1]} : vector<4x384xf32> to vector<4x128xf32>
    %85 = arith.addf %83, %84 : vector<4x128xf32>
    %c1_34 = arith.constant 1 : index
    %c0_35 = arith.constant 0 : index
    %c0_36 = arith.constant 0 : index
    %86 = vector.load %arg3[%c1_34, %c0_35, %c0_36] : memref<5x64x320xbf16, #tpu.memory_space<vmem>>, vector<1x64x320xbf16>
    %87 = vector.shape_cast %86 : vector<1x64x320xbf16> to vector<64x320xbf16>
    %c1_37 = arith.constant 1 : index
    %c0_38 = arith.constant 0 : index
    %c0_39 = arith.constant 0 : index
    %88 = vector.load %arg4[%c1_37, %c0_38, %c0_39] : memref<5x320x384xbf16, #tpu.memory_space<vmem>>, vector<1x320x384xbf16>
    %89 = vector.shape_cast %88 : vector<1x320x384xbf16> to vector<320x384xbf16>
    %cst_40 = arith.constant dense<0.000000e+00> : vector<64x384xf32>
    %90 = tpu.matmul %87, %89, %cst_40 {dimension_numbers = #tpu.dot_dimension_numbers<[1], [0], [0], [1], [0, 0, 1, 1], [], []>} : vector<64x320xbf16>, vector<320x384xbf16>, vector<64x384xf32> -> vector<64x384xf32>
    %91 = vector.shape_cast %90 : vector<64x384xf32> to vector<4x16x384xf32>
    %cst_41 = arith.constant dense<0xFF800000> : vector<4x384xf32>
    %92 = vector.multi_reduction <maximumf>, %91, %cst_41 [1] : vector<4x16x384xf32> to vector<4x384xf32>
    %c5 = arith.constant 5 : index
    %c0_42 = arith.constant 0 : index
    %93 = vector.load %arg6[%c5, %c0_42] : memref<16x384xf32, #tpu.memory_space<vmem>>, vector<1x384xf32>
    %94 = vector.broadcast %93 : vector<1x384xf32> to vector<4x384xf32>
    %95 = arith.addf %92, %94 : vector<4x384xf32>
    %96 = arith.mulf %95, %69 : vector<4x384xf32>
    %97 = vector.extract_strided_slice %96 {offsets = [0, 0], sizes = [4, 128], strides = [1, 1]} : vector<4x384xf32> to vector<4x128xf32>
    %98 = vector.extract_strided_slice %96 {offsets = [0, 128], sizes = [4, 128], strides = [1, 1]} : vector<4x384xf32> to vector<4x128xf32>
    %99 = arith.addf %97, %98 : vector<4x128xf32>
    %100 = vector.extract_strided_slice %96 {offsets = [0, 256], sizes = [4, 128], strides = [1, 1]} : vector<4x384xf32> to vector<4x128xf32>
    %101 = arith.addf %99, %100 : vector<4x128xf32>
    %c2_43 = arith.constant 2 : index
    %c0_44 = arith.constant 0 : index
    %c0_45 = arith.constant 0 : index
    %102 = vector.load %arg3[%c2_43, %c0_44, %c0_45] : memref<5x64x320xbf16, #tpu.memory_space<vmem>>, vector<1x64x320xbf16>
    %103 = vector.shape_cast %102 : vector<1x64x320xbf16> to vector<64x320xbf16>
    %c2_46 = arith.constant 2 : index
    %c0_47 = arith.constant 0 : index
    %c0_48 = arith.constant 0 : index
    %104 = vector.load %arg4[%c2_46, %c0_47, %c0_48] : memref<5x320x384xbf16, #tpu.memory_space<vmem>>, vector<1x320x384xbf16>
    %105 = vector.shape_cast %104 : vector<1x320x384xbf16> to vector<320x384xbf16>
    %cst_49 = arith.constant dense<0.000000e+00> : vector<64x384xf32>
    %106 = tpu.matmul %103, %105, %cst_49 {dimension_numbers = #tpu.dot_dimension_numbers<[1], [0], [0], [1], [0, 0, 1, 1], [], []>} : vector<64x320xbf16>, vector<320x384xbf16>, vector<64x384xf32> -> vector<64x384xf32>
    %107 = vector.shape_cast %106 : vector<64x384xf32> to vector<4x16x384xf32>
    %cst_50 = arith.constant dense<0xFF800000> : vector<4x384xf32>
    %108 = vector.multi_reduction <maximumf>, %107, %cst_50 [1] : vector<4x16x384xf32> to vector<4x384xf32>
    %c6 = arith.constant 6 : index
    %c0_51 = arith.constant 0 : index
    %109 = vector.load %arg6[%c6, %c0_51] : memref<16x384xf32, #tpu.memory_space<vmem>>, vector<1x384xf32>
    %110 = vector.broadcast %109 : vector<1x384xf32> to vector<4x384xf32>
    %111 = arith.addf %108, %110 : vector<4x384xf32>
    %112 = arith.mulf %111, %69 : vector<4x384xf32>
    %113 = vector.extract_strided_slice %112 {offsets = [0, 0], sizes = [4, 128], strides = [1, 1]} : vector<4x384xf32> to vector<4x128xf32>
    %114 = vector.extract_strided_slice %112 {offsets = [0, 128], sizes = [4, 128], strides = [1, 1]} : vector<4x384xf32> to vector<4x128xf32>
    %115 = arith.addf %113, %114 : vector<4x128xf32>
    %116 = vector.extract_strided_slice %112 {offsets = [0, 256], sizes = [4, 128], strides = [1, 1]} : vector<4x384xf32> to vector<4x128xf32>
    %117 = arith.addf %115, %116 : vector<4x128xf32>
    %c3_52 = arith.constant 3 : index
    %c0_53 = arith.constant 0 : index
    %c0_54 = arith.constant 0 : index
    %118 = vector.load %arg3[%c3_52, %c0_53, %c0_54] : memref<5x64x320xbf16, #tpu.memory_space<vmem>>, vector<1x64x320xbf16>
    %119 = vector.shape_cast %118 : vector<1x64x320xbf16> to vector<64x320xbf16>
    %c3_55 = arith.constant 3 : index
    %c0_56 = arith.constant 0 : index
    %c0_57 = arith.constant 0 : index
    %120 = vector.load %arg4[%c3_55, %c0_56, %c0_57] : memref<5x320x384xbf16, #tpu.memory_space<vmem>>, vector<1x320x384xbf16>
    %121 = vector.shape_cast %120 : vector<1x320x384xbf16> to vector<320x384xbf16>
    %cst_58 = arith.constant dense<0.000000e+00> : vector<64x384xf32>
    %122 = tpu.matmul %119, %121, %cst_58 {dimension_numbers = #tpu.dot_dimension_numbers<[1], [0], [0], [1], [0, 0, 1, 1], [], []>} : vector<64x320xbf16>, vector<320x384xbf16>, vector<64x384xf32> -> vector<64x384xf32>
    %123 = vector.shape_cast %122 : vector<64x384xf32> to vector<4x16x384xf32>
    %cst_59 = arith.constant dense<0xFF800000> : vector<4x384xf32>
    %124 = vector.multi_reduction <maximumf>, %123, %cst_59 [1] : vector<4x16x384xf32> to vector<4x384xf32>
    %c7 = arith.constant 7 : index
    %c0_60 = arith.constant 0 : index
    %125 = vector.load %arg6[%c7, %c0_60] : memref<16x384xf32, #tpu.memory_space<vmem>>, vector<1x384xf32>
    %126 = vector.broadcast %125 : vector<1x384xf32> to vector<4x384xf32>
    %127 = arith.addf %124, %126 : vector<4x384xf32>
    %128 = arith.mulf %127, %69 : vector<4x384xf32>
    %129 = vector.extract_strided_slice %128 {offsets = [0, 0], sizes = [4, 128], strides = [1, 1]} : vector<4x384xf32> to vector<4x128xf32>
    %130 = vector.extract_strided_slice %128 {offsets = [0, 128], sizes = [4, 128], strides = [1, 1]} : vector<4x384xf32> to vector<4x128xf32>
    %131 = arith.addf %129, %130 : vector<4x128xf32>
    %132 = vector.extract_strided_slice %128 {offsets = [0, 256], sizes = [4, 128], strides = [1, 1]} : vector<4x384xf32> to vector<4x128xf32>
    %133 = arith.addf %131, %132 : vector<4x128xf32>
    %c4_61 = arith.constant 4 : index
    %c0_62 = arith.constant 0 : index
    %c0_63 = arith.constant 0 : index
    %134 = vector.load %arg3[%c4_61, %c0_62, %c0_63] : memref<5x64x320xbf16, #tpu.memory_space<vmem>>, vector<1x64x320xbf16>
    %135 = vector.shape_cast %134 : vector<1x64x320xbf16> to vector<64x320xbf16>
    %c4_64 = arith.constant 4 : index
    %c0_65 = arith.constant 0 : index
    %c0_66 = arith.constant 0 : index
    %136 = vector.load %arg4[%c4_64, %c0_65, %c0_66] : memref<5x320x384xbf16, #tpu.memory_space<vmem>>, vector<1x320x384xbf16>
    %137 = vector.shape_cast %136 : vector<1x320x384xbf16> to vector<320x384xbf16>
    %cst_67 = arith.constant dense<0.000000e+00> : vector<64x384xf32>
    %138 = tpu.matmul %135, %137, %cst_67 {dimension_numbers = #tpu.dot_dimension_numbers<[1], [0], [0], [1], [0, 0, 1, 1], [], []>} : vector<64x320xbf16>, vector<320x384xbf16>, vector<64x384xf32> -> vector<64x384xf32>
    %139 = vector.shape_cast %138 : vector<64x384xf32> to vector<4x16x384xf32>
    %cst_68 = arith.constant dense<0xFF800000> : vector<4x384xf32>
    %140 = vector.multi_reduction <maximumf>, %139, %cst_68 [1] : vector<4x16x384xf32> to vector<4x384xf32>
    %c8 = arith.constant 8 : index
    %c0_69 = arith.constant 0 : index
    %141 = vector.load %arg6[%c8, %c0_69] : memref<16x384xf32, #tpu.memory_space<vmem>>, vector<1x384xf32>
    %142 = vector.broadcast %141 : vector<1x384xf32> to vector<4x384xf32>
    %143 = arith.addf %140, %142 : vector<4x384xf32>
    %144 = arith.mulf %143, %69 : vector<4x384xf32>
    %145 = vector.extract_strided_slice %144 {offsets = [0, 0], sizes = [4, 128], strides = [1, 1]} : vector<4x384xf32> to vector<4x128xf32>
    %146 = vector.extract_strided_slice %144 {offsets = [0, 128], sizes = [4, 128], strides = [1, 1]} : vector<4x384xf32> to vector<4x128xf32>
    %147 = arith.addf %145, %146 : vector<4x128xf32>
    %148 = vector.extract_strided_slice %144 {offsets = [0, 256], sizes = [4, 128], strides = [1, 1]} : vector<4x384xf32> to vector<4x128xf32>
    %149 = arith.addf %147, %148 : vector<4x128xf32>
    %150 = tpu.concatenate %85, %101, %117, %133, %149 in 1 : vector<4x128xf32>, vector<4x128xf32>, vector<4x128xf32>, vector<4x128xf32>, vector<4x128xf32> -> vector<4x640xf32>
    %c176 = arith.constant 176 : index
    %c0_70 = arith.constant 0 : index
    %151 = vector.load %arg5[%c176, %c0_70] : memref<944x128xbf16, #tpu.memory_space<vmem>>, vector<640x128xbf16>
    %c9 = arith.constant 9 : index
    %c0_71 = arith.constant 0 : index
    %152 = vector.load %arg6[%c9, %c0_71] : memref<16x384xf32, #tpu.memory_space<vmem>>, vector<1x128xf32>
    %c10 = arith.constant 10 : index
    %c0_72 = arith.constant 0 : index
    %153 = vector.load %arg6[%c10, %c0_72] : memref<16x384xf32, #tpu.memory_space<vmem>>, vector<1x128xf32>
    %c11 = arith.constant 11 : index
    %c0_73 = arith.constant 0 : index
    %154 = vector.load %arg6[%c11, %c0_73] : memref<16x384xf32, #tpu.memory_space<vmem>>, vector<1x128xf32>
    %c12 = arith.constant 12 : index
    %c0_74 = arith.constant 0 : index
    %155 = vector.load %arg6[%c12, %c0_74] : memref<16x384xf32, #tpu.memory_space<vmem>>, vector<1x128xf32>
    %c13 = arith.constant 13 : index
    %c0_75 = arith.constant 0 : index
    %156 = vector.load %arg6[%c13, %c0_75] : memref<16x384xf32, #tpu.memory_space<vmem>>, vector<1x128xf32>
    %157 = arith.truncf %150 : vector<4x640xf32> to vector<4x640xbf16>
    %cst_76 = arith.constant dense<0.000000e+00> : vector<4x128xf32>
    %158 = tpu.matmul %157, %151, %cst_76 {dimension_numbers = #tpu.dot_dimension_numbers<[1], [0], [0], [1], [0, 0, 1, 1], [], []>} : vector<4x640xbf16>, vector<640x128xbf16>, vector<4x128xf32> -> vector<4x128xf32>
    %159 = vector.broadcast %152 : vector<1x128xf32> to vector<4x128xf32>
    %160 = arith.addf %158, %159 : vector<4x128xf32>
    %161 = vector.broadcast %155 : vector<1x128xf32> to vector<4x128xf32>
    %162 = arith.subf %160, %161 : vector<4x128xf32>
    %cst_77 = arith.constant 9.99999974E-6 : f32
    %163 = vector.broadcast %cst_77 : f32 to vector<1x128xf32>
    %164 = arith.addf %156, %163 : vector<1x128xf32>
    %165 = math.rsqrt %164 : vector<1x128xf32>
    %166 = vector.broadcast %165 : vector<1x128xf32> to vector<4x128xf32>
    %167 = arith.mulf %162, %166 : vector<4x128xf32>
    %168 = vector.broadcast %153 : vector<1x128xf32> to vector<4x128xf32>
    %169 = arith.mulf %167, %168 : vector<4x128xf32>
    %170 = vector.broadcast %154 : vector<1x128xf32> to vector<4x128xf32>
    %171 = arith.addf %169, %170 : vector<4x128xf32>
    %cst_78 = arith.constant 0.000000e+00 : f32
    %172 = vector.broadcast %cst_78 : f32 to vector<4x128xf32>
    %173 = arith.maximumf %171, %172 : vector<4x128xf32>
    %c816 = arith.constant 816 : index
    %c0_79 = arith.constant 0 : index
    %174 = vector.load %arg5[%c816, %c0_79] : memref<944x128xbf16, #tpu.memory_space<vmem>>, vector<128x128xbf16>
    %c14 = arith.constant 14 : index
    %c0_80 = arith.constant 0 : index
    %175 = vector.load %arg6[%c14, %c0_80] : memref<16x384xf32, #tpu.memory_space<vmem>>, vector<1x128xf32>
    %176 = arith.truncf %173 : vector<4x128xf32> to vector<4x128xbf16>
    %cst_81 = arith.constant dense<0.000000e+00> : vector<4x128xf32>
    %177 = tpu.matmul %176, %174, %cst_81 {dimension_numbers = #tpu.dot_dimension_numbers<[1], [0], [0], [1], [0, 0, 1, 1], [], []>} : vector<4x128xbf16>, vector<128x128xbf16>, vector<4x128xf32> -> vector<4x128xf32>
    %178 = vector.broadcast %175 : vector<1x128xf32> to vector<4x128xf32>
    %179 = arith.addf %177, %178 : vector<4x128xf32>
    %180 = arith.negf %179 : vector<4x128xf32>
    %181 = math.exp %180 : vector<4x128xf32>
    %cst_82 = arith.constant 1.000000e+00 : f32
    %182 = vector.broadcast %cst_82 : f32 to vector<4x128xf32>
    %183 = arith.addf %182, %181 : vector<4x128xf32>
    %184 = arith.divf %182, %183 : vector<4x128xf32>
    %c0_83 = arith.constant 0 : index
    %c0_84 = arith.constant 0 : index
    %185 = vector.load %arg7[%c0_83, %c0_84] : memref<4x128xf32, #tpu.memory_space<vmem>>, vector<4x128xf32>
    tpu.vector_store %arg7[%c0_83, %c0_84], %184 {strides = array<i32>} : memref<4x128xf32, #tpu.memory_space<vmem>>, vector<4x128xf32>,
    return
  }
  func.func @transform_0(%arg0: i32) -> (i32, i32, i32) {
    %c0_i32 = arith.constant 0 : i32
    %c0_i32_0 = arith.constant 0 : i32
    %c0_i32_1 = arith.constant 0 : i32
    %c0_i32_2 = arith.constant 0 : i32
    return %c0_i32, %c0_i32_0, %c0_i32_1 : i32, i32, i32
  }
  func.func @transform_1(%arg0: i32) -> (i32, i32) {
    %c0_i32 = arith.constant 0 : i32
    %c0_i32_0 = arith.constant 0 : i32
    %c0_i32_1 = arith.constant 0 : i32
    return %c0_i32, %c0_i32_0 : i32, i32
  }
  func.func @transform_2(%arg0: i32) -> (i32, i32, i32) {
    %c0_i32 = arith.constant 0 : i32
    %c0_i32_0 = arith.constant 0 : i32
    %c0_i32_1 = arith.constant 0 : i32
    %c0_i32_2 = arith.constant 0 : i32
    return %c0_i32, %c0_i32_0, %c0_i32_1 : i32, i32, i32
  }
  func.func @transform_3(%arg0: i32) -> (i32, i32, i32) {
    %c0_i32 = arith.constant 0 : i32
    %c0_i32_0 = arith.constant 0 : i32
    %c0_i32_1 = arith.constant 0 : i32
    %c0_i32_2 = arith.constant 0 : i32
    return %c0_i32, %c0_i32_0, %c0_i32_1 : i32, i32, i32
  }
  func.func @transform_4(%arg0: i32) -> (i32, i32) {
    %c0_i32 = arith.constant 0 : i32
    %c0_i32_0 = arith.constant 0 : i32
    %c0_i32_1 = arith.constant 0 : i32
    return %c0_i32, %c0_i32_0 : i32, i32
  }
  func.func @transform_5(%arg0: i32) -> (i32, i32) {
    %c0_i32 = arith.constant 0 : i32
    %c0_i32_0 = arith.constant 0 : i32
    %c0_i32_1 = arith.constant 0 : i32
    return %c0_i32, %c0_i32_0 : i32, i32
  }
  func.func @transform_6(%arg0: i32) -> (i32, i32) {
    %c0_i32 = arith.constant 0 : i32
    %c0_i32_0 = arith.constant 0 : i32
    %c0_i32_1 = arith.constant 0 : i32
    return %c0_i32, %c0_i32_0 : i32, i32
  }
}

</mosaic_0001>

<bundles_post_ra>
// kernel: multidomain_fend_forward.1
= control target key start
LH: loop header
LB: loop body
LE: loop exit
PB: predicated region body
PF: predicated region fallthrough
CT: control target
= control target key end

     0   :  { %vm42_vm0 = vcmask 261120   ;;  %v10640_v3 = vmov 0   ;;  %v128_v47 = vlaneseq  ;;  %vm139_vm1 = vcmask 130112   ;;  %s10631_s0 = inlined_call_operand.vmem [shape: f32[4,16,32], index: 0, kind: input, shape index: {}]   ;;  %s10632_s5 = inlined_call_operand.vmem [shape: f32[16,384], index: 5, kind: input, shape index: {}]   ;;  %s10633_s1 = inlined_call_operand.vmem [shape: s32[4,1], index: 1, kind: input, shape index: {}]   ;;  %s10634_s4 = inlined_call_operand.vmem [shape: bf16[944,128], index: 4, kind: input, shape index: {}]   ;;  %s10635_s3 = inlined_call_operand.vmem [shape: bf16[5,320,384], index: 3, kind: input, shape index: {}]   ;;  %s10636_s2 = inlined_call_operand.vmem [shape: bf16[5,64,320], index: 2, kind: input, shape index: {}]   ;;  %s10637_s6 = inlined_call_operand.vmem [shape: f32[4,128], index: 6, kind: output, shape index: {}]  }
   0x1   :  { %v7783_v0 = vld [vmem:[%s10631_s0] sm:$0xff]  ;;  %v7791_v2 = vld [vmem:[%s10631_s0 + $0x8] sm:$0xff]  ;;  %7158 = vset.pattern.permute.xlu0 %v10640_v3  ;;  %7159 = vset.pattern.permute.xlu1 %v10640_v3  ;;  %v7800_v6 = vld [vmem:[%s10631_s0 + $0x10] sm:$0xff]  ;;  %vm168_vm2 = vcmask 1041409   ;;  %vm170_vm11 = vcmask 1042434   ;;  %vm172_vm12 = vcmask 1043459  }
   0x2   :  { %v32_v1 = vld [vmem:[%s10632_s5] ss:$0 sm:$0xff]  ;;  %v7805_v7 = vld [vmem:[%s10631_s0 + $0x18] sm:$0xff]  ;;  %v7818_v12 = vld [vmem:[%s10631_s0 + $0x28] sm:$0xff]  ;;  %v80_v20 = vsel %vm42_vm0, %v7783_v0, 0.0  ;;  %v83_v22 = vsel %vm42_vm0, %v7791_v2, 0.0 }
   0x3   :  { %v34_v4 = vmul.f32 %v32_v1, %v7783_v0  ;;  %v35_v5 = vmul.f32 %v32_v1, %v7791_v2  ;;  %v7810_v8 = vld [vmem:[%s10631_s0 + $0x20] sm:$0xff]  ;;  %v36_v9 = vmul.f32 %v32_v1, %v7800_v6  ;;  %v37_v10 = vmul.f32 %v32_v1, %v7805_v7  ;;  %v7832_v21 = vld [vmem:[%s10631_s0 + $0x30] sm:$0xff]  ;;  %v7839_v23 = vld [vmem:[%s10631_s0 + $0x38] sm:$0xff] }
   0x4   :  { %v38_v15 = vmul.f32 %v32_v1, %v7810_v8  ;;  %v39_v17 = vmul.f32 %v32_v1, %v7818_v12  ;;  %v86_v24 = vsel %vm42_vm0, %v7800_v6, 0.0  ;;  %v40_v25 = vmul.f32 %v32_v1, %v7832_v21  ;;  %v33_v34 = vld [vmem:[%s10632_s5 + $0x1] ss:$0 sm:$0xff] }
   0x5   :  { %v43_v11 = vsel %vm42_vm0, %v34_v4, 0.0  ;;  %v49_v13 = vsel %vm42_vm0, %v36_v9, 0.0  ;;  %v46_v14 = vsel %vm42_vm0, %v35_v5, 0.0  ;;  %v52_v16 = vsel %vm42_vm0, %v37_v10, 0.0 }
   0x6   :  { %44 = vadd.xlane.f32.xlu0 %v43_v11  ;;  %50 = vadd.xlane.f32.xlu1 %v49_v13  ;;  %v55_v18 = vsel %vm42_vm0, %v38_v15, 0.0  ;;  %v58_v19 = vsel %vm42_vm0, %v39_v17, 0.0  ;;  %v89_v26 = vsel %vm42_vm0, %v7805_v7, 0.0  ;;  %v41_v27 = vmul.f32 %v32_v1, %v7839_v23 }
   0x7   :  { %v61_v28 = vsel %vm42_vm0, %v40_v25, 0.0  ;;  %v92_v30 = vsel %vm42_vm0, %v7810_v8, 0.0  ;;  %v95_v31 = vsel %vm42_vm0, %v7818_v12, 0.0  ;;  %v98_v32 = vsel %vm42_vm0, %v7832_v21, 0.0 }
   0x8   :  { %v64_v29 = vsel %vm42_vm0, %v41_v27, 0.0  ;;  %v101_v33 = vsel %vm42_vm0, %v7839_v23, 0.0  ;;  %v7860_v49 = vand.u32 127, %v128_v47  ;;  %v7862_v51 = vshrl.u32 %v128_v47, 7 }
   0x9   :  { %vm175_vm13 = vcmask 125952   ;;  %vm7742_vm14 = vmmov 0  }
   0xa   :  { %47 = vadd.xlane.f32.xlu0 %v46_v14  ;;  %53 = vadd.xlane.f32.xlu1 %v52_v16  ;;  %v134_v52 = vadd.s32 4294967288, %v7860_v49  ;;  %v7870_v56 = vsub.s32 %v7860_v49, %v7862_v51 }
   0xc   :  { %v7866_v55 = vsub.s32 %v134_v52, %v7862_v51 }
   0xe   :  { %56 = vadd.xlane.f32.xlu0 %v55_v18  ;;  %59 = vadd.xlane.f32.xlu1 %v58_v19 }
  0x12   :  { %81 = vadd.xlane.f32.xlu0 %v80_v20  ;;  %84 = vadd.xlane.f32.xlu1 %v83_v22 }
  0x16   :  { %87 = vadd.xlane.f32.xlu0 %v86_v24  ;;  %90 = vadd.xlane.f32.xlu1 %v89_v26 }
  0x1a   :  { %62 = vadd.xlane.f32.xlu0 %v61_v28  ;;  %65 = vadd.xlane.f32.xlu1 %v64_v29 }
  0x1e   :  { %93 = vadd.xlane.f32.xlu0 %v92_v30  ;;  %96 = vadd.xlane.f32.xlu1 %v95_v31 }
  0x22   :  { %99 = vadd.xlane.f32.xlu0 %v98_v32  ;;  %102 = vadd.xlane.f32.xlu1 %v101_v33 }
  0x38   :  { %69 = vperm.xlu0 %7158, %v33_v34  }
  0x8f   :  { %v45_v35 = vpop.xlane.xlu0 %44  ;;  %v51_v36 = vpop.xlane.xlu1 %50 }
  0x93   :  { %v48_v37 = vpop.xlane.xlu0 %47  ;;  %v54_v38 = vpop.xlane.xlu1 %53 }
  0x97   :  { %v57_v39 = vpop.xlane.xlu0 %56  ;;  %v60_v40 = vpop.xlane.xlu1 %59 }
  0x9b   :  { %v82_v41 = vpop.xlane.xlu0 %81  ;;  %v85_v42 = vpop.xlane.xlu1 %84 }
  0x9c   :  { %vm104_vm3 = vcmp.ne.f32.partialorder %v82_v41, 0.0  ;;  %vm105_vm5 = vcmp.ne.f32.partialorder %v85_v42, 0.0 }
  0x9f   :  { %v88_v43 = vpop.xlane.xlu0 %87  ;;  %v91_v44 = vpop.xlane.xlu1 %90 }
  0xa0   :  { %vm106_vm4 = vcmp.ne.f32.partialorder %v88_v43, 0.0  ;;  %vm107_vm6 = vcmp.ne.f32.partialorder %v91_v44, 0.0 }
  0xa3   :  { %v63_v45 = vpop.xlane.xlu0 %62  ;;  %v66_v46 = vpop.xlane.xlu1 %65 }
  0xa7   :  { %v94_v48 = vpop.xlane.xlu0 %93  ;;  %v97_v50 = vpop.xlane.xlu1 %96 }
  0xa8   :  { %vm108_vm7 = vcmp.ne.f32.partialorder %v94_v48, 0.0  ;;  %vm109_vm9 = vcmp.ne.f32.partialorder %v97_v50, 0.0 }
  0xab   :  { %v100_v53 = vpop.xlane.xlu0 %99  ;;  %v103_v54 = vpop.xlane.xlu1 %102 }
  0xac   :  { %vm110_vm8 = vcmp.ne.f32.partialorder %v100_v53, 0.0  ;;  %vm111_vm10 = vcmp.ne.f32.partialorder %v103_v54, 0.0 }
  0xb3   :  { %v70_v57 = vpop.permute.xlu0 %69 }
  0xb4   :  { %v79_v58 = vadd.f32 %v70_v57, %v66_v46  ;;  %v72_v59 = vadd.f32 %v70_v57, %v45_v35  ;;  %v73_v60 = vadd.f32 %v70_v57, %v48_v37  ;;  %v74_v61 = vadd.f32 %v70_v57, %v51_v36 }
  0xb5   :  { %v75_v62 = vadd.f32 %v70_v57, %v54_v38  ;;  %v76_v63 = vadd.f32 %v70_v57, %v57_v39  ;;  %v77_v1 = vadd.f32 %v70_v57, %v60_v40  ;;  %v78_v4 = vadd.f32 %v70_v57, %v63_v45 }
  0xb6   :  { %v119_v5 = vsel %vm111_vm10, %v79_v58, -inf  ;;  %v112_v9 = vsel %vm104_vm3, %v72_v59, -inf  ;;  %v113_v10 = vsel %vm105_vm5, %v73_v60, -inf  ;;  %v114_v11 = vsel %vm106_vm4, %v74_v61, -inf }
  0xb7   :  { %v166_v13 = vrot.slane %v119_v5, %v7866_v55  ;;  %v115_v14 = vsel %vm107_vm6, %v75_v62, -inf  ;;  %v116_v15 = vsel %vm108_vm7, %v76_v63, -inf  ;;  %v117_v16 = vsel %vm109_vm9, %v77_v1, -inf }
  0xb8   :  { %v118_v17 = vsel %vm110_vm8, %v78_v4, -inf  ;;  %v133_v18 = vrot.slane %v112_v9, %v7870_v56  ;;  %v138_v19 = vrot.slane %v113_v10, %v7866_v55  ;;  %v144_v20 = vrot.slane %v114_v11, %v7870_v56 }
  0xb9   :  { %v148_v22 = vrot.slane %v115_v14, %v7866_v55  ;;  %v153_v24 = vrot.slane %v116_v15, %v7870_v56  ;;  %v157_v25 = vrot.slane %v117_v16, %v7866_v55  ;;  %v162_v26 = vrot.slane %v118_v17, %v7870_v56 }
  0xba   :  { %v140_v27 = vsel %vm139_vm1, %v138_v19, %v133_v18  ;;  %v7896_v35 = vsub.s32 0, %v7862_v51  ;;  %v194_v36 = vsub.s32 3, %v7862_v51  ;;  %v7900_v37 = vsub.s32 1, %v7862_v51 }
  0xbb   :  { %v149_v28 = vsel %vm139_vm1, %v148_v22, %v144_v20  ;;  %v158_v29 = vsel %vm139_vm1, %v157_v25, %v153_v24  ;;  %v167_v31 = vsel %vm139_vm1, %v166_v13, %v162_v26  ;;  %v7907_v46 = vsub.s32 2, %v7862_v51  ;;  %v416_v51 = vld [vmem:[%s10633_s1] sm:$0xf] }
  0xbc   :  { %v169_v30 = vsel %vm168_vm2, %v149_v28, %v140_v27  ;;  %10674 = vst [vmem:[#allocation2_spill] sm:$0xff] %v7896_v35  ;;  %10675 = vst [vmem:[#allocation3_spill] sm:$0xff] %v7900_v37  ;;  %vm660_vm3 = vcmask 1043456  }
  0xbd   :  { %v171_v32 = vsel %vm170_vm11, %v158_v29, %v169_v30  ;;  %10676 = vst [vmem:[#allocation4_spill] sm:$0xff] %v7907_v46 }
  0xbe   :  { %v173_v33 = vsel %vm172_vm12, %v167_v31, %v171_v32 }
  0xbf   :  { %v176_v34 = vsel %vm175_vm13, %v173_v33, -inf }
  0xc0   :  { %177 = vmax.xlane.f32.xlu1 %v176_v34 }
 0x149   :  { %v178_v38 = vpop.xlane.xlu1 %177 }
 0x14a   :  { %v183_v39 = vrot.slane %v178_v38, %v7896_v35  ;;  %v195_v40 = vrot.slane %v178_v38, %v194_v36  ;;  %v187_v41 = vrot.slane %v178_v38, %v7900_v37  ;;  %v191_v52 = vrot.slane %v178_v38, %v7907_v46 }
 0x14c   :  { %v200_v42 = vsub.f32 %v112_v9, %v183_v39  ;;  %v201_v43 = vsub.f32 %v113_v10, %v183_v39  ;;  %v207_v45 = vsub.f32 %v119_v5, %v195_v40  ;;  %v202_v47 = vsub.f32 %v114_v11, %v187_v41 }
 0x14d   :  { %v203_v53 = vsub.f32 %v115_v14, %v187_v41  ;;  %v204_v57 = vsub.f32 %v116_v15, %v191_v52  ;;  %v205_v59 = vsub.f32 %v117_v16, %v191_v52  ;;  %v206_v62 = vsub.f32 %v118_v17, %v195_v40 }
 0x14e   :  { %v208_v44 = vmul.f32 1.442695, %v200_v42  ;;  %v210_v48 = vmul.f32 1.442695, %v201_v43  ;;  %v222_v50 = vmul.f32 1.442695, %v207_v45 }
 0x14f   :  { %v212_v54 = vmul.f32 1.442695, %v202_v47  ;;  %v214_v58 = vmul.f32 1.442695, %v203_v53  ;;  %v216_v60 = vmul.f32 1.442695, %v204_v57 }
 0x150   :  { %7702 = vpow2.f32 %v208_v44  ;;  %v218_v63 = vmul.f32 1.442695, %v205_v59  ;;  %v220_v5 = vmul.f32 1.442695, %v206_v62 }
 0x151   :  { %7704 = vpow2.f32 %v210_v48 }
 0x152   :  { %7706 = vpow2.f32 %v222_v50 }
 0x153   :  { %7708 = vpow2.f32 %v212_v54 }
 0x154   :  { %7710 = vpow2.f32 %v214_v58 }
 0x155   :  { %7712 = vpow2.f32 %v216_v60 }
 0x156   :  { %7714 = vpow2.f32 %v218_v63 }
 0x157   :  { %7716 = vpow2.f32 %v220_v5 }
 0x15d   :  { %v7703_v61 = vpop.eup %7702 }
 0x15e   :  { %233 = vperm.xlu1 %7159, %v7703_v61   ;;  %v7705_v1 = vpop.eup %7704 }
 0x15f   :  { %v7910_v4 = vpop.eup %7706 }
 0x160   :  { %v7709_v9 = vpop.eup %7708  ;;  %254 = vperm.xlu0 %7158, %v7910_v4  }
 0x161   :  { %v7711_v10 = vpop.eup %7710 }
 0x162   :  { %236 = vperm.xlu1 %7159, %v7705_v1   ;;  %v7713_v11 = vpop.eup %7712 }
 0x163   :  { %v7715_v13 = vpop.eup %7714 }
 0x164   :  { %v7717_v14 = vpop.eup %7716 }
 0x166   :  { %239 = vperm.xlu1 %7159, %v7709_v9  }
 0x16a   :  { %242 = vperm.xlu1 %7159, %v7711_v10  }
 0x16e   :  { %245 = vperm.xlu1 %7159, %v7713_v11  }
 0x172   :  { %248 = vperm.xlu1 %7159, %v7715_v13  }
 0x176   :  { %251 = vperm.xlu1 %7159, %v7717_v14  }
 0x1d9   :  { %v234_v15 = vpop.permute.xlu1 %233 }
 0x1da   :  { %v259_v29 = vrot.slane %v234_v15, %v7870_v56 }
 0x1db   :  { %v255_v27 = vpop.permute.xlu0 %254 }
 0x1dc   :  { %v290_v33 = vrot.slane %v255_v27, %v7866_v55 }
 0x1dd   :  { %v237_v16 = vpop.permute.xlu1 %236 }
 0x1de   :  { %v263_v24 = vrot.slane %v237_v16, %v7866_v55 }
 0x1e0   :  { %v264_v34 = vsel %vm139_vm1, %v263_v24, %v259_v29 }
 0x1e1   :  { %v240_v17 = vpop.permute.xlu1 %239 }
 0x1e2   :  { %v268_v25 = vrot.slane %v240_v17, %v7870_v56 }
 0x1e5   :  { %v243_v18 = vpop.permute.xlu1 %242 }
 0x1e6   :  { %v272_v20 = vrot.slane %v243_v18, %v7866_v55 }
 0x1e8   :  { %v273_v30 = vsel %vm139_vm1, %v272_v20, %v268_v25 }
 0x1e9   :  { %v246_v19 = vpop.permute.xlu1 %245  ;;  %v292_v39 = vsel %vm168_vm2, %v273_v30, %v264_v34 }
 0x1ea   :  { %v277_v28 = vrot.slane %v246_v19, %v7870_v56 }
 0x1ed   :  { %v249_v22 = vpop.permute.xlu1 %248 }
 0x1ee   :  { %v281_v26 = vrot.slane %v249_v22, %v7866_v55 }
 0x1f0   :  { %v282_v31 = vsel %vm139_vm1, %v281_v26, %v277_v28 }
 0x1f1   :  { %v252_v32 = vpop.permute.xlu1 %251  ;;  %v293_v41 = vsel %vm170_vm11, %v282_v31, %v292_v39 }
 0x1f2   :  { %v286_v38 = vrot.slane %v252_v32, %v7870_v56 }
 0x1f4   :  { %v291_v40 = vsel %vm139_vm1, %v290_v33, %v286_v38  ;;  %vm508_vm1 = vcmask 130048  }
 0x1f5   :  { %v294_v42 = vsel %vm172_vm12, %v291_v40, %v293_v41 }
 0x1f6   :  { %v296_v43 = vsel %vm175_vm13, %v294_v42, 0.0 }
 0x1f7   :  { %297 = vadd.xlane.f32.xlu1 %v296_v43 }
 0x280   :  { %v298_v44 = vpop.xlane.xlu1 %297 }
 0x281   :  { %v303_v45 = vrot.slane %v298_v44, %v7896_v35  ;;  %v307_v55 = vrot.slane %v298_v44, %v7900_v37  ;;  %v311_v56 = vrot.slane %v298_v44, %v7907_v46  ;;  %v315_v50 = vrot.slane %v298_v44, %v194_v36 }
 0x282   :  { %v10638_v36 = vmov 0.0  }
 0x283   :  { %7718 = vrcp.f32 %v303_v45  ;;  %6999 = vmatprep.subr.bf16.mxu1 %v10638_v36  ;;  %7003 = vmatprep.mubr.msk.bf16.mxu1 %vm7742_vm14, %v10638_v36 }
 0x284   :  { %7720 = vrcp.f32 %v307_v55 }
 0x285   :  { %7722 = vrcp.f32 %v311_v56 }
 0x286   :  { %7724 = vrcp.f32 %v315_v50 }
 0x290   :  { %v7719_v47 = vpop.eup %7718 }
 0x291   :  { %v321_v48 = vmul.f32 %v7719_v47, %v7703_v61  ;;  %v322_v52 = vmul.f32 %v7719_v47, %v7705_v1  ;;  %v7721_v53 = vpop.eup %7720  ;;  %v7163_v1 = vld [vmem:[%s10634_s4 + $0x10] sm:$0xff]  }
 0x292   :  { %v324_v54 = vmul.f32 %v7721_v53, %v7709_v9  ;;  %v325_v57 = vmul.f32 %v7721_v53, %v7711_v10  ;;  %v7723_v58 = vpop.eup %7722  ;;  %7000 = vmatpush3.bf16.msra.mxu1 %v7163_v1 }
 0x293   :  { %334 = vperm.xlu0 %7158, %v321_v48   ;;  %v327_v59 = vmul.f32 %v7723_v58, %v7713_v11  ;;  %v328_v60 = vmul.f32 %v7723_v58, %v7715_v13  ;;  %v7725_v62 = vpop.eup %7724  ;;  %7001 = vmatprep.subr.bf16.mxu1 %v10638_v36 }
 0x294   :  { %v330_v63 = vmul.f32 %v7725_v62, %v7717_v14  ;;  %v331_v61 = vmul.f32 %v7725_v62, %v7910_v4  ;;  %v7164_v4 = vld [vmem:[%s10634_s4 + $0x8] sm:$0xff]  }
 0x296   :  { %7002 = vmatpush3.bf16.msra.mxu1 %v7164_v4 }
 0x297   :  { %339 = vperm.xlu0 %7158, %v322_v52   ;;  %7007 = vmatprep.subr.bf16.mxu1 %v10638_v36 }
 0x29b   :  { %344 = vperm.xlu0 %7158, %v324_v54  }
 0x29f   :  { %349 = vperm.xlu0 %7158, %v325_v57  }
 0x2a3   :  { %354 = vperm.xlu0 %7158, %v327_v59  }
 0x2a7   :  { %359 = vperm.xlu0 %7158, %v328_v60  }
 0x2ab   :  { %364 = vperm.xlu0 %7158, %v330_v63  }
 0x2af   :  { %369 = vperm.xlu0 %7158, %v331_v61  }
 0x2b3   :  { %418 = vperm.xlu0 %7158, %v416_v51  }
 0x30e   :  { %v335_v5 = vpop.permute.xlu0 %334 }
 0x30f   :  { %v372_v13 = vmul.f32 %v335_v5, %v7783_v0 }
 0x311   :  { %v380_v17 = vsel %vm42_vm0, %v372_v13, 0.0 }
 0x312   :  { %v340_v9 = vpop.permute.xlu0 %339 }
 0x313   :  { %v373_v10 = vmul.f32 %v340_v9, %v7791_v2 }
 0x315   :  { %v381_v14 = vsel %vm42_vm0, %v373_v10, 0.0 }
 0x316   :  { %v345_v11 = vpop.permute.xlu0 %344  ;;  %v382_v19 = vadd.f32 %v381_v14, %v380_v17 }
 0x317   :  { %v374_v15 = vmul.f32 %v345_v11, %v7800_v6 }
 0x318   :  { %v383_v2 = vrot.slane %v382_v19, 4 }
 0x319   :  { %v389_v20 = vsel %vm42_vm0, %v374_v15, 0.0  ;;  %v7165_v15 = vld [vmem:[%s10634_s4] sm:$0xff]  }
 0x31a   :  { %v350_v16 = vpop.permute.xlu0 %349  ;;  %v384_v29 = vadd.f32 %v383_v2, %v382_v19  ;;  %v7172_v2 = vld [vmem:[%s10634_s4 + $0x20] sm:$0xff]  }
 0x31b   :  { %v375_v18 = vmul.f32 %v350_v16, %v7805_v7 }
 0x31c   :  { %v385_v34 = vrot.slane %v384_v29, 2 }
 0x31d   :  { %v390_v22 = vsel %vm42_vm0, %v375_v18, 0.0  ;;  %v7166_v18 = vld [vmem:[%s10634_s4 + $0x50] sm:$0xff]  }
 0x31e   :  { %v391_v24 = vadd.f32 %v390_v22, %v389_v20  ;;  %v355_v25 = vpop.permute.xlu0 %354  ;;  %v386_v43 = vadd.f32 %v385_v34, %v384_v29  ;;  %v7168_v20 = vld [vmem:[%s10634_s4 + $0x40] sm:$0xff]   ;;  %v7169_v22 = vld [vmem:[%s10634_s4 + $0x38] sm:$0xff]   ;;  %v7188_v34 = vld [vmem:[%s10635_s3 + $0x48] ss:$12 sps:$4 sm:$0xff]  }
 0x31f   :  { %v376_v0 = vmul.f32 %v355_v25, %v7810_v8  ;;  %v7171_v25 = vld [vmem:[%s10634_s4 + $0x28] sm:$0xff]  }
 0x320   :  { %v392_v26 = vrot.slane %v391_v24, 4  ;;  %v387_v48 = vrot.slane %v386_v43, 1  ;;  %v7180_v29 = vld [vmem:[%s10635_s3 + $0x7c] ss:$12 sps:$4 sm:$0xff]  }
 0x321   :  { %v398_v30 = vsel %vm42_vm0, %v376_v0, 0.0  ;;  %v7174_v0 = vld [vmem:[%s10635_s3 + $0xac] ss:$12 sps:$4 sm:$0xff]  }
 0x322   :  { %v393_v27 = vadd.f32 %v392_v26, %v391_v24  ;;  %v360_v28 = vpop.permute.xlu0 %359  ;;  %v388_v57 = vadd.f32 %v387_v48, %v386_v43  ;;  %v7170_v24 = vld [vmem:[%s10634_s4 + $0x30] sm:$0xff]   ;;  %v7173_v26 = vld [vmem:[%s10634_s4 + $0x18] sm:$0xff]   ;;  %1171 = vmatprep.subr.bf16.mxu0 %v7174_v0  ;;  %v7227_v48 = vld [vmem:[%s10635_s3 + $0x120] ss:$12 sps:$4 sm:$0xff]  }
 0x323   :  { %v377_v6 = vmul.f32 %v360_v28, %v7818_v12  ;;  %v7177_v28 = vld [vmem:[%s10635_s3 + $0x94] ss:$12 sps:$4 sm:$0xff]   ;;  %v7207_v43 = vld [vmem:[%s10635_s3 + $0x16c] ss:$12 sps:$4 sm:$0xff]  }
 0x324   :  { %v394_v31 = vrot.slane %v393_v27, 2  ;;  %v431_v62 = vpack.c.bf16 %v388_v57, %v388_v57  ;;  %v7241_v57 = vld [vmem:[%s10635_s3 + $0xdc] ss:$12 sps:$4 sm:$0xff]  }
 0x325   :  { %v399_v7 = vsel %vm42_vm0, %v377_v6, 0.0  ;;  %v7179_v6 = vld [vmem:[%s10635_s3 + $0x90] ss:$12 sps:$4 sm:$0xff]  }
 0x326   :  { %v400_v32 = vadd.f32 %v399_v7, %v398_v30  ;;  %v365_v33 = vpop.permute.xlu0 %364  ;;  %v395_v40 = vadd.f32 %v394_v31, %v393_v27  ;;  %v439_v4 = vunpack.c.l.b16 %v431_v62  ;;  %v7176_v27 = vld [vmem:[%s10635_s3 + $0xa8] ss:$12 sps:$4 sm:$0xff]   ;;  %v7182_v30 = vld [vmem:[%s10635_s3 + $0x78] ss:$12 sps:$4 sm:$0xff]   ;;  %v7271_v62 = vld [vmem:[%s10635_s3 + $0x1d0] ss:$12 sps:$4 sm:$0xff]  }
 0x327   :  { %v378_v39 = vmul.f32 %v365_v33, %v7832_v21  ;;  %1172 = vmatpush1.bf16.msra.mxu0 %v7176_v27  ;;  %v7183_v7 = vld [vmem:[%s10635_s3 + $0x64] ss:$12 sps:$4 sm:$0xff]   ;;  %v7193_v31 = vld [vmem:[%s10635_s3 + $0x1cc] ss:$12 sps:$4 sm:$0xff]  }
 0x328   :  { %v401_v38 = vrot.slane %v400_v32, 4  ;;  %v396_v55 = vrot.slane %v395_v40, 1  ;;  %1173 = vmatprep.subr.bf16.mxu0 %v7177_v28  ;;  %v7186_v33 = vld [vmem:[%s10635_s3 + $0x4c] ss:$12 sps:$4 sm:$0xff]   ;;  %v7320_v27 = vld [vmem:[%s10635_s3 + $0x290] ss:$12 sps:$4 sm:$0xff]  }
 0x329   :  { %v407_v12 = vsel %vm42_vm0, %v378_v39, 0.0  ;;  %v7194_v39 = vld [vmem:[%s10635_s3 + $0x30] ss:$12 sps:$4 sm:$0xff]  }
 0x32a   :  { %v402_v41 = vadd.f32 %v401_v38, %v400_v32  ;;  %v370_v42 = vpop.permute.xlu0 %369  ;;  %v397_v53 = vadd.f32 %v396_v55, %v395_v40  ;;  %v7185_v32 = vld [vmem:[%s10635_s3 + $0x60] ss:$12 sps:$4 sm:$0xff]   ;;  %v7195_v40 = vld [vmem:[%s10635_s3 + $0x1c] ss:$12 sps:$4 sm:$0xff]  }
 0x32b   :  { %v379_v8 = vmul.f32 %v370_v42, %v7839_v23  ;;  %1174 = vmatpush1.bf16.msra.mxu0 %v7179_v6  ;;  %v7189_v38 = vld [vmem:[%s10635_s3 + $0x34] ss:$12 sps:$4 sm:$0xff]   ;;  %v7201_v42 = vld [vmem:[%s10635_s3 + $0x4] ss:$12 sps:$4 sm:$0xff]   ;;  %v7219_v55 = vld [vmem:[%s10635_s3 + $0x13c] ss:$12 sps:$4 sm:$0xff]  }
 0x32c   :  { %v403_v44 = vrot.slane %v402_v41, 2  ;;  %v432_v59 = vpack.c.bf16 %v397_v53, %v397_v53  ;;  %1175 = vmatprep.subr.bf16.mxu0 %v7180_v29  ;;  %v7233_v53 = vld [vmem:[%s10635_s3 + $0x108] ss:$12 sps:$4 sm:$0xff]   ;;  %v7321_v6 = vld [vmem:[%s10635_s3 + $0x338] ss:$12 sps:$4 sm:$0xff]  }
 0x32d   :  { %v408_v45 = vsel %vm42_vm0, %v379_v8, 0.0  ;;  %v7206_v8 = vld [vmem:[%s10635_s3] ss:$12 sps:$4 sm:$0xff]   ;;  %v7325_v29 = vld [vmem:[%s10635_s3 + $0x278] ss:$12 sps:$4 sm:$0xff]  }
 0x32e   :  { %v404_v56 = vadd.f32 %v403_v44, %v402_v41  ;;  %v409_v47 = vadd.f32 %v408_v45, %v407_v12  ;;  %v440_v61 = vunpack.c.l.b16 %v432_v59  ;;  %v419_v13 = vpop.permute.xlu0 %418  ;;  %v7200_v41 = vld [vmem:[%s10635_s3 + $0x18] ss:$12 sps:$4 sm:$0xff]   ;;  %v7212_v44 = vld [vmem:[%s10635_s3 + $0x168] ss:$12 sps:$4 sm:$0xff]   ;;  %v7216_v45 = vld [vmem:[%s10635_s3 + $0x150] ss:$12 sps:$4 sm:$0xff]  }
 0x32f   :  { %vm420_vm15 = vcmp.eq.s32.totalorder %v7860_v49, %v419_v13  ;;  %v7167_v49 = vld [vmem:[%s10634_s4 + $0x48] sm:$0xff]   ;;  %1176 = vmatpush1.bf16.msra.mxu0 %v7182_v30  ;;  %v7213_v12 = vld [vmem:[%s10635_s3 + $0x154] ss:$12 sps:$4 sm:$0xff]   ;;  %v7246_v59 = vld [vmem:[%s10635_s3 + $0xc4] ss:$12 sps:$4 sm:$0xff]  }
 0x330   :  { %v405_v50 = vrot.slane %v404_v56, 1  ;;  %v410_v52 = vrot.slane %v409_v47, 4  ;;  %v443_v10 = vsel %vm168_vm2, %v440_v61, %v439_v4  ;;  %v5831_v17 = vsel %vm420_vm15, 1.0, %v10638_v36  ;;  %1177 = vmatprep.subr.bf16.mxu0 %v7183_v7  ;;  %v7276_v61 = vld [vmem:[%s10635_s3 + $0x1b8] ss:$12 sps:$4 sm:$0xff]  }
 0x331   :  { %v423_v19 = vpack.c.bf16 %v5831_v17, %v5831_v17  ;;  %v8144_v4 = vld [vmem:[%s10636_s2 + $0x34] ss:$12 sps:$4 sm:$0xff]  }
 0x332   :  { %v411_v54 = vadd.f32 %v410_v52, %v409_v47  ;;  %v406_v21 = vadd.f32 %v405_v50, %v404_v56  ;;  %v7222_v56 = vld [vmem:[%s10635_s3 + $0x138] ss:$12 sps:$4 sm:$0xff]   ;;  %v8169_v13 = vld [vmem:[%s10636_s2 + $0x48] ss:$12 sps:$4 sm:$0xff]   ;;  %v7326_v7 = vld [vmem:[%s10635_s3 + $0x320] ss:$12 sps:$4 sm:$0xff]  }
 0x333   :  { %1178 = vmatpush1.bf16.msra.mxu0 %v7185_v32  ;;  %v7224_v47 = vld [vmem:[%s10635_s3 + $0x124] ss:$12 sps:$4 sm:$0xff]   ;;  %v7230_v50 = vld [vmem:[%s10635_s3 + $0x10c] ss:$12 sps:$4 sm:$0xff]   ;;  %v7299_v17 = vld [vmem:[%s10635_s3 + $0x394] ss:$12 sps:$4 sm:$0xff]  }
 0x334   :  { %v412_v58 = vrot.slane %v411_v54, 2  ;;  %v433_v23 = vpack.c.bf16 %v406_v21, %v406_v21  ;;  %1179 = vmatprep.subr.bf16.mxu0 %v7186_v33  ;;  %v8091_v52 = vld [vmem:[%s10636_s2 + $0x4] ss:$12 sps:$4 sm:$0xff]   ;;  %v430_v32 = vld [vmem:[%s10632_s5 + $0x2] ss:$0 sm:$0xff] }
 0x335   :  { %1203 = vmatprep.mubr.bf16.mxu0 %v8091_v52  ;;  %v7238_v21 = vld [vmem:[%s10635_s3 + $0xf0] ss:$12 sps:$4 sm:$0xff]   ;;  %v7330_v33 = vld [vmem:[%s10636_s2 + $0x80] ss:$12 sps:$4 sm:$0xff]  }
 0x336   :  { %v413_v60 = vadd.f32 %v412_v58, %v411_v54  ;;  %v441_v1 = vunpack.c.l.b16 %v433_v23  ;;  %v7235_v54 = vld [vmem:[%s10635_s3 + $0xf4] ss:$12 sps:$4 sm:$0xff]   ;;  %v7244_v58 = vld [vmem:[%s10635_s3 + $0xd8] ss:$12 sps:$4 sm:$0xff]  }
 0x337   :  { %1180 = vmatpush1.bf16.msra.mxu0 %v7188_v34  ;;  %v8118_v23 = vld [vmem:[%s10636_s2] ss:$12 sps:$4 sm:$0xff]  }
 0x338   :  { %v414_v63 = vrot.slane %v413_v60, 1  ;;  %v444_v11 = vsel %vm170_vm11, %v441_v1, %v443_v10  ;;  %1181 = vmatprep.subr.bf16.mxu0 %v7189_v38  ;;  %v7282_v1 = vld [vmem:[%s10635_s3 + $0x1a0] ss:$12 sps:$4 sm:$0xff]  }
 0x339   :  { %v7293_v10 = vld [vmem:[%s10635_s3 + $0x3ac] ss:$12 sps:$4 sm:$0xff]  }
 0x33a   :  { %v415_v51 = vadd.f32 %v414_v63, %v413_v60  ;;  %v7249_v60 = vld [vmem:[%s10635_s3 + $0xc0] ss:$12 sps:$4 sm:$0xff]   ;;  %v8126_v63 = vld [vmem:[%s10636_s2 + $0x1c] ss:$12 sps:$4 sm:$0xff]  }
 0x33b   :  { %1182 = vmatpush1.bf16.msra.mxu0 %v7194_v39  ;;  %v7331_v39 = vld [vmem:[%s10635_s3 + $0x260] ss:$12 sps:$4 sm:$0xff]  }
 0x33c   :  { %v434_v5 = vpack.c.bf16 %v415_v51, %v415_v51  ;;  %1183 = vmatprep.subr.bf16.mxu0 %v7195_v40  ;;  %v8136_v51 = vld [vmem:[%s10636_s2 + $0x18] ss:$12 sps:$4 sm:$0xff]  }
 0x33e   :  { %v442_v9 = vunpack.c.l.b16 %v434_v5  ;;  %v7287_v5 = vld [vmem:[%s10635_s3 + $0x188] ss:$12 sps:$4 sm:$0xff]  }
 0x33f   :  { %1184 = vmatpush1.bf16.msra.mxu0 %v7200_v41  ;;  %v7332_v41 = vld [vmem:[%s10635_s3 + $0x308] ss:$12 sps:$4 sm:$0xff]  }
 0x340   :  { %v445_v14 = vsel %vm172_vm12, %v442_v9, %v444_v11  ;;  %1185 = vmatprep.subr.bf16.mxu0 %v7201_v42  ;;  %v8154_v9 = vld [vmem:[%s10636_s2 + $0x30] ss:$12 sps:$4 sm:$0xff]   ;;  %v8162_v11 = vld [vmem:[%s10636_s2 + $0x4c] ss:$12 sps:$4 sm:$0xff]  }
 0x341   :  { %v446_v16 = vpack.c.b16 %v445_v14, %v445_v14  ;;  %v8174_v14 = vld [vmem:[%s10636_s2 + $0x8] ss:$12 sps:$4 sm:$0xff]  }
 0x343   :  { %7004 = vmatmul.mubr.msk.bf16.vlgmr.msra.gmra.mxu1 %vm42_vm0, %v446_v16  ;;  %1186 = vmatpush1.bf16.msra.mxu0 %v7206_v8  ;;  %vm1158_vm0 = vcmask 523264   ;;  %v8185_v16 = vld [vmem:[%s10636_s2 + $0x20] ss:$12 sps:$4 sm:$0xff]   ;;  %v7336_v8 = vld [vmem:[%s10635_s3 + $0x248] ss:$12 sps:$4 sm:$0xff]  }
 0x344   :  { %7008 = vmatpush3.bf16.msra.mxu1 %v7165_v15  ;;  %7009 = vmatprep.mubr.msk.bf16.mxu1 %vm7742_vm14, %v10638_v36  ;;  %v7291_v15 = vld [vmem:[%s10635_s3 + $0x3a8] ss:$12 sps:$4 sm:$0xff]  }
 0x345   :  { %7013 = vmatprep.subr.bf16.mxu1 %v10638_v36  ;;  %1187 = vmatprep.subr.bf16.mxu0 %v7207_v43 }
 0x347   :  { %1188 = vmatpush2.bf16.msra.mxu0 %v7212_v44  ;;  %v7191_v44 = vld [vmem:[%s10635_s3 + $0x1c8] ss:$12 sps:$4 sm:$0xff]  }
 0x348   :  { %1189 = vmatprep.subr.bf16.mxu0 %v7213_v12 }
 0x34b   :  { %7010 = vmatmul.mubr.msk.bf16.vlgmr.msra.gmra.mxu1 %vm508_vm1, %v423_v19  ;;  %1190 = vmatpush2.bf16.msra.mxu0 %v7216_v45  ;;  %v7297_v19 = vld [vmem:[%s10635_s3 + $0x390] ss:$12 sps:$4 sm:$0xff]   ;;  %v7199_v45 = vld [vmem:[%s10635_s3 + $0x1b4] ss:$12 sps:$4 sm:$0xff]  }
 0x34c   :  { %7014 = vmatpush3.bf16.msra.mxu1 %v7166_v18  ;;  %7029 = vmatprep.mubr.msk.bf16.mxu1 %vm7742_vm14, %v10638_v36  ;;  %v8193_v18 = vld [vmem:[%s10636_s2 + $0x38] ss:$12 sps:$4 sm:$0xff]  }
 0x34d   :  { %7015 = vmatprep.subr.bf16.mxu1 %v10638_v36  ;;  %1191 = vmatprep.subr.bf16.mxu0 %v7219_v55  ;;  %v7337_v55 = vld [vmem:[%s10635_s3 + $0x2f0] ss:$12 sps:$4 sm:$0xff]  }
 0x34f   :  { %1192 = vmatpush2.bf16.msra.mxu0 %v7222_v56 }
 0x350   :  { %7016 = vmatpush3.bf16.msra.mxu1 %v7167_v49  ;;  %1193 = vmatprep.subr.bf16.mxu0 %v7224_v47  ;;  %v7305_v49 = vld [vmem:[%s10635_s3 + $0x37c] ss:$12 sps:$4 sm:$0xff]   ;;  %v7341_v47 = vld [vmem:[%s10636_s2 + $0x98] ss:$12 sps:$4 sm:$0xff]  }
 0x351   :  { %7017 = vmatprep.subr.bf16.mxu1 %v10638_v36 }
 0x353   :  { %1194 = vmatpush2.bf16.msra.mxu0 %v7227_v48 }
 0x354   :  { %7018 = vmatpush3.bf16.msra.mxu1 %v7168_v20  ;;  %1195 = vmatprep.subr.bf16.mxu0 %v7230_v50  ;;  %v7303_v20 = vld [vmem:[%s10635_s3 + $0x378] ss:$12 sps:$4 sm:$0xff]   ;;  %v7342_v50 = vld [vmem:[%s10635_s3 + $0x230] ss:$12 sps:$4 sm:$0xff]  }
 0x355   :  { %7019 = vmatprep.subr.bf16.mxu1 %v10638_v36 }
 0x357   :  { %1196 = vmatpush2.bf16.msra.mxu0 %v7233_v53  ;;  %v7197_v53 = vld [vmem:[%s10635_s3 + $0x1b0] ss:$12 sps:$4 sm:$0xff]  }
 0x358   :  { %7020 = vmatpush3.bf16.msra.mxu1 %v7169_v22  ;;  %1197 = vmatprep.subr.bf16.mxu0 %v7235_v54  ;;  %v8211_v22 = vld [vmem:[%s10636_s2 + $0x50] ss:$12 sps:$4 sm:$0xff]   ;;  %v7346_v54 = vld [vmem:[%s10635_s3 + $0x2d8] ss:$12 sps:$4 sm:$0xff]  }
 0x359   :  { %7021 = vmatprep.subr.bf16.mxu1 %v10638_v36 }
 0x35b   :  { %1198 = vmatpush2.bf16.msra.mxu0 %v7238_v21  ;;  %v7205_v21 = vld [vmem:[%s10635_s3 + $0x19c] ss:$12 sps:$4 sm:$0xff]  }
 0x35c   :  { %7022 = vmatpush3.bf16.msra.mxu1 %v7170_v24  ;;  %1199 = vmatprep.subr.bf16.mxu0 %v7241_v57  ;;  %v7311_v24 = vld [vmem:[%s10635_s3 + $0x364] ss:$12 sps:$4 sm:$0xff]  }
 0x35d   :  { %7023 = vmatprep.subr.bf16.mxu1 %v10638_v36  ;;  %v7347_v57 = vld [vmem:[%s10635_s3 + $0x218] ss:$12 sps:$4 sm:$0xff]  }
 0x35f   :  { %1200 = vmatpush2.bf16.msra.mxu0 %v7244_v58  ;;  %v7203_v58 = vld [vmem:[%s10635_s3 + $0x198] ss:$12 sps:$4 sm:$0xff]  }
 0x360   :  { %7024 = vmatpush3.bf16.msra.mxu1 %v7171_v25  ;;  %1201 = vmatprep.subr.bf16.mxu0 %v7246_v59  ;;  %v7309_v25 = vld [vmem:[%s10635_s3 + $0x360] ss:$12 sps:$4 sm:$0xff]  }
 0x361   :  { %7025 = vmatprep.subr.bf16.mxu1 %v10638_v36  ;;  %v7348_v59 = vld [vmem:[%s10635_s3 + $0x2c0] ss:$12 sps:$4 sm:$0xff]  }
 0x363   :  { %1202 = vmatpush2.bf16.msra.mxu0 %v7249_v60  ;;  %v7211_v60 = vld [vmem:[%s10635_s3 + $0x184] ss:$12 sps:$4 sm:$0xff]  }
 0x364   :  { %7026 = vmatpush3.bf16.msra.mxu1 %v7172_v2  ;;  %7033 = vmatprep.subr.bf16.mxu0 %v7271_v62  ;;  %v7315_v2 = vld [vmem:[%s10635_s3 + $0x350] ss:$12 sps:$4 sm:$0xff]  }
 0x365   :  { %7027 = vmatprep.subr.bf16.mxu1 %v10638_v36 }
 0x366   :  { %1204 = vmatmul.mubr.bf16.vlgmr.msra.gmra.mxu0 %v8118_v23 }
 0x367   :  { %1213 = vmatprep.mubr.bf16.mxu0 %v8126_v63  ;;  %7034 = vmatpush3.bf16.msra.mxu0 %v7271_v62  ;;  %v7349_v62 = vld [vmem:[%s10636_s2 + $0xb0] ss:$12 sps:$4 sm:$0xff]  }
 0x368   :  { %7028 = vmatpush3.bf16.msra.mxu1 %v7173_v26  ;;  %7035 = vmatprep.subr.bf16.mxu0 %v7276_v61  ;;  %v7319_v26 = vld [vmem:[%s10636_s2 + $0x68] ss:$12 sps:$4 sm:$0xff]  }
 0x369   :  { %1252 = vmatprep.subr.bf16.mxu1 %v7193_v31 }
 0x36b   :  { %7036 = vmatpush3.bf16.msra.mxu0 %v7276_v61  ;;  %v7350_v61 = vld [vmem:[%s10635_s3 + $0x200] ss:$12 sps:$4 sm:$0xff]  }
 0x36c   :  { %7037 = vmatprep.subr.bf16.mxu0 %v7282_v1 }
 0x36e   :  { %1214 = vmatmul.mubr.bf16.gmra.mxu0 %v8136_v51 }
 0x36f   :  { %1223 = vmatprep.mubr.bf16.mxu0 %v8144_v4  ;;  %7038 = vmatpush3.bf16.msra.mxu0 %v7282_v1  ;;  %v7209_v1 = vld [vmem:[%s10635_s3 + $0x180] ss:$12 sps:$4 sm:$0xff]  }
 0x370   :  { %7039 = vmatprep.subr.bf16.mxu0 %v7287_v5 }
 0x373   :  { %7040 = vmatpush3.bf16.msra.mxu0 %v7287_v5  ;;  %v7353_v5 = vld [vmem:[%s10635_s3 + $0x2a8] ss:$12 sps:$4 sm:$0xff]  }
 0x374   :  { %2173 = vmatprep.subr.bf16.mxu0 %v7293_v10  ;;  %v7215_v10 = vld [vmem:[%s10635_s3 + $0x170] ss:$12 sps:$4 sm:$0xff]  }
 0x376   :  { %1224 = vmatmul.mubr.bf16.gmra.mxu0 %v8154_v9 }
 0x377   :  { %1233 = vmatprep.mubr.bf16.mxu0 %v8162_v11 }
 0x37e   :  { %1234 = vmatmul.mubr.bf16.gmra.mxu0 %v8169_v13 }
 0x37f   :  { %7041 = vmatprep.mubr.msk.bf16.mxu0 %vm1158_vm0, %v8174_v14 }
 0x386   :  { %7042 = vmatmul.mubr.msk.bf16.vlgmr.msra.gmra.mxu0 %vm1158_vm0, %v8185_v16 }
 0x387   :  { %2174 = vmatpush1.bf16.msra.mxu0 %v7291_v15  ;;  %7045 = vmatprep.mubr.msk.bf16.mxu0 %vm1158_vm0, %v8193_v18  ;;  %v8316_v15 = vld [vmem:[%s10636_s2 + $0x64] ss:$12 sps:$4 sm:$0xff]  }
 0x388   :  { %2175 = vmatprep.subr.bf16.mxu0 %v7299_v17  ;;  %v7355_v17 = vld [vmem:[%s10635_s3 + $0x1e8] ss:$12 sps:$4 sm:$0xff]  }
 0x38b   :  { %2176 = vmatpush1.bf16.msra.mxu0 %v7297_v19  ;;  %v7218_v19 = vld [vmem:[%s10635_s3 + $0xb0] ss:$12 sps:$4 sm:$0xff]  }
 0x38c   :  { %2177 = vmatprep.subr.bf16.mxu0 %v7305_v49  ;;  %v7221_v49 = vld [vmem:[%s10635_s3 + $0x158] ss:$12 sps:$4 sm:$0xff]  }
 0x38e   :  { %7046 = vmatmul.mubr.msk.bf16.gmra.mxu0 %vm1158_vm0, %v8211_v22 }
 0x38f   :  { %2178 = vmatpush1.bf16.msra.mxu0 %v7303_v20  ;;  %2197 = vmatprep.mubr.bf16.mxu0 %v10640_v3  ;;  %v7358_v20 = vld [vmem:[%s10635_s3 + $0x46c] ss:$12 sps:$4 sm:$0xff]  }
 0x390   :  { %2179 = vmatprep.subr.bf16.mxu0 %v7311_v24  ;;  %v7356_v24 = vld [vmem:[%s10635_s3 + $0x468] ss:$12 sps:$4 sm:$0xff]  }
 0x393   :  { %2180 = vmatpush1.bf16.msra.mxu0 %v7309_v25  ;;  %v7223_v25 = vld [vmem:[%s10635_s3 + $0x98] ss:$12 sps:$4 sm:$0xff]  }
 0x394   :  { %6745 = vmatprep.subr.bf16.mxu0 %v7315_v2  ;;  %v8341_v2 = vld [vmem:[%s10636_s2 + $0x60] ss:$12 sps:$4 sm:$0xff]  }
 0x396   :  { %6094 = vmatmul.mubr.msk.bf16.vlgmr.msra.gmra.mxu0 %vm1158_vm0, %v7319_v26  ;;  %v7364_v26 = vld [vmem:[%s10635_s3 + $0x454] ss:$12 sps:$4 sm:$0xff]  }
 0x397   :  { %6746 = vmatpush3.bf16.msra.mxu0 %v7320_v27  ;;  %2207 = vmatprep.mubr.bf16.mxu0 %v10640_v3  ;;  %v8354_v27 = vld [vmem:[%s10636_s2 + $0x7c] ss:$12 sps:$4 sm:$0xff]  }
 0x398   :  { %6747 = vmatprep.subr.bf16.mxu0 %v7321_v6  ;;  %v7232_v6 = vld [vmem:[%s10635_s3 + $0x128] ss:$12 sps:$4 sm:$0xff]  }
 0x39b   :  { %6748 = vmatpush3.bf16.msra.mxu0 %v7325_v29  ;;  %v7369_v29 = vld [vmem:[%s10635_s3 + $0x43c] ss:$12 sps:$4 sm:$0xff]  }
 0x39c   :  { %6749 = vmatprep.subr.bf16.mxu0 %v7326_v7  ;;  %v7234_v7 = vld [vmem:[%s10635_s3 + $0x68] ss:$12 sps:$4 sm:$0xff]  }
 0x39e   :  { %6095 = vmatmul.mubr.msk.bf16.gmra.mxu0 %vm1158_vm0, %v7330_v33  ;;  %v7237_v33 = vld [vmem:[%s10635_s3 + $0x110] ss:$12 sps:$4 sm:$0xff]  }
 0x39f   :  { %6750 = vmatpush3.bf16.msra.mxu0 %v7331_v39  ;;  %2217 = vmatprep.mubr.bf16.mxu0 %v10640_v3  ;;  %v7243_v39 = vld [vmem:[%s10635_s3 + $0xf8] ss:$12 sps:$4 sm:$0xff]  }
 0x3a0   :  { %6751 = vmatprep.subr.bf16.mxu0 %v7332_v41  ;;  %v8413_v41 = vld [vmem:[%s10636_s2 + $0x90] ss:$12 sps:$4 sm:$0xff]  }
 0x3a3   :  { %6752 = vmatpush3.bf16.msra.mxu0 %v7336_v8  ;;  %v8423_v8 = vld [vmem:[%s10636_s2 + $0xac] ss:$12 sps:$4 sm:$0xff]  }
 0x3a4   :  { %6753 = vmatprep.subr.bf16.mxu0 %v7337_v55  ;;  %v7265_v55 = vld [vmem:[%s10635_s3 + $0x274] ss:$12 sps:$4 sm:$0xff]  }
 0x3a6   :  { %6096 = vmatmul.mubr.msk.bf16.gmra.mxu0 %vm1158_vm0, %v7341_v47  ;;  %v7275_v47 = vld [vmem:[%s10635_s3 + $0x244] ss:$12 sps:$4 sm:$0xff]  }
 0x3a7   :  { %6754 = vmatpush3.bf16.msra.mxu0 %v7342_v50  ;;  %2227 = vmatprep.mubr.bf16.mxu0 %v10640_v3  ;;  %v7286_v50 = vld [vmem:[%s10635_s3 + $0x214] ss:$12 sps:$4 sm:$0xff]  }
 0x3a8   :  { %6755 = vmatprep.subr.bf16.mxu0 %v7346_v54  ;;  %v7378_v54 = vld [vmem:[%s10635_s3 + $0x408] ss:$12 sps:$4 sm:$0xff]  }
 0x3ab   :  { %6756 = vmatpush3.bf16.msra.mxu0 %v7347_v57  ;;  %v7381_v57 = vld [vmem:[%s10635_s3 + $0x3f0] ss:$12 sps:$4 sm:$0xff]  }
 0x3ac   :  { %6757 = vmatprep.subr.bf16.mxu0 %v7348_v59  ;;  %v7389_v59 = vld [vmem:[%s10635_s3 + $0x3dc] ss:$12 sps:$4 sm:$0xff]  }
 0x3ae   :  { %6097 = vmatmul.mubr.msk.bf16.gmra.mxu0 %vm1158_vm0, %v7349_v62  ;;  %v7302_v62 = vld [vmem:[%s10635_s3 + $0x34c] ss:$12 sps:$4 sm:$0xff]  }
 0x3af   :  { %6758 = vmatpush3.bf16.msra.mxu0 %v7350_v61  ;;  %2270 = vmatprep.mubr.bf16.mxu0 %v8316_v15  ;;  %v7387_v61 = vld [vmem:[%s10635_s3 + $0x3d8] ss:$12 sps:$4 sm:$0xff]  }
 0x3b0   :  { %6759 = vmatprep.subr.bf16.mxu0 %v7353_v5  ;;  %v7308_v5 = vld [vmem:[%s10635_s3 + $0x334] ss:$12 sps:$4 sm:$0xff]  }
 0x3b3   :  { %6760 = vmatpush3.bf16.msra.mxu0 %v7355_v17  ;;  %v7306_v17 = vld [vmem:[%s10635_s3 + $0x330] ss:$12 sps:$4 sm:$0xff]  }
 0x3b4   :  { %2992 = vmatprep.subr.bf16.mxu0 %v7358_v20  ;;  %v7407_v20 = vld [vmem:[%s10635_s3 + $0x514] ss:$12 sps:$4 sm:$0xff]  }
 0x3b6   :  { %2271 = vmatmul.mubr.bf16.vlgmr.msra.gmra.mxu0 %v8341_v2 }
 0x3b7   :  { %2993 = vmatpush1.bf16.msra.mxu0 %v7356_v24  ;;  %2278 = vmatprep.mubr.bf16.mxu0 %v8354_v27  ;;  %v7312_v24 = vld [vmem:[%s10635_s3 + $0x318] ss:$12 sps:$4 sm:$0xff]  }
 0x3b8   :  { %2994 = vmatprep.subr.bf16.mxu0 %v7364_v26  ;;  %v7405_v26 = vld [vmem:[%s10635_s3 + $0x510] ss:$12 sps:$4 sm:$0xff]  }
 0x403   :  { %v496_v0 = vpop.f32.mrf.mxu1 }
 0x405   :  { %v7005_v28 = vpop.f32.mrf.mxu1 }
 0x406   :  { %v7362_v28 = vld [vmem:[%s10635_s3 + $0x450] ss:$12 sps:$4 sm:$0xff]  }
 0x407   :  { %v499_v30 = vpop.f32.mrf.mxu1  ;;  %2995 = vmatpush1.bf16.msra.mxu0 %v7362_v28  ;;  %v7413_v28 = vld [vmem:[%s10635_s3 + $0x4fc] ss:$12 sps:$4 sm:$0xff]  }
 0x408   :  { %v7367_v30 = vld [vmem:[%s10635_s3 + $0x438] ss:$12 sps:$4 sm:$0xff]   ;;  %2996 = vmatprep.subr.bf16.mxu0 %v7369_v29 }
 0x409   :  { %v7006_v31 = vpop.f32.mrf.mxu1  ;;  %v7411_v29 = vld [vmem:[%s10635_s3 + $0x4f8] ss:$12 sps:$4 sm:$0xff]  }
 0x40a   :  { %v8380_v31 = vld [vmem:[%s10636_s2 + $0x78] ss:$12 sps:$4 sm:$0xff]  }
 0x40b   :  { %v546_v34 = vpop.f32.mrf.mxu1  ;;  %2279 = vmatmul.mubr.bf16.gmra.mxu0 %v8380_v31 }
 0x40c   :  { %v547_v38 = vadd.f32 %v546_v34, %v496_v0  ;;  %v7226_v0 = vld [vmem:[%s10635_s3 + $0x140] ss:$12 sps:$4 sm:$0xff]   ;;  %2997 = vmatpush1.bf16.msra.mxu0 %v7367_v30  ;;  %v7418_v30 = vld [vmem:[%s10635_s3 + $0x4e4] ss:$12 sps:$4 sm:$0xff]  }
 0x40d   :  { %v7011_v40 = vpop.f32.mrf.mxu1  ;;  %v8393_v34 = vld [vmem:[%s10636_s2 + $0x94] ss:$12 sps:$4 sm:$0xff]  }
 0x40e   :  { %v552_v42 = vadd.f32 %v547_v38, %v430_v32  ;;  %v7375_v32 = vld [vmem:[%s10635_s3 + $0x424] ss:$12 sps:$4 sm:$0xff]   ;;  %v7373_v38 = vld [vmem:[%s10635_s3 + $0x420] ss:$12 sps:$4 sm:$0xff]   ;;  %2286 = vmatprep.mubr.bf16.mxu0 %v8393_v34 }
 0x40f   :  { %v549_v43 = vpop.f32.mrf.mxu1  ;;  %2998 = vmatprep.subr.bf16.mxu0 %v7375_v32  ;;  %v7245_v40 = vld [vmem:[%s10635_s3 + $0x38] ss:$12 sps:$4 sm:$0xff]   ;;  %v7329_v32 = vld [vmem:[%s10635_s3 + $0x2d4] ss:$12 sps:$4 sm:$0xff]  }
 0x410   :  { %v553_v12 = vmax.f32 %v552_v42, 0.0  ;;  %v7248_v42 = vld [vmem:[%s10635_s3 + $0xe0] ss:$12 sps:$4 sm:$0xff]   ;;  %2999 = vmatpush1.bf16.msra.mxu0 %v7373_v38 }
 0x411   :  { %v7012_v56 = vpop.f32.mrf.mxu1  ;;  %v7251_v43 = vld [vmem:[%s10635_s3 + $0x20] ss:$12 sps:$4 sm:$0xff]  }
 0x412   :  { %v571_v48 = vpack.c.bf16 %v553_v12, %v553_v12  ;;  %v7259_v12 = vld [vmem:[%s10635_s3 + $0x28c] ss:$12 sps:$4 sm:$0xff]  }
 0x413   :  { %2287 = vmatmul.mubr.bf16.gmra.mxu0 %v8413_v41  ;;  %v7266_v56 = vld [vmem:[%s10635_s3 + $0x258] ss:$12 sps:$4 sm:$0xff]  }
 0x414   :  { %7030 = vmatmul.mubr.bf16.vlgmr.msra.gmra.mxu1 %v571_v48  ;;  %2294 = vmatprep.mubr.bf16.mxu0 %v8423_v8  ;;  %v7279_v48 = vld [vmem:[%s10635_s3 + $0x22c] ss:$12 sps:$4 sm:$0xff]  }
 0x415   :  { %1253 = vmatpush1.bf16.msra.mxu1 %v7191_v44  ;;  %1276 = vmatprep.mubr.bf16.mxu1 %v10640_v3  ;;  %v7256_v44 = vld [vmem:[%s10635_s3 + $0x8] ss:$12 sps:$4 sm:$0xff]   ;;  %v7424_v38 = vld [vmem:[%s10635_s3 + $0x4cc] ss:$12 sps:$4 sm:$0xff]  }
 0x416   :  { %1254 = vmatprep.subr.bf16.mxu1 %v7199_v45  ;;  %v7257_v45 = vld [vmem:[%s10635_s3 + $0x288] ss:$12 sps:$4 sm:$0xff]  }
 0x419   :  { %1255 = vmatpush1.bf16.msra.mxu1 %v7197_v53  ;;  %v7284_v53 = vld [vmem:[%s10635_s3 + $0x210] ss:$12 sps:$4 sm:$0xff]  }
 0x41a   :  { %1256 = vmatprep.subr.bf16.mxu1 %v7205_v21  ;;  %v7296_v21 = vld [vmem:[%s10635_s3 + $0x1e4] ss:$12 sps:$4 sm:$0xff]  }
 0x41d   :  { %1257 = vmatpush1.bf16.msra.mxu1 %v7203_v58  ;;  %v7383_v58 = vld [vmem:[%s10635_s3 + $0x3f4] ss:$12 sps:$4 sm:$0xff]  }
 0x41e   :  { %1258 = vmatprep.subr.bf16.mxu1 %v7211_v60  ;;  %v7294_v60 = vld [vmem:[%s10635_s3 + $0x1e0] ss:$12 sps:$4 sm:$0xff]  }
 0x421   :  { %1259 = vmatpush1.bf16.msra.mxu1 %v7209_v1  ;;  %v7300_v1 = vld [vmem:[%s10635_s3 + $0x348] ss:$12 sps:$4 sm:$0xff]  }
 0x422   :  { %6697 = vmatprep.subr.bf16.mxu1 %v7215_v10  ;;  %v7393_v10 = vld [vmem:[%s10635_s3 + $0x3c0] ss:$12 sps:$4 sm:$0xff]  }
 0x424   :  { %5917 = vmatmul.mubr.msk.bf16.vlgmr.msra.gmra.mxu1 %vm1158_vm0, %v8174_v14  ;;  %v7229_v14 = vld [vmem:[%s10635_s3 + $0x80] ss:$12 sps:$4 sm:$0xff]  }
 0x425   :  { %6698 = vmatpush3.bf16.msra.mxu1 %v7218_v19  ;;  %1286 = vmatprep.mubr.bf16.mxu1 %v10640_v3  ;;  %v7314_v19 = vld [vmem:[%s10635_s3 + $0x31c] ss:$12 sps:$4 sm:$0xff]  }
 0x426   :  { %6699 = vmatprep.subr.bf16.mxu1 %v7221_v49  ;;  %v7399_v49 = vld [vmem:[%s10635_s3 + $0x528] ss:$12 sps:$4 sm:$0xff]  }
 0x429   :  { %6700 = vmatpush3.bf16.msra.mxu1 %v7223_v25  ;;  %v7318_v25 = vld [vmem:[%s10635_s3 + $0x304] ss:$12 sps:$4 sm:$0xff]  }
 0x42a   :  { %6701 = vmatprep.subr.bf16.mxu1 %v7226_v0  ;;  %v8562_v0 = vld [vmem:[%s10636_s2 + $0xc4] ss:$12 sps:$4 sm:$0xff]  }
 0x42c   :  { %5918 = vmatmul.mubr.msk.bf16.gmra.mxu1 %vm1158_vm0, %v8185_v16  ;;  %v7240_v16 = vld [vmem:[%s10635_s3 + $0x50] ss:$12 sps:$4 sm:$0xff]  }
 0x42d   :  { %6702 = vmatpush3.bf16.msra.mxu1 %v7229_v14  ;;  %1296 = vmatprep.mubr.bf16.mxu1 %v10640_v3  ;;  %v7316_v14 = vld [vmem:[%s10635_s3 + $0x300] ss:$12 sps:$4 sm:$0xff]  }
 0x42e   :  { %6703 = vmatprep.subr.bf16.mxu1 %v7232_v6  ;;  %v7324_v6 = vld [vmem:[%s10635_s3 + $0x2ec] ss:$12 sps:$4 sm:$0xff]  }
 0x431   :  { %6704 = vmatpush3.bf16.msra.mxu1 %v7234_v7  ;;  %v7322_v7 = vld [vmem:[%s10635_s3 + $0x2e8] ss:$12 sps:$4 sm:$0xff]  }
 0x432   :  { %6705 = vmatprep.subr.bf16.mxu1 %v7237_v33  ;;  %v7416_v33 = vld [vmem:[%s10635_s3 + $0x4e0] ss:$12 sps:$4 sm:$0xff]  }
 0x434   :  { %5919 = vmatmul.mubr.msk.bf16.gmra.mxu1 %vm1158_vm0, %v8193_v18  ;;  %v7255_v18 = vld [vmem:[%s10635_s3 + $0xc8] ss:$12 sps:$4 sm:$0xff]  }
 0x435   :  { %6706 = vmatpush3.bf16.msra.mxu1 %v7240_v16  ;;  %1306 = vmatprep.mubr.bf16.mxu1 %v10640_v3  ;;  %v7327_v16 = vld [vmem:[%s10635_s3 + $0x2d0] ss:$12 sps:$4 sm:$0xff]  }
 0x436   :  { %6707 = vmatprep.subr.bf16.mxu1 %v7243_v39  ;;  %v7335_v39 = vld [vmem:[%s10635_s3 + $0x2bc] ss:$12 sps:$4 sm:$0xff]  }
 0x439   :  { %6708 = vmatpush3.bf16.msra.mxu1 %v7245_v40  ;;  %v7422_v40 = vld [vmem:[%s10635_s3 + $0x4c8] ss:$12 sps:$4 sm:$0xff]  }
 0x43a   :  { %6709 = vmatprep.subr.bf16.mxu1 %v7248_v42  ;;  %v7429_v42 = vld [vmem:[%s10635_s3 + $0x4b4] ss:$12 sps:$4 sm:$0xff]  }
 0x43c   :  { %5920 = vmatmul.mubr.msk.bf16.gmra.mxu1 %vm1158_vm0, %v8211_v22  ;;  %v7263_v22 = vld [vmem:[%s10635_s3 + $0x270] ss:$12 sps:$4 sm:$0xff]  }
 0x43d   :  { %6710 = vmatpush3.bf16.msra.mxu1 %v7251_v43  ;;  %1349 = vmatprep.mubr.bf16.mxu1 %v8091_v52  ;;  %v7268_v52 = vld [vmem:[%s10635_s3 + $0x25c] ss:$12 sps:$4 sm:$0xff]   ;;  %v7333_v43 = vld [vmem:[%s10635_s3 + $0x2b8] ss:$12 sps:$4 sm:$0xff]  }
 0x43e   :  { %6711 = vmatprep.subr.bf16.mxu1 %v7255_v18  ;;  %v7340_v18 = vld [vmem:[%s10635_s3 + $0x2a4] ss:$12 sps:$4 sm:$0xff]  }
 0x441   :  { %6712 = vmatpush3.bf16.msra.mxu1 %v7256_v44  ;;  %v7427_v44 = vld [vmem:[%s10635_s3 + $0x4b0] ss:$12 sps:$4 sm:$0xff]  }
 0x442   :  { %2092 = vmatprep.subr.bf16.mxu1 %v7259_v12  ;;  %v7435_v12 = vld [vmem:[%s10635_s3 + $0x49c] ss:$12 sps:$4 sm:$0xff]  }
 0x444   :  { %1350 = vmatmul.mubr.bf16.vlgmr.msra.gmra.mxu1 %v8118_v23  ;;  %v7273_v23 = vld [vmem:[%s10635_s3 + $0x240] ss:$12 sps:$4 sm:$0xff]  }
 0x445   :  { %2093 = vmatpush1.bf16.msra.mxu1 %v7257_v45  ;;  %1357 = vmatprep.mubr.bf16.mxu1 %v8126_v63  ;;  %v7277_v63 = vld [vmem:[%s10635_s3 + $0x228] ss:$12 sps:$4 sm:$0xff]   ;;  %v7338_v45 = vld [vmem:[%s10635_s3 + $0x2a0] ss:$12 sps:$4 sm:$0xff]  }
 0x446   :  { %2094 = vmatprep.subr.bf16.mxu1 %v7265_v55  ;;  %v7361_v55 = vld [vmem:[%s10635_s3 + $0x3b0] ss:$12 sps:$4 sm:$0xff]  }
 0x449   :  { %2095 = vmatpush1.bf16.msra.mxu1 %v7263_v22  ;;  %v7433_v22 = vld [vmem:[%s10635_s3 + $0x498] ss:$12 sps:$4 sm:$0xff]  }
 0x44a   :  { %2096 = vmatprep.subr.bf16.mxu1 %v7268_v52  ;;  %v7440_v52 = vld [vmem:[%s10635_s3 + $0x484] ss:$12 sps:$4 sm:$0xff]  }
 0x44c   :  { %1358 = vmatmul.mubr.bf16.gmra.mxu1 %v8136_v51  ;;  %v8485_v51 = vld [vmem:[%s10636_s2 + $0xa8] ss:$12 sps:$4 sm:$0xff]  }
 0x44d   :  { %2097 = vmatpush1.bf16.msra.mxu1 %v7266_v56  ;;  %1365 = vmatprep.mubr.bf16.mxu1 %v8144_v4  ;;  %v7290_v4 = vld [vmem:[%s10635_s3 + $0x1fc] ss:$12 sps:$4 sm:$0xff]   ;;  %v7366_v56 = vld [vmem:[%s10635_s3 + $0x398] ss:$12 sps:$4 sm:$0xff]  }
 0x44e   :  { %2098 = vmatprep.subr.bf16.mxu1 %v7275_v47  ;;  %2295 = vmatmul.mubr.bf16.gmra.mxu0 %v8485_v51  ;;  %v7438_v47 = vld [vmem:[%s10635_s3 + $0x480] ss:$12 sps:$4 sm:$0xff]  }
 0x44f   :  { %3024 = vmatprep.mubr.bf16.mxu0 %v8562_v0 }
 0x451   :  { %2099 = vmatpush1.bf16.msra.mxu1 %v7273_v23  ;;  %v7463_v23 = vld [vmem:[%s10635_s3 + $0x590] ss:$12 sps:$4 sm:$0xff]  }
 0x452   :  { %2100 = vmatprep.subr.bf16.mxu1 %v7279_v48  ;;  %v8642_v48 = vld [vmem:[%s10636_s2 + $0xc0] ss:$12 sps:$4 sm:$0xff]  }
 0x454   :  { %1366 = vmatmul.mubr.bf16.gmra.mxu1 %v8154_v9  ;;  %v7380_v9 = vld [vmem:[%s10635_s3 + $0x40c] ss:$12 sps:$4 sm:$0xff]  }
 0x455   :  { %2101 = vmatpush1.bf16.msra.mxu1 %v7277_v63  ;;  %1373 = vmatprep.mubr.bf16.mxu1 %v8162_v11  ;;  %v7288_v11 = vld [vmem:[%s10635_s3 + $0x1f8] ss:$12 sps:$4 sm:$0xff]   ;;  %v7372_v63 = vld [vmem:[%s10635_s3 + $0x380] ss:$12 sps:$4 sm:$0xff]  }
 0x456   :  { %2102 = vmatprep.subr.bf16.mxu1 %v7286_v50  ;;  %3000 = vmatprep.subr.bf16.mxu0 %v7380_v9  ;;  %v8650_v50 = vld [vmem:[%s10636_s2 + $0xdc] ss:$12 sps:$4 sm:$0xff]   ;;  %v8676_v9 = vld [vmem:[%s10636_s2 + $0xf4] ss:$12 sps:$4 sm:$0xff]  }
 0x457   :  { %3001 = vmatpush1.bf16.msra.mxu0 %v7378_v54  ;;  %v7386_v54 = vld [vmem:[%s10635_s3 + $0x58c] ss:$12 sps:$4 sm:$0xff]  }
 0x458   :  { %3002 = vmatprep.subr.bf16.mxu0 %v7383_v58  ;;  %v7384_v58 = vld [vmem:[%s10635_s3 + $0x588] ss:$12 sps:$4 sm:$0xff]  }
 0x459   :  { %2103 = vmatpush1.bf16.msra.mxu1 %v7284_v53  ;;  %v7474_v53 = vld [vmem:[%s10635_s3 + $0x560] ss:$12 sps:$4 sm:$0xff]  }
 0x45a   :  { %2104 = vmatprep.subr.bf16.mxu1 %v7290_v4  ;;  %v8668_v4 = vld [vmem:[%s10636_s2 + $0xd8] ss:$12 sps:$4 sm:$0xff]  }
 0x45b   :  { %3003 = vmatpush1.bf16.msra.mxu0 %v7381_v57  ;;  %v7409_v57 = vld [vmem:[%s10636_s2 + $0xc8] ss:$12 sps:$4 sm:$0xff]  }
 0x45c   :  { %1374 = vmatmul.mubr.bf16.gmra.mxu1 %v8169_v13  ;;  %3004 = vmatprep.subr.bf16.mxu0 %v7389_v59  ;;  %v7395_v13 = vld [vmem:[%s10635_s3 + $0x3c4] ss:$12 sps:$4 sm:$0xff]   ;;  %v7737_v59 = vld [vmem:[%s10636_s2 + $0x80] ss:$12 sps:$4 sm:$0xff]  }
 0x45d   :  { %2105 = vmatpush1.bf16.msra.mxu1 %v7288_v11  ;;  %2124 = vmatprep.mubr.bf16.mxu1 %v8316_v15  ;;  %v7401_v15 = vld [vmem:[%s10635_s3 + $0x52c] ss:$12 sps:$4 sm:$0xff]   ;;  %v8691_v11 = vld [vmem:[%s10636_s2 + $0xf0] ss:$12 sps:$4 sm:$0xff]  }
 0x45e   :  { %2106 = vmatprep.subr.bf16.mxu1 %v7296_v21  ;;  %v8696_v21 = vld [vmem:[%s10636_s2 + $0x10c] ss:$12 sps:$4 sm:$0xff]  }
 0x45f   :  { %3005 = vmatpush1.bf16.msra.mxu0 %v7387_v61  ;;  %v8732_v61 = vpop.f32.mrf.mxu0 }
 0x460   :  { %3006 = vmatprep.subr.bf16.mxu0 %v7395_v13  ;;  %v7398_v13 = vld [vmem:[%s10635_s3 + $0x55c] ss:$12 sps:$4 sm:$0xff]  }
 0x461   :  { %2107 = vmatpush1.bf16.msra.mxu1 %v7294_v60  ;;  %v7390_v60 = vld [vmem:[%s10635_s3 + $0x570] ss:$12 sps:$4 sm:$0xff]  }
 0x462   :  { %2108 = vmatprep.subr.bf16.mxu1 %v7302_v62  ;;  %v7738_v62 = vld [vmem:[%s10636_s2 + $0x98] ss:$12 sps:$4 sm:$0xff]  }
 0x463   :  { %3007 = vmatpush1.bf16.msra.mxu0 %v7393_v10  ;;  %v7491_v10 = vld [vmem:[%s10635_s3 + $0x754] ss:$12 sps:$4 sm:$0xff]  }
 0x464   :  { %3008 = vmatprep.subr.bf16.mxu0 %v7401_v15  ;;  %v7396_v15 = vld [vmem:[%s10635_s3 + $0x558] ss:$12 sps:$4 sm:$0xff]  }
 0x465   :  { %2109 = vmatpush2.bf16.msra.mxu1 %v7300_v1  ;;  %v7483_v1 = vld [vmem:[%s10635_s3 + $0x768] ss:$12 sps:$4 sm:$0xff]  }
 0x466   :  { %2110 = vmatprep.subr.bf16.mxu1 %v7308_v5  ;;  %v7420_v5 = vld [vmem:[%s10636_s2 + $0xe0] ss:$12 sps:$4 sm:$0xff]  }
 0x467   :  { %3009 = vmatpush2.bf16.msra.mxu0 %v7399_v49  ;;  %v7404_v49 = vld [vmem:[%s10635_s3 + $0x544] ss:$12 sps:$4 sm:$0xff]  }
 0x468   :  { %3010 = vmatprep.subr.bf16.mxu0 %v7407_v20  ;;  %v7489_v20 = vld [vmem:[%s10635_s3 + $0x750] ss:$12 sps:$4 sm:$0xff]  }
 0x469   :  { %2111 = vmatpush2.bf16.msra.mxu1 %v7306_v17  ;;  %v8752_v17 = vld [vmem:[%s10636_s2 + $0xf8] ss:$12 sps:$4 sm:$0xff]  }
 0x46a   :  { %2112 = vmatprep.subr.bf16.mxu1 %v7314_v19  ;;  %v8755_v19 = vpop.f32.mrf.mxu0 }
 0x46b   :  { %3011 = vmatpush2.bf16.msra.mxu0 %v7405_v26  ;;  %v7402_v26 = vld [vmem:[%s10635_s3 + $0x540] ss:$12 sps:$4 sm:$0xff]  }
 0x46c   :  { %3012 = vmatprep.subr.bf16.mxu0 %v7413_v28  ;;  %v8776_v28 = vpop.f32.mrf.mxu0 }
 0x46d   :  { %2113 = vmatpush2.bf16.msra.mxu1 %v7312_v24  ;;  %v7497_v24 = vld [vmem:[%s10635_s3 + $0x73c] ss:$12 sps:$4 sm:$0xff]  }
 0x46e   :  { %2114 = vmatprep.subr.bf16.mxu1 %v7318_v25  ;;  %v7739_v25 = vld [vmem:[%s10636_s2 + $0xb0] ss:$12 sps:$4 sm:$0xff]  }
 0x46f   :  { %3013 = vmatpush2.bf16.msra.mxu0 %v7411_v29  ;;  %v8787_v29 = vld [vmem:[%s10636_s2 + $0x110] ss:$12 sps:$4 sm:$0xff]  }
 0x470   :  { %3014 = vmatprep.subr.bf16.mxu0 %v7418_v30  ;;  %v7503_v30 = vld [vmem:[%s10635_s3 + $0x724] ss:$12 sps:$4 sm:$0xff]  }
 0x471   :  { %2115 = vmatpush2.bf16.msra.mxu1 %v7316_v14  ;;  %v7408_v14 = vld [vmem:[%s10635_s3 + $0x530] ss:$12 sps:$4 sm:$0xff]  }
 0x472   :  { %2116 = vmatprep.subr.bf16.mxu1 %v7324_v6  ;;  %v7495_v6 = vld [vmem:[%s10635_s3 + $0x738] ss:$12 sps:$4 sm:$0xff]  }
 0x473   :  { %3015 = vmatpush2.bf16.msra.mxu0 %v7416_v33  ;;  %v7414_v33 = vld [vmem:[%s10635_s3 + $0x518] ss:$12 sps:$4 sm:$0xff]  }
 0x474   :  { %3016 = vmatprep.subr.bf16.mxu0 %v7424_v38  ;;  %v7501_v38 = vld [vmem:[%s10635_s3 + $0x720] ss:$12 sps:$4 sm:$0xff]  }
 0x475   :  { %2117 = vmatpush2.bf16.msra.mxu1 %v7322_v7  ;;  %v7410_v7 = vld [vmem:[%s10635_s3 + $0x470] ss:$12 sps:$4 sm:$0xff]  }
 0x476   :  { %2118 = vmatprep.subr.bf16.mxu1 %v7329_v32  ;;  %v8797_v32 = vpop.f32.mrf.mxu0 }
 0x477   :  { %3017 = vmatpush2.bf16.msra.mxu0 %v7422_v40  ;;  %v8817_v40 = vld [vmem:[%s10636_s2 + $0x128] ss:$12 sps:$4 sm:$0xff]  }
 0x478   :  { %3018 = vmatprep.subr.bf16.mxu0 %v7429_v42  ;;  %v8819_v42 = vpop.f32.mrf.mxu0 }
 0x479   :  { %2119 = vmatpush2.bf16.msra.mxu1 %v7327_v16  ;;  %v7507_v16 = vld [vmem:[%s10635_s3 + $0x710] ss:$12 sps:$4 sm:$0xff]  }
 0x47a   :  { %2120 = vmatprep.subr.bf16.mxu1 %v7335_v39  ;;  %v7415_v39 = vld [vmem:[%s10635_s3 + $0x458] ss:$12 sps:$4 sm:$0xff]  }
 0x47b   :  { %3019 = vmatpush2.bf16.msra.mxu0 %v7427_v44  ;;  %v7513_v44 = vld [vmem:[%s10635_s3 + $0x6f8] ss:$12 sps:$4 sm:$0xff]  }
 0x47c   :  { %3020 = vmatprep.subr.bf16.mxu0 %v7435_v12  ;;  %v7421_v12 = vld [vmem:[%s10635_s3 + $0x440] ss:$12 sps:$4 sm:$0xff]  }
 0x47d   :  { %2121 = vmatpush2.bf16.msra.mxu1 %v7333_v43  ;;  %v7419_v43 = vld [vmem:[%s10635_s3 + $0x500] ss:$12 sps:$4 sm:$0xff]  }
 0x47e   :  { %2122 = vmatprep.subr.bf16.mxu1 %v7340_v18  ;;  %v7512_v18 = vld [vmem:[%s10635_s3 + $0x650] ss:$12 sps:$4 sm:$0xff]  }
 0x47f   :  { %3021 = vmatpush2.bf16.msra.mxu0 %v7433_v22  ;;  %v7517_v22 = vld [vmem:[%s10635_s3 + $0x638] ss:$12 sps:$4 sm:$0xff]  }
 0x480   :  { %3022 = vmatprep.subr.bf16.mxu0 %v7440_v52  ;;  %v7518_v52 = vld [vmem:[%s10635_s3 + $0x6e0] ss:$12 sps:$4 sm:$0xff]  }
 0x481   :  { %2123 = vmatpush2.bf16.msra.mxu1 %v7338_v45  ;;  %v8835_v45 = vpop.f32.mrf.mxu0 }
 0x482   :  { %7049 = vmatprep.subr.bf16.mxu1 %v7361_v55 }
 0x483   :  { %3023 = vmatpush2.bf16.msra.mxu0 %v7438_v47  ;;  %v8855_v47 = vld [vmem:[%s10636_s2 + $0x140] ss:$12 sps:$4 sm:$0xff]  }
 0x484   :  { %2125 = vmatmul.mubr.bf16.vlgmr.msra.gmra.mxu1 %v8341_v2  ;;  %7065 = vmatprep.subr.bf16.mxu0 %v7463_v23  ;;  %v7468_v2 = vld [vmem:[%s10635_s3 + $0x578] ss:$12 sps:$4 sm:$0xff]  }
 0x485   :  { %2134 = vmatprep.mubr.bf16.mxu1 %v8354_v27  ;;  %7050 = vmatpush3.bf16.msra.mxu1 %v7361_v55  ;;  %v7377_v27 = vld [vmem:[%s10635_s3 + $0x368] ss:$12 sps:$4 sm:$0xff]  }
 0x486   :  { %7051 = vmatprep.subr.bf16.mxu1 %v7366_v56  ;;  %3025 = vmatmul.mubr.bf16.vlgmr.msra.gmra.mxu0 %v8642_v48  ;;  %v7425_v55 = vld [vmem:[%s10635_s3 + $0x4e8] ss:$12 sps:$4 sm:$0xff]  }
 0x487   :  { %3034 = vmatprep.mubr.bf16.mxu0 %v8650_v50  ;;  %7066 = vmatpush3.bf16.msra.mxu0 %v7463_v23  ;;  %v8857_v23 = vpop.f32.mrf.mxu0 }
 0x488   :  { %7067 = vmatprep.subr.bf16.mxu0 %v7468_v2 }
 0x489   :  { %7052 = vmatpush3.bf16.msra.mxu1 %v7366_v56  ;;  %v7426_v56 = vld [vmem:[%s10635_s3 + $0x428] ss:$12 sps:$4 sm:$0xff]  }
 0x48a   :  { %7053 = vmatprep.subr.bf16.mxu1 %v7372_v63 }
 0x48b   :  { %7068 = vmatpush3.bf16.msra.mxu0 %v7468_v2  ;;  %v7523_v2 = vld [vmem:[%s10635_s3 + $0x620] ss:$12 sps:$4 sm:$0xff]  }
 0x48c   :  { %2135 = vmatmul.mubr.bf16.gmra.mxu1 %v8380_v31  ;;  %7069 = vmatprep.subr.bf16.mxu0 %v7474_v53  ;;  %v7479_v31 = vld [vmem:[%s10635_s3 + $0x548] ss:$12 sps:$4 sm:$0xff]  }
 0x48d   :  { %2144 = vmatprep.mubr.bf16.mxu1 %v8393_v34  ;;  %7054 = vmatpush3.bf16.msra.mxu1 %v7372_v63  ;;  %v7485_v34 = vld [vmem:[%s10635_s3 + $0x76c] ss:$12 sps:$4 sm:$0xff]   ;;  %v7430_v63 = vld [vmem:[%s10635_s3 + $0x4d0] ss:$12 sps:$4 sm:$0xff]  }
 0x48e   :  { %7055 = vmatprep.subr.bf16.mxu1 %v7377_v27  ;;  %3035 = vmatmul.mubr.bf16.gmra.mxu0 %v8668_v4 }
 0x48f   :  { %3044 = vmatprep.mubr.bf16.mxu0 %v8676_v9  ;;  %7070 = vmatpush3.bf16.msra.mxu0 %v7474_v53  ;;  %v7432_v53 = vld [vmem:[%s10635_s3 + $0x410] ss:$12 sps:$4 sm:$0xff]  }
 0x490   :  { %7071 = vmatprep.subr.bf16.mxu0 %v7479_v31 }
 0x491   :  { %7056 = vmatpush3.bf16.msra.mxu1 %v7377_v27  ;;  %v7524_v27 = vld [vmem:[%s10635_s3 + $0x6c8] ss:$12 sps:$4 sm:$0xff]  }
 0x492   :  { %3073 = vmatprep.subr.bf16.mxu1 %v7386_v54  ;;  %v8873_v54 = vpop.f32.mrf.mxu0 }
 0x493   :  { %7072 = vmatpush3.bf16.msra.mxu0 %v7479_v31  ;;  %v7436_v31 = vld [vmem:[%s10635_s3 + $0x4b8] ss:$12 sps:$4 sm:$0xff]  }
 0x494   :  { %2145 = vmatmul.mubr.bf16.gmra.mxu1 %v8413_v41  ;;  %3973 = vmatprep.subr.bf16.mxu0 %v7485_v34  ;;  %v7736_v41 = vld [vmem:[%s10636_s2 + $0x68] ss:$12 sps:$4 sm:$0xff]  }
 0x495   :  { %2154 = vmatprep.mubr.bf16.mxu1 %v8423_v8  ;;  %v8708_v8 = vld [vmem:[%s10636_s2 + $0x108] ss:$12 sps:$4 sm:$0xff]  }
 0x496   :  { %3045 = vmatmul.mubr.bf16.gmra.mxu0 %v8691_v11  ;;  %v7528_v34 = vld [vmem:[%s10635_s3 + $0x608] ss:$12 sps:$4 sm:$0xff]  }
 0x497   :  { %3054 = vmatprep.mubr.bf16.mxu0 %v8696_v21 }
 0x49c   :  { %2155 = vmatmul.mubr.bf16.gmra.mxu1 %v8485_v51  ;;  %v7392_v51 = vld [vmem:[%s10635_s3 + $0x574] ss:$12 sps:$4 sm:$0xff]  }
 0x49d   :  { %7057 = vmatprep.mubr.msk.bf16.mxu1 %vm1158_vm0, %v7736_v41  ;;  %v7529_v41 = vld [vmem:[%s10635_s3 + $0x6b0] ss:$12 sps:$4 sm:$0xff]  }
 0x49e   :  { %3055 = vmatmul.mubr.bf16.gmra.mxu0 %v8708_v8 }
 0x49f   :  { %7073 = vmatprep.mubr.msk.bf16.mxu0 %vm1158_vm0, %v7409_v57 }
 0x4a4   :  { %7058 = vmatmul.mubr.msk.bf16.vlgmr.msra.gmra.mxu1 %vm1158_vm0, %v7737_v59  ;;  %v7441_v59 = vld [vmem:[%s10635_s3 + $0x4a0] ss:$12 sps:$4 sm:$0xff]  }
 0x4a5   :  { %3074 = vmatpush1.bf16.msra.mxu1 %v7384_v58  ;;  %7061 = vmatprep.mubr.msk.bf16.mxu1 %vm1158_vm0, %v7738_v62  ;;  %v8894_v58 = vld [vmem:[%s10636_s2 + $0x158] ss:$12 sps:$4 sm:$0xff]  }
 0x4a6   :  { %3075 = vmatprep.subr.bf16.mxu1 %v7392_v51  ;;  %7074 = vmatmul.mubr.msk.bf16.vlgmr.msra.gmra.mxu0 %vm1158_vm0, %v7420_v5  ;;  %v8896_v51 = vpop.f32.mrf.mxu0  ;;  %v7538_v62 = vld [vmem:[%s10635_s3 + $0x698] ss:$12 sps:$4 sm:$0xff]  }
 0x4a7   :  { %3974 = vmatpush1.bf16.msra.mxu0 %v7483_v1  ;;  %7077 = vmatprep.mubr.msk.bf16.mxu0 %vm1158_vm0, %v8752_v17 }
 0x4a8   :  { %3975 = vmatprep.subr.bf16.mxu0 %v7491_v10  ;;  %v8912_v1 = vpop.f32.mrf.mxu0  ;;  %v7539_v10 = vld [vmem:[%s10635_s3 + $0x5d8] ss:$12 sps:$4 sm:$0xff]  }
 0x4a9   :  { %3076 = vmatpush1.bf16.msra.mxu1 %v7390_v60  ;;  %v7534_v60 = vld [vmem:[%s10635_s3 + $0x5f0] ss:$12 sps:$4 sm:$0xff]  }
 0x4aa   :  { %3077 = vmatprep.subr.bf16.mxu1 %v7398_v13  ;;  %v7443_v13 = vld [vmem:[%s10635_s3 + $0x3e0] ss:$12 sps:$4 sm:$0xff]  }
 0x4ab   :  { %3976 = vmatpush1.bf16.msra.mxu0 %v7489_v20  ;;  %v8935_v20 = vld [vmem:[%s10636_s2 + $0x170] ss:$12 sps:$4 sm:$0xff]  }
 0x4ac   :  { %7062 = vmatmul.mubr.msk.bf16.gmra.mxu1 %vm1158_vm0, %v7739_v25  ;;  %3977 = vmatprep.subr.bf16.mxu0 %v7497_v24  ;;  %v7451_v24 = vld [vmem:[%s10635_s3 + $0x64c] ss:$12 sps:$4 sm:$0xff]  }
 0x4ad   :  { %3078 = vmatpush1.bf16.msra.mxu1 %v7396_v15  ;;  %3097 = vmatprep.mubr.bf16.mxu1 %v10640_v3  ;;  %v7540_v15 = vld [vmem:[%s10635_s3 + $0x680] ss:$12 sps:$4 sm:$0xff]  }
 0x4ae   :  { %3079 = vmatprep.subr.bf16.mxu1 %v7404_v49  ;;  %7078 = vmatmul.mubr.msk.bf16.gmra.mxu0 %vm1158_vm0, %v8787_v29  ;;  %v8930_v49 = vpop.f32.mrf.mxu0  ;;  %v7542_v25 = vld [vmem:[%s10635_s3 + $0x5c0] ss:$12 sps:$4 sm:$0xff]  }
 0x4af   :  { %3978 = vmatpush1.bf16.msra.mxu0 %v7495_v6  ;;  %3997 = vmatprep.mubr.bf16.mxu0 %v10640_v3 }
 0x4b0   :  { %3979 = vmatprep.subr.bf16.mxu0 %v7503_v30  ;;  %v8956_v6 = vpop.f32.mrf.mxu0  ;;  %v7457_v30 = vld [vmem:[%s10635_s3 + $0x634] ss:$12 sps:$4 sm:$0xff]  }
 0x4b1   :  { %3080 = vmatpush1.bf16.msra.mxu1 %v7402_v26  ;;  %v7449_v26 = vld [vmem:[%s10635_s3 + $0x648] ss:$12 sps:$4 sm:$0xff]  }
 0x4b2   :  { %6793 = vmatprep.subr.bf16.mxu1 %v7408_v14  ;;  %v8952_v14 = vld [vmem:[%s10636_s2 + $0x124] ss:$12 sps:$4 sm:$0xff]  }
 0x4b3   :  { %3980 = vmatpush1.bf16.msra.mxu0 %v7501_v38 }
 0x4b4   :  { %6271 = vmatmul.mubr.msk.bf16.vlgmr.msra.gmra.mxu1 %vm1158_vm0, %v7409_v57  ;;  %6841 = vmatprep.subr.bf16.mxu0 %v7507_v16  ;;  %v7437_v57 = vld [vmem:[%s10635_s3 + $0x3f8] ss:$12 sps:$4 sm:$0xff]  }
 0x4b5   :  { %6794 = vmatpush3.bf16.msra.mxu1 %v7410_v7  ;;  %3107 = vmatprep.mubr.bf16.mxu1 %v10640_v3  ;;  %v7547_v7 = vld [vmem:[%s10635_s3 + $0x5a8] ss:$12 sps:$4 sm:$0xff]  }
 0x4b6   :  { %6795 = vmatprep.subr.bf16.mxu1 %v7414_v33  ;;  %6448 = vmatmul.mubr.msk.bf16.vlgmr.msra.gmra.mxu0 %vm1158_vm0, %v8817_v40  ;;  %v7550_v33 = vld [vmem:[%s10635_s3 + $0x82c] ss:$12 sps:$4 sm:$0xff]  }
 0x4b7   :  { %6842 = vmatpush3.bf16.msra.mxu0 %v7512_v18  ;;  %4007 = vmatprep.mubr.bf16.mxu0 %v10640_v3 }
 0x4b8   :  { %6843 = vmatprep.subr.bf16.mxu0 %v7513_v44  ;;  %v7460_v44 = vld [vmem:[%s10635_s3 + $0x61c] ss:$12 sps:$4 sm:$0xff]  }
 0x4b9   :  { %6796 = vmatpush3.bf16.msra.mxu1 %v7415_v39  ;;  %v7455_v39 = vld [vmem:[%s10635_s3 + $0x630] ss:$12 sps:$4 sm:$0xff]  }
 0x4ba   :  { %6797 = vmatprep.subr.bf16.mxu1 %v7419_v43  ;;  %v8978_v43 = vpop.f32.mrf.mxu0 }
 0x4bb   :  { %6844 = vmatpush3.bf16.msra.mxu0 %v7517_v22 }
 0x4bc   :  { %6272 = vmatmul.mubr.msk.bf16.gmra.mxu1 %vm1158_vm0, %v7420_v5  ;;  %6845 = vmatprep.subr.bf16.mxu0 %v7518_v52  ;;  %v7447_v5 = vld [vmem:[%s10635_s3 + $0x488] ss:$12 sps:$4 sm:$0xff]   ;;  %v7458_v52 = vld [vmem:[%s10635_s3 + $0x618] ss:$12 sps:$4 sm:$0xff]  }
 0x4bd   :  { %6798 = vmatpush3.bf16.msra.mxu1 %v7421_v12  ;;  %3117 = vmatprep.mubr.bf16.mxu1 %v10640_v3 }
 0x4be   :  { %6799 = vmatprep.subr.bf16.mxu1 %v7425_v55  ;;  %6449 = vmatmul.mubr.msk.bf16.gmra.mxu0 %vm1158_vm0, %v8855_v47  ;;  %v7555_v55 = vld [vmem:[%s10635_s3 + $0x814] ss:$12 sps:$4 sm:$0xff]  }
 0x4bf   :  { %6846 = vmatpush3.bf16.msra.mxu0 %v7523_v2  ;;  %4017 = vmatprep.mubr.bf16.mxu0 %v10640_v3 }
 0x4c0   :  { %6847 = vmatprep.subr.bf16.mxu0 %v7524_v27  ;;  %v7467_v27 = vld [vmem:[%s10635_s3 + $0x604] ss:$12 sps:$4 sm:$0xff]  }
 0x4c1   :  { %6800 = vmatpush3.bf16.msra.mxu1 %v7426_v56  ;;  %v9002_v56 = vld [vmem:[%s10636_s2 + $0x13c] ss:$12 sps:$4 sm:$0xff]  }
 0x4c2   :  { %6801 = vmatprep.subr.bf16.mxu1 %v7430_v63  ;;  %v9004_v63 = vpop.f32.mrf.mxu0 }
 0x4c3   :  { %6848 = vmatpush3.bf16.msra.mxu0 %v7528_v34  ;;  %v7465_v34 = vld [vmem:[%s10635_s3 + $0x600] ss:$12 sps:$4 sm:$0xff]  }
 0x4c4   :  { %6273 = vmatmul.mubr.msk.bf16.gmra.mxu1 %vm1158_vm0, %v8752_v17  ;;  %6849 = vmatprep.subr.bf16.mxu0 %v7529_v41  ;;  %v7448_v17 = vld [vmem:[%s10635_s3 + $0x3c8] ss:$12 sps:$4 sm:$0xff]   ;;  %v9022_v41 = vpop.f32.mrf.mxu0 }
 0x4c5   :  { %6802 = vmatpush3.bf16.msra.mxu1 %v7432_v53  ;;  %3127 = vmatprep.mubr.bf16.mxu1 %v10640_v3  ;;  %v7553_v53 = vld [vmem:[%s10635_s3 + $0x810] ss:$12 sps:$4 sm:$0xff]  }
 0x4c6   :  { %6803 = vmatprep.subr.bf16.mxu1 %v7436_v31  ;;  %6450 = vmatmul.mubr.msk.bf16.gmra.mxu0 %vm1158_vm0, %v8894_v58  ;;  %v7560_v31 = vld [vmem:[%s10635_s3 + $0x7fc] ss:$12 sps:$4 sm:$0xff]  }
 0x4c7   :  { %6850 = vmatpush3.bf16.msra.mxu0 %v7534_v60  ;;  %4027 = vmatprep.mubr.bf16.mxu0 %v10640_v3  ;;  %v9038_v60 = vpop.f32.mrf.mxu0  ;;  %v7616_v3 = vld [vmem:[%s10635_s3 + $0x874] ss:$12 sps:$4 sm:$0xff]  }
 0x4c8   :  { %6851 = vmatprep.subr.bf16.mxu0 %v7538_v62  ;;  %v9043_v62 = vld [vmem:[%s10636_s2 + $0x154] ss:$12 sps:$4 sm:$0xff]  }
 0x4c9   :  { %6804 = vmatpush3.bf16.msra.mxu1 %v7437_v57  ;;  %v7471_v57 = vld [vmem:[%s10635_s3 + $0x5ec] ss:$12 sps:$4 sm:$0xff]  }
 0x4ca   :  { %6805 = vmatprep.subr.bf16.mxu1 %v7441_v59  ;;  %v7558_v59 = vld [vmem:[%s10635_s3 + $0x7f8] ss:$12 sps:$4 sm:$0xff]  }
 0x4cb   :  { %6852 = vmatpush3.bf16.msra.mxu0 %v7539_v10 }
 0x4cc   :  { %6274 = vmatmul.mubr.msk.bf16.gmra.mxu1 %vm1158_vm0, %v8787_v29  ;;  %6853 = vmatprep.subr.bf16.mxu0 %v7540_v15  ;;  %v570_v29 = vld [vmem:[%s10632_s5 + $0x3] ss:$0 sm:$0xff]  ;;  %v7476_v15 = vld [vmem:[%s10635_s3 + $0x5d0] ss:$12 sps:$4 sm:$0xff]  }
 0x4cd   :  { %6806 = vmatpush3.bf16.msra.mxu1 %v7443_v13  ;;  %3170 = vmatprep.mubr.bf16.mxu1 %v8562_v0  ;;  %v7545_v0 = vld [vmem:[%s10635_s3 + $0x668] ss:$12 sps:$4 sm:$0xff]  }
 0x4ce   :  { %6807 = vmatprep.subr.bf16.mxu1 %v7447_v5  ;;  %6451 = vmatmul.mubr.msk.bf16.gmra.mxu0 %vm1158_vm0, %v8935_v20  ;;  %v7478_v13 = vld [vmem:[%s10635_s3 + $0x5d4] ss:$12 sps:$4 sm:$0xff]   ;;  %v9049_v5 = vpop.f32.mrf.mxu0 }
 0x4cf   :  { %6854 = vmatpush3.bf16.msra.mxu0 %v7542_v25  ;;  %4070 = vmatprep.mubr.bf16.mxu0 %v8952_v14  ;;  %v7565_v25 = vld [vmem:[%s10635_s3 + $0x7e0] ss:$12 sps:$4 sm:$0xff]  }
 0x4d0   :  { %6855 = vmatprep.subr.bf16.mxu0 %v7545_v0  ;;  %v9066_v0 = vpop.f32.mrf.mxu0 }
 0x4d1   :  { %6808 = vmatpush3.bf16.msra.mxu1 %v7448_v17  ;;  %v7482_v17 = vld [vmem:[%s10635_s3 + $0x5bc] ss:$12 sps:$4 sm:$0xff]  }
 0x4d2   :  { %3892 = vmatprep.subr.bf16.mxu1 %v7451_v24 }
 0x4d3   :  { %6856 = vmatpush3.bf16.msra.mxu0 %v7547_v7 }
 0x4d4   :  { %v654_v38 = vpop.f32.mrf.mxu1  ;;  %3171 = vmatmul.mubr.bf16.vlgmr.msra.gmra.mxu1 %v8642_v48  ;;  %v7548_v48 = vld [vmem:[%s10635_s3 + $0x828] ss:$12 sps:$4 sm:$0xff]   ;;  %4792 = vmatprep.subr.bf16.mxu0 %v7550_v33  ;;  %v7488_v33 = vld [vmem:[%s10635_s3 + $0x5a4] ss:$12 sps:$4 sm:$0xff]  }
 0x4d5   :  { %v8972_v16 = vadd.f32 %v654_v38, %v570_v29  ;;  %3893 = vmatpush1.bf16.msra.mxu1 %v7449_v26  ;;  %3178 = vmatprep.mubr.bf16.mxu1 %v8650_v50  ;;  %v8991_v50 = vld [vmem:[%s10636_s2 + $0x120] ss:$12 sps:$4 sm:$0xff]   ;;  %v7567_v26 = vld [vmem:[%s10635_s3 + $0x7e4] ss:$12 sps:$4 sm:$0xff]  }
 0x4d6   :  { %v7031_v18 = vpop.f32.mrf.mxu1  ;;  %3894 = vmatprep.subr.bf16.mxu1 %v7457_v30  ;;  %4071 = vmatmul.mubr.bf16.vlgmr.msra.gmra.mxu0 %v8991_v50  ;;  %v7571_v29 = vld [vmem:[%s10635_s3 + $0x7cc] ss:$12 sps:$4 sm:$0xff]  }
 0x4d7   :  { %v661_v12 = vsel %vm660_vm3, %v8972_v16, -inf  ;;  %4793 = vmatpush1.bf16.msra.mxu0 %v7548_v48  ;;  %4078 = vmatprep.mubr.bf16.mxu0 %v9002_v56  ;;  %v7480_v30 = vld [vmem:[%s10635_s3 + $0x5b8] ss:$12 sps:$4 sm:$0xff]   ;;  %v7575_v48 = vld [vmem:[%s10635_s3 + $0x7b4] ss:$12 sps:$4 sm:$0xff]  }
 0x4d8   :  { %662 = vmax.xlane.f32.xlu1 %v661_v12  ;;  %v657_v22 = vpop.f32.mrf.mxu1  ;;  %4794 = vmatprep.subr.bf16.mxu0 %v7555_v55  ;;  %v7486_v55 = vld [vmem:[%s10635_s3 + $0x5a0] ss:$12 sps:$4 sm:$0xff]  }
 0x4d9   :  { %3895 = vmatpush1.bf16.msra.mxu1 %v7455_v39  ;;  %v9091_v39 = vld [vmem:[%s10636_s2 + $0x16c] ss:$12 sps:$4 sm:$0xff]  }
 0x4da   :  { %v7032_v2 = vpop.f32.mrf.mxu1  ;;  %3896 = vmatprep.subr.bf16.mxu1 %v7460_v44  ;;  %v9098_v44 = vpop.f32.mrf.mxu0  ;;  %v7494_v22 = vld [vmem:[%s10635_s3 + $0x70c] ss:$12 sps:$4 sm:$0xff]  }
 0x4db   :  { %4795 = vmatpush1.bf16.msra.mxu0 %v7553_v53 }
 0x4dc   :  { %3179 = vmatmul.mubr.bf16.gmra.mxu1 %v8668_v4  ;;  %v9033_v4 = vld [vmem:[%s10636_s2 + $0x138] ss:$12 sps:$4 sm:$0xff]   ;;  %4796 = vmatprep.subr.bf16.mxu0 %v7560_v31  ;;  %v7492_v31 = vld [vmem:[%s10635_s3 + $0x708] ss:$12 sps:$4 sm:$0xff]  }
 0x4dd   :  { %3897 = vmatpush1.bf16.msra.mxu1 %v7458_v52  ;;  %3186 = vmatprep.mubr.bf16.mxu1 %v8676_v9  ;;  %v7469_v9 = vld [vmem:[%s10635_s3 + $0x5e8] ss:$12 sps:$4 sm:$0xff]  }
 0x4de   :  { %3898 = vmatprep.subr.bf16.mxu1 %v7467_v27  ;;  %4079 = vmatmul.mubr.bf16.gmra.mxu0 %v9033_v4  ;;  %v9119_v27 = vpop.f32.mrf.mxu0 }
 0x4df   :  { %4797 = vmatpush1.bf16.msra.mxu0 %v7558_v59  ;;  %4086 = vmatprep.mubr.bf16.mxu0 %v9043_v62  ;;  %v7500_v59 = vld [vmem:[%s10635_s3 + $0x6f4] ss:$12 sps:$4 sm:$0xff]  }
 0x4e0   :  { %4798 = vmatprep.subr.bf16.mxu0 %v7567_v26 }
 0x4e1   :  { %3899 = vmatpush1.bf16.msra.mxu1 %v7465_v34 }
 0x4e2   :  { %3900 = vmatprep.subr.bf16.mxu1 %v7471_v57  ;;  %v9131_v57 = vld [vmem:[%s10636_s2 + $0x168] ss:$12 sps:$4 sm:$0xff]  }
 0x4e3   :  { %4799 = vmatpush1.bf16.msra.mxu0 %v7565_v25 }
 0x4e4   :  { %3187 = vmatmul.mubr.bf16.gmra.mxu1 %v8691_v11  ;;  %v1278_v10 = vpop.f32.mrf.mxu1  ;;  %4800 = vmatprep.subr.bf16.mxu0 %v7571_v29  ;;  %v7587_v29 = vld [vmem:[%s10635_s3 + $0x8ec] ss:$12 sps:$4 sm:$0xff]  }
 0x4e5   :  { %3901 = vmatpush1.bf16.msra.mxu1 %v7469_v9  ;;  %3194 = vmatprep.mubr.bf16.mxu1 %v8696_v21  ;;  %v1279_v11 = vadd.f32 %v1278_v10, %v8732_v61  ;;  %v9081_v61 = vld [vmem:[%s10636_s2 + $0x150] ss:$12 sps:$4 sm:$0xff]  }
 0x4e6   :  { %3902 = vmatprep.subr.bf16.mxu1 %v7478_v13  ;;  %v9060_v24 = vpop.f32.mrf.mxu1  ;;  %4087 = vmatmul.mubr.bf16.gmra.mxu0 %v9081_v61  ;;  %v7576_v13 = vld [vmem:[%s10635_s3 + $0x798] ss:$12 sps:$4 sm:$0xff]  }
 0x4e7   :  { %4094 = vmatprep.mubr.bf16.mxu0 %v9091_v39  ;;  %v7581_v10 = vld [vmem:[%s10635_s3 + $0x784] ss:$12 sps:$4 sm:$0xff]  }
 0x4e8   :  { %v1282_v21 = vpop.f32.mrf.mxu1 }
 0x4e9   :  { %3903 = vmatpush1.bf16.msra.mxu1 %v7476_v15  ;;  %v1283_v7 = vadd.f32 %v1282_v21, %v8776_v28  ;;  %v7569_v28 = vld [vmem:[%s10635_s3 + $0x7c8] ss:$12 sps:$4 sm:$0xff]   ;;  %v7579_v21 = vld [vmem:[%s10635_s3 + $0x780] ss:$12 sps:$4 sm:$0xff]  }
 0x4ea   :  { %3904 = vmatprep.subr.bf16.mxu1 %v7482_v17  ;;  %v9086_v38 = vpop.f32.mrf.mxu1  ;;  %4801 = vmatpush1.bf16.msra.mxu0 %v7569_v28  ;;  %v7498_v17 = vld [vmem:[%s10635_s3 + $0x6f0] ss:$12 sps:$4 sm:$0xff]   ;;  %v7504_v28 = vld [vmem:[%s10635_s3 + $0x6d8] ss:$12 sps:$4 sm:$0xff]  }
 0x4eb   :  { %v9096_v18 = vmax.f32 %v1279_v11, %v1283_v7  ;;  %4802 = vmatprep.subr.bf16.mxu0 %v7575_v48  ;;  %v7506_v11 = vld [vmem:[%s10635_s3 + $0x6dc] ss:$12 sps:$4 sm:$0xff]  }
 0x4ec   :  { %3195 = vmatmul.mubr.bf16.gmra.mxu1 %v8708_v8  ;;  %v1288_v12 = vpop.f32.mrf.mxu1  ;;  %v7573_v8 = vld [vmem:[%s10635_s3 + $0x7b0] ss:$12 sps:$4 sm:$0xff]  }
 0x4ed   :  { %3905 = vmatpush1.bf16.msra.mxu1 %v7480_v30  ;;  %3924 = vmatprep.mubr.bf16.mxu1 %v8952_v14  ;;  %v1289_v2 = vadd.f32 %v1288_v12, %v8819_v42  ;;  %v7578_v14 = vld [vmem:[%s10635_s3 + $0x79c] ss:$12 sps:$4 sm:$0xff]   ;;  %v9133_v42 = vpop.f32.mrf.mxu0  ;;  %v7510_v12 = vld [vmem:[%s10635_s3 + $0x6c4] ss:$12 sps:$4 sm:$0xff]  }
 0x4ee   :  { %3906 = vmatprep.subr.bf16.mxu1 %v7488_v33  ;;  %v9113_v52 = vpop.f32.mrf.mxu1  ;;  %4803 = vmatpush1.bf16.msra.mxu0 %v7573_v8  ;;  %v7593_v8 = vld [vmem:[%s10635_s3 + $0x8d4] ss:$12 sps:$4 sm:$0xff]  }
 0x4ef   :  { %4804 = vmatprep.subr.bf16.mxu0 %v7578_v14  ;;  %4095 = vmatmul.mubr.bf16.gmra.mxu0 %v9131_v57  ;;  %v9152_v25 = vpop.f32.mrf.mxu0 }
 0x4f0   :  { %v1292_v53 = vpop.f32.mrf.mxu1 }
 0x4f1   :  { %3907 = vmatpush1.bf16.msra.mxu1 %v7486_v55  ;;  %v1293_v34 = vadd.f32 %v1292_v53, %v8857_v23  ;;  %v9165_v30 = vpop.f32.mrf.mxu0 }
 0x4f2   :  { %3908 = vmatprep.subr.bf16.mxu1 %v7494_v22  ;;  %v9138_v9 = vpop.f32.mrf.mxu1  ;;  %4805 = vmatpush1.bf16.msra.mxu0 %v7576_v13  ;;  %v7591_v13 = vld [vmem:[%s10635_s3 + $0x8d0] ss:$12 sps:$4 sm:$0xff]  }
 0x4f3   :  { %v9143_v23 = vmax.f32 %v1289_v2, %v1293_v34  ;;  %4806 = vmatprep.subr.bf16.mxu0 %v7581_v10  ;;  %v9171_v48 = vpop.f32.mrf.mxu0  ;;  %v7516_v34 = vld [vmem:[%s10635_s3 + $0x6ac] ss:$12 sps:$4 sm:$0xff]  }
 0x4f4   :  { %v1298_v15 = vpop.f32.mrf.mxu1 }
 0x4f5   :  { %3909 = vmatpush2.bf16.msra.mxu1 %v7492_v31  ;;  %v1299_v7 = vadd.f32 %v1298_v15, %v8896_v51  ;;  %v7585_v51 = vld [vmem:[%s10635_s3 + $0x8e8] ss:$12 sps:$4 sm:$0xff]   ;;  %v9185_v2 = vpop.f32.mrf.mxu0 }
 0x4f6   :  { %3910 = vmatprep.subr.bf16.mxu1 %v7500_v59  ;;  %v9157_v26 = vpop.f32.mrf.mxu1  ;;  %4807 = vmatpush1.bf16.msra.mxu0 %v7579_v21  ;;  %v7599_v15 = vld [vmem:[%s10635_s3 + $0x8bc] ss:$12 sps:$4 sm:$0xff]  }
 0x4f7   :  { %4808 = vmatprep.subr.bf16.mxu0 %v7587_v29  ;;  %v9192_v31 = vpop.f32.mrf.mxu0  ;;  %v7514_v21 = vld [vmem:[%s10635_s3 + $0x6a8] ss:$12 sps:$4 sm:$0xff]  }
 0x4f8   :  { %v1302_v33 = vpop.f32.mrf.mxu1  ;;  %10677 = vst [vmem:[#allocation5_spill] sm:$0xff] %v9192_v31 }
 0x4f9   :  { %3911 = vmatpush2.bf16.msra.mxu1 %v7498_v17  ;;  %v1303_v55 = vadd.f32 %v1302_v33, %v8930_v49  ;;  %v7508_v49 = vld [vmem:[%s10635_s3 + $0x6c0] ss:$12 sps:$4 sm:$0xff]   ;;  %v9206_v17 = vpop.f32.mrf.mxu0 }
 0x4fa   :  { %3912 = vmatprep.subr.bf16.mxu1 %v7506_v11  ;;  %v9177_v22 = vpop.f32.mrf.mxu1  ;;  %4809 = vmatpush2.bf16.msra.mxu0 %v7585_v51 }
 0x4fb   :  { %v9187_v14 = vmax.f32 %v1299_v7, %v1303_v55  ;;  %4810 = vmatprep.subr.bf16.mxu0 %v7593_v8  ;;  %v9212_v7 = vpop.f32.mrf.mxu0  ;;  %v9232_v8 = vld [vmem:[%s10636_s2 + $0x184] ss:$12 sps:$4 sm:$0xff]  }
 0x4fc   :  { %v1308_v53 = vpop.f32.mrf.mxu1  ;;  %10678 = vst [vmem:[#allocation6_spill] sm:$0xff] %v9212_v7  ;;  %4824 = vmatprep.mubr.bf16.mxu0 %v9232_v8 }
 0x4fd   :  { %3913 = vmatpush2.bf16.msra.mxu1 %v7504_v28  ;;  %v1309_v10 = vadd.f32 %v1308_v53, %v8978_v43  ;;  %v7521_v43 = vld [vmem:[%s10635_s3 + $0x694] ss:$12 sps:$4 sm:$0xff]   ;;  %v7597_v28 = vld [vmem:[%s10635_s3 + $0x8b8] ss:$12 sps:$4 sm:$0xff]   ;;  %v9227_v55 = vpop.f32.mrf.mxu0  ;;  %v7519_v53 = vld [vmem:[%s10635_s3 + $0x690] ss:$12 sps:$4 sm:$0xff]  }
 0x4fe   :  { %3914 = vmatprep.subr.bf16.mxu1 %v7510_v12  ;;  %v9197_v59 = vpop.f32.mrf.mxu1  ;;  %4811 = vmatpush2.bf16.msra.mxu0 %v7591_v13 }
 0x4ff   :  { %4812 = vmatprep.subr.bf16.mxu0 %v7599_v15 }
 0x500   :  { %v1312_v11 = vpop.f32.mrf.mxu1 }
 0x501   :  { %3915 = vmatpush2.bf16.msra.mxu1 %v7508_v49  ;;  %v1313_v29 = vadd.f32 %v1312_v11, %v9022_v41  ;;  %v7605_v41 = vld [vmem:[%s10635_s3 + $0x8a4] ss:$12 sps:$4 sm:$0xff]   ;;  %v9237_v49 = vpop.f32.mrf.mxu0  ;;  %v7611_v11 = vld [vmem:[%s10635_s3 + $0x88c] ss:$12 sps:$4 sm:$0xff]  }
 0x502   :  { %3916 = vmatprep.subr.bf16.mxu1 %v7516_v34  ;;  %v9217_v33 = vpop.f32.mrf.mxu1  ;;  %10680 = vst [vmem:[#allocation8_spill] sm:$0xff] %v9237_v49  ;;  %v7527_v34 = vld [vmem:[%s10635_s3 + $0x67c] ss:$12 sps:$4 sm:$0xff]   ;;  %4813 = vmatpush2.bf16.msra.mxu0 %v7597_v28 }
 0x503   :  { %v9222_v12 = vmax.f32 %v1309_v10, %v1313_v29  ;;  %v7603_v10 = vld [vmem:[%s10635_s3 + $0x8a0] ss:$12 sps:$4 sm:$0xff]   ;;  %4814 = vmatprep.subr.bf16.mxu0 %v7605_v41  ;;  %v7532_v41 = vld [vmem:[%s10635_s3 + $0x664] ss:$12 sps:$4 sm:$0xff]  }
 0x504   :  { %v6713_v51 = vpop.f32.mrf.mxu1 }
 0x505   :  { %10679 = vst [vmem:[#allocation7_spill] sm:$0xff] %v9222_v12  ;;  %3917 = vmatpush2.bf16.msra.mxu1 %v7514_v21  ;;  %v9248_v21 = vpop.f32.mrf.mxu0 }
 0x506   :  { %3918 = vmatprep.subr.bf16.mxu1 %v7521_v43  ;;  %v6714_v13 = vpop.f32.mrf.mxu1  ;;  %v7525_v43 = vld [vmem:[%s10635_s3 + $0x678] ss:$12 sps:$4 sm:$0xff]   ;;  %4815 = vmatpush2.bf16.msra.mxu0 %v7603_v10  ;;  %v7530_v10 = vld [vmem:[%s10635_s3 + $0x660] ss:$12 sps:$4 sm:$0xff]  }
 0x507   :  { %v6715_v15 = vadd.f32 %v6714_v13, %v6713_v51  ;;  %v9254_v28 = vpop.f32.mrf.mxu0  ;;  %v7609_v13 = vld [vmem:[%s10635_s3 + $0x888] ss:$12 sps:$4 sm:$0xff]   ;;  %4816 = vmatprep.subr.bf16.mxu0 %v7611_v11  ;;  %v7614_v11 = vld [vmem:[%s10635_s3 + $0x870] ss:$12 sps:$4 sm:$0xff]  }
 0x508   :  { %v6716_v29 = vpop.f32.mrf.mxu1  ;;  %10681 = vst [vmem:[#allocation9_spill] sm:$0xff] %v9254_v28 }
 0x509   :  { %3919 = vmatpush2.bf16.msra.mxu1 %v7519_v53  ;;  %v1417_v36 = vadd.f32 %v6715_v15, %v9066_v0  ;;  %v9266_v46 = vpop.f32.mrf.mxu0  ;;  %v7557_v0 = vld [vmem:[%s10635_s3 + $0x770] ss:$12 sps:$4 sm:$0xff]  }
 0x50a   :  { %3920 = vmatprep.subr.bf16.mxu1 %v7527_v34  ;;  %v6717_v51 = vpop.f32.mrf.mxu1  ;;  %4817 = vmatpush2.bf16.msra.mxu0 %v7609_v13  ;;  %v7561_v13 = vld [vmem:[%s10635_s3 + $0x758] ss:$12 sps:$4 sm:$0xff]  }
 0x50b   :  { %v6718_v53 = vadd.f32 %v6717_v51, %v6716_v29  ;;  %v9272_v49 = vpop.f32.mrf.mxu0  ;;  %4818 = vmatprep.subr.bf16.mxu0 %v7616_v3  ;;  %v7620_v3 = vld [vmem:[%s10635_s3 + $0x858] ss:$12 sps:$4 sm:$0xff]  }
 0x50c   :  { %v6719_v34 = vpop.f32.mrf.mxu1 }
 0x50d   :  { %3921 = vmatpush2.bf16.msra.mxu1 %v7525_v43  ;;  %v1420_v28 = vadd.f32 %v6718_v53, %v9119_v27  ;;  %v7622_v27 = vld [vmem:[%s10635_s3 + $0x85c] ss:$12 sps:$4 sm:$0xff]   ;;  %v9285_v51 = vpop.f32.mrf.mxu0 }
 0x50e   :  { %3922 = vmatprep.subr.bf16.mxu1 %v7532_v41  ;;  %v6720_v15 = vpop.f32.mrf.mxu1  ;;  %4819 = vmatpush2.bf16.msra.mxu0 %v7614_v11 }
 0x50f   :  { %v9280_v29 = vmax.f32 %v1417_v36, %v1420_v28  ;;  %v6721_v43 = vadd.f32 %v6720_v15, %v6719_v34  ;;  %v9287_v53 = vpop.f32.mrf.mxu0  ;;  %4820 = vmatprep.subr.bf16.mxu0 %v7622_v27  ;;  %v7627_v34 = vld [vmem:[%s10635_s3 + $0x844] ss:$12 sps:$4 sm:$0xff]  }
 0x510   :  { %v6722_v41 = vpop.f32.mrf.mxu1 }
 0x511   :  { %10682 = vst [vmem:[#allocation10_spill] sm:$0xff] %v9280_v29  ;;  %3923 = vmatpush2.bf16.msra.mxu1 %v7530_v10  ;;  %v1425_v36 = vadd.f32 %v9049_v5, %v6721_v43  ;;  %v9299_v10 = vpop.f32.mrf.mxu0  ;;  %v7568_v5 = vld [vmem:[%s10635_s3 + $0x740] ss:$12 sps:$4 sm:$0xff]  }
 0x512   :  { %7081 = vmatprep.subr.bf16.mxu1 %v7557_v0  ;;  %v6723_v7 = vpop.f32.mrf.mxu1  ;;  %4821 = vmatpush2.bf16.msra.mxu0 %v7620_v3  ;;  %v7625_v43 = vld [vmem:[%s10635_s3 + $0x840] ss:$12 sps:$4 sm:$0xff]   ;;  %v7572_v3 = vld [vmem:[%s10635_s3 + $0x728] ss:$12 sps:$4 sm:$0xff]  }
 0x513   :  { %v6724_v28 = vadd.f32 %v6723_v7, %v6722_v41  ;;  %v9304_v31 = vpop.f32.mrf.mxu0  ;;  %4822 = vmatprep.subr.bf16.mxu0 %v7627_v34  ;;  %v9328_v34 = vld [vmem:[%s10636_s2 + $0x180] ss:$12 sps:$4 sm:$0xff]  }
 0x514   :  { %3925 = vmatmul.mubr.bf16.vlgmr.msra.gmra.mxu1 %v8991_v50  ;;  %v6725_v15 = vpop.f32.mrf.mxu1 }
 0x515   :  { %3934 = vmatprep.mubr.bf16.mxu1 %v9002_v56  ;;  %7082 = vmatpush3.bf16.msra.mxu1 %v7557_v0  ;;  %v1428_v11 = vadd.f32 %v9098_v44, %v6724_v28  ;;  %v9314_v56 = vpop.f32.mrf.mxu0  ;;  %v7647_v44 = vld [vmem:[%s10635_s3 + $0x950] ss:$12 sps:$4 sm:$0xff]  }
 0x516   :  { %7083 = vmatprep.subr.bf16.mxu1 %v7561_v13  ;;  %v6726_v7 = vpop.f32.mrf.mxu1  ;;  %4823 = vmatpush2.bf16.msra.mxu0 %v7625_v43 }
 0x517   :  { %v9312_v50 = vmax.f32 %v1425_v36, %v1428_v11  ;;  %v6727_v27 = vadd.f32 %v6726_v7, %v6725_v15  ;;  %v9320_v28 = vpop.f32.mrf.mxu0  ;;  %7097 = vmatprep.subr.bf16.mxu0 %v7647_v44  ;;  %v7648_v7 = vld [vmem:[%s10635_s3 + $0x938] ss:$12 sps:$4 sm:$0xff]  }
 0x518   :  { %v6728_v0 = vpop.f32.mrf.mxu1 }
 0x519   :  { %10683 = vst [vmem:[#allocation11_spill] sm:$0xff] %v9312_v50  ;;  %7084 = vmatpush3.bf16.msra.mxu1 %v7561_v13  ;;  %v1433_v41 = vadd.f32 %v6727_v27, %v9152_v25  ;;  %v6761_v11 = vpop.f32.mrf.mxu0  ;;  %v9333_v25 = vld [vmem:[%s10636_s2 + $0x19c] ss:$12 sps:$4 sm:$0xff]   ;;  %4825 = vmatmul.mubr.bf16.vlgmr.msra.gmra.mxu0 %v9328_v34 }
 0x51a   :  { %7085 = vmatprep.subr.bf16.mxu1 %v7568_v5  ;;  %v6729_v36 = vpop.f32.mrf.mxu1  ;;  %4834 = vmatprep.mubr.bf16.mxu0 %v9333_v25 }
 0x51b   :  { %v6730_v15 = vadd.f32 %v6729_v36, %v6728_v0  ;;  %v6762_v27 = vpop.f32.mrf.mxu0  ;;  %v7584_v36 = vld [vmem:[%s10635_s3 + $0x94c] ss:$12 sps:$4 sm:$0xff]   ;;  %7098 = vmatpush3.bf16.msra.mxu0 %v7647_v44 }
 0x51c   :  { %3935 = vmatmul.mubr.bf16.gmra.mxu1 %v9033_v4  ;;  %v6731_v13 = vpop.f32.mrf.mxu1  ;;  %v9345_v4 = vadd.f32 %v6762_v27, %v6761_v11  ;;  %7099 = vmatprep.subr.bf16.mxu0 %v7648_v7 }
 0x51d   :  { %3944 = vmatprep.mubr.bf16.mxu1 %v9043_v62  ;;  %7086 = vmatpush3.bf16.msra.mxu1 %v7568_v5  ;;  %v1436_v43 = vadd.f32 %v6730_v15, %v9171_v48  ;;  %v6764_v62 = vpop.f32.mrf.mxu0  ;;  %v7652_v48 = vld [vmem:[%s10635_s3 + $0x920] ss:$12 sps:$4 sm:$0xff]  }
 0x51e   :  { %7087 = vmatprep.subr.bf16.mxu1 %v7572_v3  ;;  %v6732_v0 = vpop.f32.mrf.mxu1 }
 0x51f   :  { %v6733_v50 = vadd.f32 %v6732_v0, %v6731_v13  ;;  %v9347_v37 = vmax.f32 %v1433_v41, %v1436_v43  ;;  %v6765_v35 = vpop.f32.mrf.mxu0  ;;  %v9357_v41 = vld [vmem:[%s10636_s2 + $0x198] ss:$12 sps:$4 sm:$0xff]   ;;  %v9364_v43 = vld [vmem:[%s10636_s2 + $0x1b4] ss:$12 sps:$4 sm:$0xff]   ;;  %7100 = vmatpush3.bf16.msra.mxu0 %v7648_v7 }
 0x520   :  { %v6734_v5 = vpop.f32.mrf.mxu1  ;;  %v9359_v13 = vadd.f32 %v6765_v35, %v6764_v62  ;;  %7101 = vmatprep.subr.bf16.mxu0 %v7652_v48 }
 0x521   :  { %10684 = vst [vmem:[#allocation12_spill] sm:$0xff] %v9347_v37  ;;  %7088 = vmatpush3.bf16.msra.mxu1 %v7572_v3  ;;  %v1441_v15 = vadd.f32 %v9133_v42, %v6733_v50  ;;  %v6767_v3 = vpop.f32.mrf.mxu0  ;;  %v7653_v42 = vld [vmem:[%s10635_s3 + $0x908] ss:$12 sps:$4 sm:$0xff]   ;;  %4835 = vmatmul.mubr.bf16.gmra.mxu0 %v9357_v41  ;;  %v7619_v37 = vld [vmem:[%s10635_s3 + $0x800] ss:$12 sps:$4 sm:$0xff]  }
 0x522   :  { %4873 = vmatprep.subr.bf16.mxu1 %v7584_v36  ;;  %v6735_v11 = vpop.f32.mrf.mxu1  ;;  %4844 = vmatprep.mubr.bf16.mxu0 %v9364_v43  ;;  %v9381_v36 = vld [vmem:[%s10636_s2 + $0x1b0] ss:$12 sps:$4 sm:$0xff]  }
 0x523   :  { %v6736_v44 = vadd.f32 %v6735_v11, %v6734_v5  ;;  %v6768_v50 = vpop.f32.mrf.mxu0  ;;  %7102 = vmatpush3.bf16.msra.mxu0 %v7652_v48  ;;  %v7582_v11 = vld [vmem:[%s10635_s3 + $0x948] ss:$12 sps:$4 sm:$0xff]  }
 0x524   :  { %3945 = vmatmul.mubr.bf16.gmra.mxu1 %v9081_v61  ;;  %v9373_v27 = vadd.f32 %v6768_v50, %v6767_v3  ;;  %7103 = vmatprep.subr.bf16.mxu0 %v7653_v42  ;;  %v7606_v50 = vld [vmem:[%s10636_s2 + $0x188] ss:$12 sps:$4 sm:$0xff]  }
 0x525   :  { %3954 = vmatprep.mubr.bf16.mxu1 %v9091_v39  ;;  %v1444_v35 = vadd.f32 %v9165_v30, %v6736_v44  ;;  %v6770_v61 = vpop.f32.mrf.mxu0  ;;  %v9388_v30 = vld [vmem:[%s10636_s2 + $0x1cc] ss:$12 sps:$4 sm:$0xff]  }
 0x527   :  { %v9375_v0 = vmax.f32 %v1441_v15, %v1444_v35  ;;  %v6771_v7 = vpop.f32.mrf.mxu0  ;;  %7104 = vmatpush3.bf16.msra.mxu0 %v7653_v42  ;;  %v7588_v35 = vld [vmem:[%s10635_s3 + $0x930] ss:$12 sps:$4 sm:$0xff]  }
 0x528   :  { %v9383_v39 = vadd.f32 %v6771_v7, %v6770_v61  ;;  %v7596_v7 = vld [vmem:[%s10635_s3 + $0x91c] ss:$12 sps:$4 sm:$0xff]  }
 0x529   :  { %10685 = vst [vmem:[#allocation13_spill] sm:$0xff] %v9375_v0  ;;  %v6773_v62 = vpop.f32.mrf.mxu0  ;;  %4845 = vmatmul.mubr.bf16.gmra.mxu0 %v9381_v36 }
 0x52a   :  { %4854 = vmatprep.mubr.bf16.mxu0 %v9388_v30 }
 0x52b   :  { %v6774_v5 = vpop.f32.mrf.mxu0 }
 0x52c   :  { %3955 = vmatmul.mubr.bf16.gmra.mxu1 %v9131_v57  ;;  %v9394_v48 = vadd.f32 %v6774_v5, %v6773_v62  ;;  %v7590_v57 = vld [vmem:[%s10635_s3 + $0x934] ss:$12 sps:$4 sm:$0xff]  }
 0x52d   :  { %7089 = vmatprep.mubr.msk.bf16.mxu1 %vm1158_vm0, %v8817_v40  ;;  %v6776_v15 = vpop.f32.mrf.mxu0  ;;  %v9406_v40 = vld [vmem:[%s10636_s2 + $0x1c8] ss:$12 sps:$4 sm:$0xff]  }
 0x52f   :  { %v6777_v44 = vpop.f32.mrf.mxu0 }
 0x530   :  { %v9408_v3 = vadd.f32 %v6777_v44, %v6776_v15  ;;  %v7602_v15 = vld [vmem:[%s10635_s3 + $0x904] ss:$12 sps:$4 sm:$0xff]   ;;  %v7617_v44 = vld [vmem:[%s10636_s2 + $0x1a0] ss:$12 sps:$4 sm:$0xff]  }
 0x531   :  { %v6779_v42 = vpop.f32.mrf.mxu0  ;;  %4855 = vmatmul.mubr.bf16.gmra.mxu0 %v9406_v40 }
 0x532   :  { %7105 = vmatprep.mubr.msk.bf16.mxu0 %vm1158_vm0, %v7606_v50 }
 0x533   :  { %v6780_v61 = vpop.f32.mrf.mxu0 }
 0x534   :  { %7090 = vmatmul.mubr.msk.bf16.vlgmr.msra.gmra.mxu1 %vm1158_vm0, %v8855_v47  ;;  %v9424_v47 = vadd.f32 %v6780_v61, %v6779_v42  ;;  %v10686_v42 = vmov 0   ;;  %v7608_v61 = vld [vmem:[%s10635_s3 + $0x830] ss:$12 sps:$4 sm:$0xff]  }
 0x535   :  { %4874 = vmatpush1.bf16.msra.mxu1 %v7582_v11  ;;  %7093 = vmatprep.mubr.msk.bf16.mxu1 %vm1158_vm0, %v8894_v58  ;;  %v6782_v62 = vpop.f32.mrf.mxu0  ;;  %v7594_v58 = vld [vmem:[%s10635_s3 + $0x918] ss:$12 sps:$4 sm:$0xff]  }
 0x536   :  { %4875 = vmatprep.subr.bf16.mxu1 %v7590_v57  ;;  %v7600_v57 = vld [vmem:[%s10635_s3 + $0x900] ss:$12 sps:$4 sm:$0xff]  }
 0x537   :  { %v6783_v5 = vpop.f32.mrf.mxu0 }
 0x538   :  { %v9433_v11 = vadd.f32 %v6783_v5, %v6782_v62  ;;  %v7613_v5 = vld [vmem:[%s10635_s3 + $0x818] ss:$12 sps:$4 sm:$0xff]  }
 0x539   :  { %4876 = vmatpush1.bf16.msra.mxu1 %v7588_v35  ;;  %v7628_v35 = vld [vmem:[%s10636_s2 + $0x1b8] ss:$12 sps:$4 sm:$0xff]   ;;  %7106 = vmatmul.mubr.msk.bf16.vlgmr.msra.gmra.mxu0 %vm1158_vm0, %v7617_v44 }
 0x53a   :  { %4877 = vmatprep.subr.bf16.mxu1 %v7596_v7  ;;  %7109 = vmatprep.mubr.msk.bf16.mxu0 %vm1158_vm0, %v7628_v35  ;;  %v7612_v7 = vld [vmem:[%s10635_s3 + $0x8d8] ss:$12 sps:$4 sm:$0xff]  }
 0x53c   :  { %7094 = vmatmul.mubr.msk.bf16.gmra.mxu1 %vm1158_vm0, %v8935_v20  ;;  %v7607_v20 = vld [vmem:[%s10635_s3 + $0x8f0] ss:$12 sps:$4 sm:$0xff]  }
 0x53d   :  { %4878 = vmatpush1.bf16.msra.mxu1 %v7594_v58  ;;  %4897 = vmatprep.mubr.bf16.mxu1 %v10686_v42  ;;  %v7636_v58 = vld [vmem:[%s10636_s2 + $0x1d0] ss:$12 sps:$4 sm:$0xff]  }
 0x53e   :  { %4879 = vmatprep.subr.bf16.mxu1 %v7602_v15 }
 0x541   :  { %4880 = vmatpush1.bf16.msra.mxu1 %v7600_v57  ;;  %v7618_v57 = vld [vmem:[%s10635_s3 + $0x8c0] ss:$12 sps:$4 sm:$0xff]   ;;  %7110 = vmatmul.mubr.msk.bf16.gmra.mxu0 %vm1158_vm0, %v7636_v58 }
 0x542   :  { %6889 = vmatprep.subr.bf16.mxu1 %v7607_v20 }
 0x544   :  { %v2126_v62 = vpop.f32.mrf.mxu1  ;;  %6625 = vmatmul.mubr.msk.bf16.vlgmr.msra.gmra.mxu1 %vm1158_vm0, %v7606_v50 }
 0x545   :  { %6890 = vmatpush3.bf16.msra.mxu1 %v7608_v61  ;;  %4907 = vmatprep.mubr.bf16.mxu1 %v10686_v42  ;;  %v2200_v50 = vadd.f32 %v9185_v2, %v2126_v62 }
 0x546   :  { %v9466_v15 = vpop.f32.mrf.mxu1  ;;  %6891 = vmatprep.subr.bf16.mxu1 %v7612_v7  ;;  %v9477_v0 = vpop.f32.mrf.mxu0  ;;  %v7623_v7 = vld [vmem:[%s10635_s3 + $0x8a8] ss:$12 sps:$4 sm:$0xff]  }
 0x547   :  { %10687 = vst [vmem:[#allocation14_spill] sm:$0xff] %v9466_v15 }
 0x548   :  { %v2130_v20 = vpop.f32.mrf.mxu1  ;;  %v9486_v2 = vpop.f32.mrf.mxu0 }
 0x549   :  { %v2204_v61 = vadd.f32 %v9206_v17, %v2130_v20  ;;  %6892 = vmatpush3.bf16.msra.mxu1 %v7613_v5  ;;  %v7624_v17 = vld [vmem:[%s10635_s3 + $0x7e8] ss:$12 sps:$4 sm:$0xff]  }
 0x54a   :  { %v9479_v15 = vpop.f32.mrf.mxu1  ;;  %6893 = vmatprep.subr.bf16.mxu1 %v7618_v57  ;;  %v9493_v5 = vpop.f32.mrf.mxu0 }
 0x54b   :  { %10688 = vst [vmem:[#allocation15_spill] sm:$0xff] %v9479_v15  ;;  %v9484_v29 = vmax.f32 %v2200_v50, %v2204_v61  ;;  %v7629_v50 = vld [vmem:[%s10635_s3 + $0x890] ss:$12 sps:$4 sm:$0xff]  }
 0x54c   :  { %v2136_v62 = vpop.f32.mrf.mxu1  ;;  %6626 = vmatmul.mubr.msk.bf16.gmra.mxu1 %vm1158_vm0, %v7617_v44  ;;  %v9501_v61 = vpop.f32.mrf.mxu0 }
 0x54d   :  { %10689 = vst [vmem:[#allocation16_spill] sm:$0xff] %v9484_v29  ;;  %6894 = vmatpush3.bf16.msra.mxu1 %v7619_v37  ;;  %4917 = vmatprep.mubr.bf16.mxu1 %v10686_v42  ;;  %v2210_v20 = vadd.f32 %v9227_v55, %v2136_v62  ;;  %v7633_v29 = vld [vmem:[%s10635_s3 + $0x7d0] ss:$12 sps:$4 sm:$0xff]  }
 0x54e   :  { %v9495_v57 = vpop.f32.mrf.mxu1  ;;  %6895 = vmatprep.subr.bf16.mxu1 %v7623_v7  ;;  %v7634_v7 = vld [vmem:[%s10635_s3 + $0x878] ss:$12 sps:$4 sm:$0xff]   ;;  %v9514_v55 = vpop.f32.mrf.mxu0 }
 0x54f   :  { %10690 = vst [vmem:[#allocation17_spill] sm:$0xff] %v9495_v57 }
 0x550   :  { %v2140_v37 = vpop.f32.mrf.mxu1 }
 0x551   :  { %v2214_v44 = vadd.f32 %v9248_v21, %v2140_v37  ;;  %6896 = vmatpush3.bf16.msra.mxu1 %v7624_v17  ;;  %v7635_v21 = vld [vmem:[%s10635_s3 + $0x7b8] ss:$12 sps:$4 sm:$0xff]  }
 0x552   :  { %v9507_v15 = vpop.f32.mrf.mxu1  ;;  %6897 = vmatprep.subr.bf16.mxu1 %v7629_v50  ;;  %v7637_v50 = vld [vmem:[%s10635_s3 + $0x860] ss:$12 sps:$4 sm:$0xff]  }
 0x553   :  { %10691 = vst [vmem:[#allocation18_spill] sm:$0xff] %v9507_v15  ;;  %v9512_v57 = vmax.f32 %v2210_v20, %v2214_v44  ;;  %v9524_v20 = vpop.f32.mrf.mxu0 }
 0x554   :  { %v2146_v62 = vpop.f32.mrf.mxu1  ;;  %6627 = vmatmul.mubr.msk.bf16.gmra.mxu1 %vm1158_vm0, %v7628_v35 }
 0x555   :  { %10692 = vst [vmem:[#allocation19_spill] sm:$0xff] %v9512_v57  ;;  %6898 = vmatpush3.bf16.msra.mxu1 %v7633_v29  ;;  %4927 = vmatprep.mubr.bf16.mxu1 %v10686_v42  ;;  %v2220_v37 = vadd.f32 %v9266_v46, %v2146_v62  ;;  %v7641_v29 = vld [vmem:[%s10635_s3 + $0x7a0] ss:$12 sps:$4 sm:$0xff]   ;;  %v9536_v12 = vpop.f32.mrf.mxu0 }
 0x556   :  { %v2148_v17 = vpop.f32.mrf.mxu1  ;;  %6899 = vmatprep.subr.bf16.mxu1 %v7634_v7  ;;  %v7642_v7 = vld [vmem:[%s10635_s3 + $0x848] ss:$12 sps:$4 sm:$0xff]  }
 0x557   :  { %v2222_v35 = vadd.f32 %v9272_v49, %v2148_v17 }
 0x558   :  { %v2150_v44 = vpop.f32.mrf.mxu1 }
 0x559   :  { %6900 = vmatpush3.bf16.msra.mxu1 %v7635_v21  ;;  %v2224_v42 = vadd.f32 %v9285_v51, %v2150_v44  ;;  %v7643_v51 = vld [vmem:[%s10635_s3 + $0x788] ss:$12 sps:$4 sm:$0xff]  }
 0x55a   :  { %v2152_v57 = vpop.f32.mrf.mxu1  ;;  %6901 = vmatprep.subr.bf16.mxu1 %v7637_v50 }
 0x55b   :  { %v2226_v15 = vadd.f32 %v9287_v53, %v2152_v57  ;;  %v9538_v46 = vmax.f32 %v2220_v37, %v2224_v42  ;;  %v9548_v57 = vpop.f32.mrf.mxu0 }
 0x55c   :  { %v2156_v49 = vpop.f32.mrf.mxu1  ;;  %6628 = vmatmul.mubr.msk.bf16.gmra.mxu1 %vm1158_vm0, %v7636_v58 }
 0x55d   :  { %v9541_v62 = vmax.f32 %v2222_v35, %v2226_v15  ;;  %6902 = vmatpush3.bf16.msra.mxu1 %v7641_v29  ;;  %4970 = vmatprep.mubr.bf16.mxu1 %v9232_v8  ;;  %v2230_v53 = vadd.f32 %v9299_v10, %v2156_v49  ;;  %v9556_v29 = vpop.f32.mrf.mxu0 }
 0x55e   :  { %v2158_v21 = vpop.f32.mrf.mxu1  ;;  %6903 = vmatprep.subr.bf16.mxu1 %v7642_v7 }
 0x55f   :  { %v2232_v37 = vadd.f32 %v9304_v31, %v2158_v21  ;;  %v3048_v49 = vpop.f32.mrf.mxu0 }
 0x560   :  { %v2160_v17 = vpop.f32.mrf.mxu1 }
 0x561   :  { %v663_v50 = vpop.xlane.xlu1 %662  ;;  %v2234_v58 = vadd.f32 %v9314_v56, %v2160_v17  ;;  %6904 = vmatpush3.bf16.msra.mxu1 %v7643_v51  ;;  %v3050_v17 = vpop.f32.mrf.mxu0 }
 0x562   :  { %v664_v15 = vsub.f32 %v8972_v16, %v663_v50  ;;  %v2162_v44 = vpop.f32.mrf.mxu1 }
 0x563   :  { %v9553_v35 = vmax.f32 %v2230_v53, %v2234_v58  ;;  %v2236_v8 = vadd.f32 %v9320_v28, %v2162_v44  ;;  %v3052_v58 = vpop.f32.mrf.mxu0 }
 0x564   :  { %v665_v42 = vmul.f32 1.442695, %v664_v15  ;;  %v7059_v10 = vpop.f32.mrf.mxu1  ;;  %4971 = vmatmul.mubr.bf16.vlgmr.msra.gmra.mxu1 %v9328_v34 }
 0x565   :  { %v9559_v7 = vmax.f32 %v2232_v37, %v2236_v8  ;;  %4978 = vmatprep.mubr.bf16.mxu1 %v9333_v25  ;;  %v2346_v31 = vadd.f32 %v7059_v10, %v9373_v27 }
 0x566   :  { %7726 = vpow2.f32 %v665_v42  ;;  %v2337_v56 = vpop.f32.mrf.mxu1  ;;  %v3056_v42 = vpop.f32.mrf.mxu0 }
 0x567   :  { %v2338_v16 = vadd.f32 %v9345_v4, %v2337_v56 }
 0x568   :  { %v7060_v51 = vpop.f32.mrf.mxu1  ;;  %v3058_v56 = vpop.f32.mrf.mxu0 }
 0x569   :  { %v2349_v28 = vadd.f32 %v7060_v51, %v9383_v39 }
 0x56a   :  { %v2340_v21 = vpop.f32.mrf.mxu1 }
 0x56b   :  { %v2341_v53 = vadd.f32 %v9359_v13, %v2340_v21  ;;  %v9567_v34 = vmax.f32 %v2346_v31, %v2349_v28  ;;  %v3060_v21 = vpop.f32.mrf.mxu0 }
 0x56c   :  { %4979 = vmatmul.mubr.bf16.gmra.mxu1 %v9357_v41  ;;  %v7063_v50 = vpop.f32.mrf.mxu1 }
 0x56d   :  { %v9569_v25 = vmax.f32 %v2338_v16, %v2341_v53  ;;  %4986 = vmatprep.mubr.bf16.mxu1 %v9364_v43  ;;  %v2362_v27 = vadd.f32 %v7063_v50, %v9424_v47 }
 0x56e   :  { %v2353_v4 = vpop.f32.mrf.mxu1 }
 0x56f   :  { %v2354_v37 = vadd.f32 %v9394_v48, %v2353_v4 }
 0x570   :  { %v7064_v39 = vpop.f32.mrf.mxu1 }
 0x571   :  { %v2365_v15 = vadd.f32 %v7064_v39, %v9433_v11 }
 0x572   :  { %v2356_v13 = vpop.f32.mrf.mxu1 }
 0x573   :  { %v9575_v44 = vpop.eup %7726  ;;  %v9577_v41 = vmax.f32 %v2362_v27, %v2365_v15  ;;  %v2357_v8 = vadd.f32 %v9408_v3, %v2356_v13  ;;  %v3062_v27 = vpop.f32.mrf.mxu0 }
 0x574   :  { %v667_v43 = vsel %vm660_vm3, %v9575_v44, 0.0  ;;  %4987 = vmatmul.mubr.bf16.gmra.mxu1 %v9381_v36  ;;  %v3099_v47 = vpop.f32.mrf.mxu1 }
 0x575   :  { %668 = vadd.xlane.f32.xlu0 %v667_v43  ;;  %4994 = vmatprep.mubr.bf16.mxu1 %v9388_v30  ;;  %v9584_v48 = vmax.f32 %v2354_v37, %v2357_v8  ;;  %v3100_v11 = vadd.f32 %v3099_v47, %v9477_v0  ;;  %v7075_v37 = vpop.f32.mrf.mxu0 }
 0x576   :  { %v3101_v10 = vpop.f32.mrf.mxu1 }
 0x577   :  { %v3102_v31 = vadd.f32 %v3101_v10, %v9486_v2  ;;  %v3237_v8 = vpop.f32.mrf.mxu0 }
 0x578   :  { %v3103_v16 = vpop.f32.mrf.mxu1 }
 0x579   :  { %v3104_v3 = vadd.f32 %v3103_v16, %v9493_v5  ;;  %v7076_v10 = vpop.f32.mrf.mxu0 }
 0x57a   :  { %v3105_v51 = vpop.f32.mrf.mxu1 }
 0x57b   :  { %v9589_v28 = vmax.f32 %v3100_v11, %v3104_v3  ;;  %v3106_v36 = vadd.f32 %v3105_v51, %v9501_v61 }
 0x57c   :  { %4995 = vmatmul.mubr.bf16.gmra.mxu1 %v9406_v40  ;;  %v3109_v30 = vpop.f32.mrf.mxu1 }
 0x57d   :  { %v3110_v53 = vadd.f32 %v3109_v30, %v9514_v55  ;;  %v9594_v50 = vmax.f32 %v3102_v31, %v3106_v36  ;;  %v3240_v36 = vpop.f32.mrf.mxu0 }
 0x57e   :  { %v3111_v0 = vpop.f32.mrf.mxu1 }
 0x57f   :  { %v3112_v2 = vadd.f32 %v3111_v0, %v9524_v20 }
 0x580   :  { %v3113_v4 = vpop.f32.mrf.mxu1 }
 0x581   :  { %v3114_v5 = vadd.f32 %v3113_v4, %v9536_v12 }
 0x582   :  { %v3115_v39 = vpop.f32.mrf.mxu1 }
 0x583   :  { %v9598_v15 = vmax.f32 %v3110_v53, %v3114_v5  ;;  %v3116_v40 = vadd.f32 %v3115_v39, %v9548_v57  ;;  %v7079_v53 = vpop.f32.mrf.mxu0 }
 0x584   :  { %v3119_v13 = vpop.f32.mrf.mxu1 }
 0x585   :  { %v9601_v61 = vmax.f32 %v3112_v2, %v3116_v40  ;;  %v3120_v55 = vadd.f32 %v3119_v13, %v9556_v29  ;;  %v10655_v13 = vmov 2  }
 0x586   :  { %v3121_v43 = vpop.f32.mrf.mxu1  ;;  %7162 = vset.pattern.permute.xlu0 %v10655_v13 }
 0x587   :  { %v3122_v47 = vadd.f32 %v3121_v43, %v3048_v49  ;;  %v3253_v49 = vpop.f32.mrf.mxu0 }
 0x588   :  { %v3123_v11 = vpop.f32.mrf.mxu1 }
 0x589   :  { %v3124_v20 = vadd.f32 %v3123_v11, %v3050_v17  ;;  %v7080_v43 = vpop.f32.mrf.mxu0 }
 0x58a   :  { %v3125_v31 = vpop.f32.mrf.mxu1 }
 0x58b   :  { %v9604_v16 = vmax.f32 %v3120_v55, %v3124_v20  ;;  %v3126_v12 = vadd.f32 %v3125_v31, %v3052_v58  ;;  %v3256_v20 = vpop.f32.mrf.mxu0 }
 0x58c   :  { %v3129_v3 = vpop.f32.mrf.mxu1 }
 0x58d   :  { %v9606_v51 = vmax.f32 %v3122_v47, %v3126_v12  ;;  %v3130_v57 = vadd.f32 %v3129_v3, %v3056_v42 }
 0x58e   :  { %v3131_v30 = vpop.f32.mrf.mxu1 }
 0x58f   :  { %v3132_v0 = vadd.f32 %v3131_v30, %v3058_v56 }
 0x590   :  { %v3133_v2 = vpop.f32.mrf.mxu1 }
 0x591   :  { %v3134_v29 = vadd.f32 %v3133_v2, %v3060_v21 }
 0x592   :  { %v3135_v4 = vpop.f32.mrf.mxu1 }
 0x593   :  { %v3136_v5 = vadd.f32 %v3135_v4, %v3062_v27  ;;  %v9608_v39 = vmax.f32 %v3130_v57, %v3134_v29  ;;  %v3999_v57 = vpop.f32.mrf.mxu0 }
 0x594   :  { %v6809_v17 = vpop.f32.mrf.mxu1 }
 0x595   :  { %v9610_v40 = vmax.f32 %v3132_v0, %v3136_v5  ;;  %v4001_v4 = vpop.f32.mrf.mxu0 }
 0x596   :  { %v6810_v58 = vpop.f32.mrf.mxu1 }
 0x597   :  { %v6811_v55 = vadd.f32 %v6810_v58, %v6809_v17 }
 0x598   :  { %v6812_v42 = vpop.f32.mrf.mxu1 }
 0x599   :  { %v3238_v47 = vadd.f32 %v6811_v55, %v3237_v8  ;;  %v4003_v55 = vpop.f32.mrf.mxu0 }
 0x59a   :  { %v6813_v11 = vpop.f32.mrf.mxu1 }
 0x59b   :  { %v6814_v56 = vadd.f32 %v6813_v11, %v6812_v42 }
 0x59c   :  { %v6815_v21 = vpop.f32.mrf.mxu1 }
 0x59d   :  { %v3241_v31 = vadd.f32 %v6814_v56, %v3240_v36 }
 0x59e   :  { %v6816_v27 = vpop.f32.mrf.mxu1 }
 0x59f   :  { %v9613_v12 = vmax.f32 %v3238_v47, %v3241_v31  ;;  %v6817_v3 = vadd.f32 %v6816_v27, %v6815_v21  ;;  %v4005_v47 = vpop.f32.mrf.mxu0 }
 0x5a0   :  { %v6818_v30 = vpop.f32.mrf.mxu1 }
 0x5a1   :  { %10693 = vst [vmem:[#allocation20_spill] sm:$0xff] %v9613_v12  ;;  %v3246_v0 = vadd.f32 %v7075_v37, %v6817_v3  ;;  %v4009_v3 = vpop.f32.mrf.mxu0 }
 0x5a2   :  { %v6819_v2 = vpop.f32.mrf.mxu1 }
 0x5a3   :  { %v6820_v29 = vadd.f32 %v6819_v2, %v6818_v30 }
 0x5a4   :  { %v6821_v5 = vpop.f32.mrf.mxu1 }
 0x5a5   :  { %v3249_v17 = vadd.f32 %v7076_v10, %v6820_v29 }
 0x5a6   :  { %v6822_v58 = vpop.f32.mrf.mxu1 }
 0x5a7   :  { %v9615_v13 = vmax.f32 %v3246_v0, %v3249_v17  ;;  %v6823_v8 = vadd.f32 %v6822_v58, %v6821_v5  ;;  %v9619_v0 = vpop.f32.mrf.mxu0 }
 0x5a8   :  { %v6824_v42 = vpop.f32.mrf.mxu1  ;;  %10696 = vst [vmem:[#allocation23_spill] sm:$0xff] %v9619_v0 }
 0x5a9   :  { %10694 = vst [vmem:[#allocation21_spill] sm:$0xff] %v9615_v13  ;;  %v3254_v11 = vadd.f32 %v6823_v8, %v3253_v49  ;;  %v9623_v49 = vpop.f32.mrf.mxu0 }
 0x5aa   :  { %v6825_v36 = vpop.f32.mrf.mxu1  ;;  %10698 = vst [vmem:[#allocation25_spill] sm:$0xff] %v9623_v49 }
 0x5ab   :  { %v6826_v56 = vadd.f32 %v6825_v36, %v6824_v42  ;;  %v9625_v58 = vpop.f32.mrf.mxu0 }
 0x5ac   :  { %v6827_v31 = vpop.f32.mrf.mxu1  ;;  %10699 = vst [vmem:[#allocation26_spill] sm:$0xff] %v9625_v58 }
 0x5ad   :  { %v3257_v21 = vadd.f32 %v6826_v56, %v3256_v20  ;;  %v9627_v8 = vpop.f32.mrf.mxu0  ;;  %v7655_v56 = vld [vmem:[%s10634_s4 + $0x90] sm:$0xff]  }
 0x5ae   :  { %v6828_v27 = vpop.f32.mrf.mxu1  ;;  %10700 = vst [vmem:[#allocation27_spill] sm:$0xff] %v9627_v8 }
 0x5af   :  { %v6829_v12 = vadd.f32 %v6828_v27, %v6827_v31  ;;  %v9617_v37 = vmax.f32 %v3254_v11, %v3257_v21  ;;  %v9629_v20 = vpop.f32.mrf.mxu0  ;;  %v7656_v31 = vld [vmem:[%s10634_s4 + $0x150] sm:$0xff]  }
 0x5b0   :  { %v6830_v30 = vpop.f32.mrf.mxu1  ;;  %10701 = vst [vmem:[#allocation28_spill] sm:$0xff] %v9629_v20  ;;  %v7657_v27 = vld [vmem:[%s10634_s4 + $0x110] sm:$0xff]   ;;  %6959 = vmatprep.subr.bf16.mxu0 %v7656_v31 }
 0x5b1   :  { %10695 = vst [vmem:[#allocation22_spill] sm:$0xff] %v9617_v37  ;;  %v3262_v2 = vadd.f32 %v7079_v53, %v6829_v12  ;;  %v9631_v42 = vpop.f32.mrf.mxu0  ;;  %6960 = vmatpush3.bf16.msra.mxu0 %v7657_v27 }
 0x5b2   :  { %v6831_v10 = vpop.f32.mrf.mxu1  ;;  %10702 = vst [vmem:[#allocation29_spill] sm:$0xff] %v9631_v42 }
 0x5b3   :  { %v6832_v29 = vadd.f32 %v6831_v10, %v6830_v30  ;;  %v9633_v11 = vpop.f32.mrf.mxu0  ;;  %v7658_v30 = vld [vmem:[%s10634_s4 + $0xc8] sm:$0xff]  }
 0x5b4   :  { %10703 = vst [vmem:[#allocation30_spill] sm:$0xff] %v9633_v11 }
 0x5b5   :  { %v3265_v5 = vadd.f32 %v7080_v43, %v6832_v29  ;;  %v9635_v53 = vpop.f32.mrf.mxu0  ;;  %v7654_v43 = vld [vmem:[%s10634_s4 + $0xd0] sm:$0xff]   ;;  %v7660_v29 = vld [vmem:[%s10634_s4 + $0x148] sm:$0xff]  }
 0x5b6   :  { %10704 = vst [vmem:[#allocation31_spill] sm:$0xff] %v9635_v53  ;;  %6937 = vmatprep.subr.bf16.mxu1 %v7654_v43  ;;  %6961 = vmatprep.subr.bf16.mxu0 %v7660_v29 }
 0x5b7   :  { %v9621_v17 = vmax.f32 %v3262_v2, %v3265_v5  ;;  %v9637_v12 = vpop.f32.mrf.mxu0  ;;  %6938 = vmatpush3.bf16.msra.mxu1 %v7655_v56 }
 0x5b8   :  { %10705 = vst [vmem:[#allocation32_spill] sm:$0xff] %v9637_v12  ;;  %v7659_v12 = vld [vmem:[%s10634_s4 + $0x88] sm:$0xff]   ;;  %6939 = vmatprep.subr.bf16.mxu1 %v7658_v30 }
 0x5b9   :  { %10697 = vst [vmem:[#allocation24_spill] sm:$0xff] %v9621_v17  ;;  %v9654_v10 = vpop.f32.mrf.mxu0  ;;  %v7661_v17 = vld [vmem:[%s10634_s4 + $0x108] sm:$0xff]  }
 0x5ba   :  { %10706 = vst [vmem:[#allocation33_spill] sm:$0xff] %v9654_v10  ;;  %6962 = vmatpush3.bf16.msra.mxu0 %v7661_v17 }
 0x5bb   :  { %v9667_v53 = vpop.f32.mrf.mxu0  ;;  %6940 = vmatpush3.bf16.msra.mxu1 %v7659_v12 }
 0x5bc   :  { %10708 = vst [vmem:[#allocation35_spill] sm:$0xff] %v9667_v53 }
 0x5bd   :  { %v9675_v42 = vpop.f32.mrf.mxu0 }
 0x5be   :  { %10712 = vst [vmem:[#allocation39_spill] sm:$0xff] %v9675_v42 }
 0x5d4   :  { %v3926_v36 = vpop.f32.mrf.mxu1 }
 0x5d5   :  { %v4000_v2 = vadd.f32 %v3999_v57, %v3926_v36 }
 0x5d6   :  { %v3928_v21 = vpop.f32.mrf.mxu1 }
 0x5d7   :  { %v4002_v57 = vadd.f32 %v4001_v4, %v3928_v21  ;;  %v9681_v21 = vpop.f32.mrf.mxu0 }
 0x5d8   :  { %v3930_v5 = vpop.f32.mrf.mxu1  ;;  %10715 = vst [vmem:[#allocation42_spill] sm:$0xff] %v9681_v21 }
 0x5d9   :  { %v4004_v36 = vadd.f32 %v4003_v55, %v3930_v5  ;;  %v9687_v12 = vpop.f32.mrf.mxu0 }
 0x5da   :  { %v3932_v43 = vpop.f32.mrf.mxu1  ;;  %10718 = vst [vmem:[#allocation45_spill] sm:$0xff] %v9687_v12 }
 0x5db   :  { %v9665_v31 = vmax.f32 %v4000_v2, %v4004_v36  ;;  %v4006_v10 = vadd.f32 %v4005_v47, %v3932_v43  ;;  %v9693_v2 = vpop.f32.mrf.mxu0 }
 0x5dc   :  { %v3936_v56 = vpop.f32.mrf.mxu1  ;;  %10721 = vst [vmem:[#allocation48_spill] sm:$0xff] %v9693_v2 }
 0x5dd   :  { %10707 = vst [vmem:[#allocation34_spill] sm:$0xff] %v9665_v31  ;;  %v9669_v27 = vmax.f32 %v4002_v57, %v4006_v10  ;;  %v9671_v37 = vadd.f32 %v4009_v3, %v3936_v56  ;;  %v9697_v29 = vpop.f32.mrf.mxu0  ;;  %v10761_v31 = vld [vmem:[#allocation15_spill] sm:$0xff] }
 0x5de   :  { %v9673_v11 = vpop.f32.mrf.mxu1  ;;  %10723 = vst [vmem:[#allocation50_spill] sm:$0xff] %v9697_v29 }
 0x5df   :  { %10709 = vst [vmem:[#allocation36_spill] sm:$0xff] %v9669_v27  ;;  %10710 = vst [vmem:[#allocation37_spill] sm:$0xff] %v9671_v37  ;;  %v9703_v36 = vpop.f32.mrf.mxu0 }
 0x5e0   :  { %10711 = vst [vmem:[#allocation38_spill] sm:$0xff] %v9673_v11  ;;  %v9677_v4 = vpop.f32.mrf.mxu1  ;;  %10726 = vst [vmem:[#allocation53_spill] sm:$0xff] %v9703_v36 }
 0x5e1   :  { %10713 = vst [vmem:[#allocation40_spill] sm:$0xff] %v9677_v4  ;;  %v9709_v12 = vpop.f32.mrf.mxu0  ;;  %v10775_v4 = vld [vmem:[#allocation19_spill] sm:$0xff] }
 0x5e2   :  { %v9679_v55 = vpop.f32.mrf.mxu1  ;;  %10729 = vst [vmem:[#allocation56_spill] sm:$0xff] %v9709_v12  ;;  %v2390_v0 = vrot.slane %v10775_v4, 4 }
 0x5e3   :  { %10714 = vst [vmem:[#allocation41_spill] sm:$0xff] %v9679_v55  ;;  %v9715_v2 = vpop.f32.mrf.mxu0 }
 0x5e4   :  { %v9683_v47 = vpop.f32.mrf.mxu1  ;;  %10732 = vst [vmem:[#allocation59_spill] sm:$0xff] %v9715_v2 }
 0x5e5   :  { %10716 = vst [vmem:[#allocation43_spill] sm:$0xff] %v9683_v47 }
 0x5e6   :  { %v9685_v30 = vpop.f32.mrf.mxu1 }
 0x5e7   :  { %10717 = vst [vmem:[#allocation44_spill] sm:$0xff] %v9685_v30 }
 0x5e8   :  { %v9689_v17 = vpop.f32.mrf.mxu1 }
 0x5e9   :  { %10719 = vst [vmem:[#allocation46_spill] sm:$0xff] %v9689_v17  ;;  %v7674_v17 = vld [vmem:[%s10634_s4 + $0xa8] sm:$0xff]  }
 0x5ea   :  { %v9691_v3 = vpop.f32.mrf.mxu1 }
 0x5eb   :  { %10720 = vst [vmem:[#allocation47_spill] sm:$0xff] %v9691_v3 }
 0x5ec   :  { %v9695_v10 = vpop.f32.mrf.mxu1 }
 0x5ed   :  { %10722 = vst [vmem:[#allocation49_spill] sm:$0xff] %v9695_v10  ;;  %v10763_v10 = vld [vmem:[#allocation17_spill] sm:$0xff] }
 0x5ee   :  { %v9699_v5 = vpop.f32.mrf.mxu1 }
 0x5ef   :  { %10724 = vst [vmem:[#allocation51_spill] sm:$0xff] %v9699_v5  ;;  %v9721_v5 = vpop.f32.mrf.mxu0 }
 0x5f0   :  { %v9701_v57 = vpop.f32.mrf.mxu1  ;;  %10735 = vst [vmem:[#allocation62_spill] sm:$0xff] %v9721_v5  ;;  %v1305_v5 = vadd.f32 %v9177_v22, %v8956_v6  ;;  %v7669_v6 = vld [vmem:[%s10634_s4 + $0xf8] sm:$0xff]  }
 0x5f1   :  { %10725 = vst [vmem:[#allocation52_spill] sm:$0xff] %v9701_v57  ;;  %v10762_v57 = vld [vmem:[#allocation6_spill] sm:$0xff] }
 0x5f2   :  { %v9705_v43 = vpop.f32.mrf.mxu1 }
 0x5f3   :  { %10727 = vst [vmem:[#allocation54_spill] sm:$0xff] %v9705_v43 }
 0x5f4   :  { %v9707_v56 = vpop.f32.mrf.mxu1 }
 0x5f5   :  { %10728 = vst [vmem:[#allocation55_spill] sm:$0xff] %v9707_v56  ;;  %v9727_v56 = vpop.f32.mrf.mxu0 }
 0x5f6   :  { %v9711_v21 = vpop.f32.mrf.mxu1  ;;  %10738 = vst [vmem:[#allocation65_spill] sm:$0xff] %v9727_v56 }
 0x5f7   :  { %10730 = vst [vmem:[#allocation57_spill] sm:$0xff] %v9711_v21 }
 0x5f8   :  { %v9713_v42 = vpop.f32.mrf.mxu1 }
 0x5f9   :  { %10731 = vst [vmem:[#allocation58_spill] sm:$0xff] %v9713_v42  ;;  %v9733_v42 = vpop.f32.mrf.mxu0 }
 0x5fa   :  { %v9717_v53 = vpop.f32.mrf.mxu1  ;;  %10741 = vst [vmem:[#allocation68_spill] sm:$0xff] %v9733_v42  ;;  %v1301_v42 = vadd.f32 %v9157_v26, %v8912_v1  ;;  %v7668_v1 = vld [vmem:[%s10634_s4 + $0x78] sm:$0xff]   ;;  %v7744_v26 = vmov 1  }
 0x5fb   :  { %10733 = vst [vmem:[#allocation60_spill] sm:$0xff] %v9717_v53  ;;  %v1285_v53 = vadd.f32 %v9086_v38, %v8797_v32 }
 0x5fc   :  { %v9719_v29 = vpop.f32.mrf.mxu1 }
 0x5fd   :  { %10734 = vst [vmem:[#allocation61_spill] sm:$0xff] %v9719_v29  ;;  %v1281_v29 = vadd.f32 %v9060_v24, %v8755_v19  ;;  %v7664_v19 = vld [vmem:[%s10634_s4 + $0x140] sm:$0xff]  }
 0x5fe   :  { %v669_v27 = vpop.xlane.xlu0 %668  ;;  %v9723_v36 = vpop.f32.mrf.mxu1  ;;  %6963 = vmatprep.subr.bf16.mxu0 %v7664_v19 }
 0x5ff   :  { %10736 = vst [vmem:[#allocation63_spill] sm:$0xff] %v9723_v36  ;;  %7728 = vrcp.f32 %v669_v27  ;;  %v9743_v27 = vpop.f32.mrf.mxu0 }
 0x600   :  { %v9725_v43 = vpop.f32.mrf.mxu1  ;;  %10744 = vst [vmem:[#allocation71_spill] sm:$0xff] %v9743_v27  ;;  %v1291_v27 = vadd.f32 %v9113_v52, %v8835_v45  ;;  %v1311_v45 = vadd.f32 %v9197_v59, %v9004_v63  ;;  %v7670_v63 = vld [vmem:[%s10634_s4 + $0xb0] sm:$0xff]  }
 0x601   :  { %10737 = vst [vmem:[#allocation64_spill] sm:$0xff] %v9725_v43  ;;  %v1448_v43 = vrot.slane %v9096_v18, 4  ;;  %v9758_v38 = vpop.f32.mrf.mxu0 }
 0x602   :  { %v9729_v12 = vpop.f32.mrf.mxu1  ;;  %10746 = vst [vmem:[#allocation73_spill] sm:$0xff] %v9758_v38 }
 0x603   :  { %10739 = vst [vmem:[#allocation66_spill] sm:$0xff] %v9729_v12  ;;  %v1454_v12 = vmax.f32 %v1281_v29, %v1285_v53  ;;  %v7665_v53 = vld [vmem:[%s10634_s4 + $0x100] sm:$0xff]   ;;  %v7666_v29 = vld [vmem:[%s10634_s4 + $0xb8] sm:$0xff]  }
 0x604   :  { %v9731_v21 = vpop.f32.mrf.mxu1  ;;  %6964 = vmatpush3.bf16.msra.mxu0 %v7665_v53  ;;  %v1490_v53 = vrot.slane %v9187_v14, 4 }
 0x605   :  { %10740 = vst [vmem:[#allocation67_spill] sm:$0xff] %v9731_v21  ;;  %v7662_v21 = vld [vmem:[%s10634_s4 + $0xc0] sm:$0xff]  }
 0x606   :  { %v9735_v2 = vpop.f32.mrf.mxu1  ;;  %6941 = vmatprep.subr.bf16.mxu1 %v7662_v21  ;;  %v7671_v21 = vld [vmem:[%s10634_s4 + $0x70] sm:$0xff]  }
 0x607   :  { %10742 = vst [vmem:[#allocation69_spill] sm:$0xff] %v9735_v2  ;;  %v7663_v2 = vld [vmem:[%s10634_s4 + $0x80] sm:$0xff]  }
 0x608   :  { %v9741_v36 = vpop.f32.mrf.mxu1  ;;  %6942 = vmatpush3.bf16.msra.mxu1 %v7663_v2  ;;  %v1469_v2 = vrot.slane %v9143_v23, 4 }
 0x609   :  { %10743 = vst [vmem:[#allocation70_spill] sm:$0xff] %v9741_v36  ;;  %v7667_v36 = vld [vmem:[%s10634_s4 + $0x138] sm:$0xff]   ;;  %6943 = vmatprep.subr.bf16.mxu1 %v7666_v29 }
 0x60a   :  { %v9756_v24 = vpop.f32.mrf.mxu1  ;;  %6965 = vmatprep.subr.bf16.mxu0 %v7667_v36 }
 0x60b   :  { %10745 = vst [vmem:[#allocation72_spill] sm:$0xff] %v9756_v24  ;;  %v1455_v24 = vrot.slane %v1454_v12, 4  ;;  %6966 = vmatpush3.bf16.msra.mxu0 %v7669_v6 }
 0x60c   :  { %v7729_v56 = vpop.eup %7728  ;;  %v9782_v52 = vpop.f32.mrf.mxu1  ;;  %6944 = vmatpush3.bf16.msra.mxu1 %v7668_v1 }
 0x60d   :  { %v671_v32 = vmul.f32 %v7729_v56, %v9575_v44  ;;  %v1295_v44 = vadd.f32 %v9138_v9, %v8873_v54  ;;  %v1449_v56 = vmax.f32 %v9096_v18, %v1448_v43  ;;  %v1315_v54 = vadd.f32 %v9217_v33, %v9038_v60  ;;  %10747 = vst [vmem:[#allocation74_spill] sm:$0xff] %v9782_v52  ;;  %v9784_v18 = vpop.f32.mrf.mxu0  ;;  %v7672_v60 = vld [vmem:[%s10634_s4 + $0x130] sm:$0xff]  }
 0x60e   :  { %10748 = vst [vmem:[#allocation75_spill] sm:$0xff] %v9784_v18  ;;  %v1456_v59 = vmax.f32 %v1454_v12, %v1455_v24  ;;  %v1496_v33 = vmax.f32 %v1301_v42, %v1305_v5  ;;  %v9802_v43 = vpop.f32.mrf.mxu1  ;;  %6945 = vmatprep.subr.bf16.mxu1 %v7670_v63  ;;  %v7673_v12 = vld [vmem:[%s10634_s4 + $0xf0] sm:$0xff]   ;;  %6967 = vmatprep.subr.bf16.mxu0 %v7672_v60  ;;  %v10753_v63 = vld [vmem:[#allocation10_spill] sm:$0xff]  ;;  %v10760_v18 = vld [vmem:[#allocation5_spill] sm:$0xff] }
 0x60f   :  { %674 = vperm.xlu1 %7159, %v671_v32   ;;  %v1475_v9 = vmax.f32 %v1291_v27, %v1295_v44  ;;  %v1450_v22 = vrot.slane %v1449_v56, 2  ;;  %v1517_v36 = vmax.f32 %v1311_v45, %v1315_v54  ;;  %10749 = vst [vmem:[#allocation76_spill] sm:$0xff] %v9802_v43  ;;  %v9804_v27 = vpop.f32.mrf.mxu0  ;;  %v5925_v5 = vld [vmem:[%s10632_s5 + $0x4] ss:$8 sm:$0x7]  ;;  %v10751_v44 = vmov 2   ;;  %6968 = vmatpush3.bf16.msra.mxu0 %v7673_v12 }
 0x610   :  { %10750 = vst [vmem:[#allocation77_spill] sm:$0xff] %v9804_v27  ;;  %v1457_v24 = vrot.slane %v1456_v59, 2  ;;  %v1497_v29 = vrot.slane %v1496_v33, 4  ;;  %6946 = vmatpush3.bf16.msra.mxu1 %v7671_v21  ;;  %v1470_v45 = vmax.f32 %v9143_v23, %v1469_v2  ;;  %v10752_v54 = vld [vmem:[#allocation7_spill] sm:$0xff]  ;;  %v9817_v60 = vpop.f32.mrf.mxu1  ;;  %v10759_v2 = vld [vmem:[#allocation14_spill] sm:$0xff]  ;;  %v10766_v12 = vld [vmem:[#allocation9_spill] sm:$0xff] }
 0x611   :  { %v1476_v42 = vrot.slane %v1475_v9, 4  ;;  %v1451_v19 = vmax.f32 %v1449_v56, %v1450_v22  ;;  %v1511_v1 = vrot.slane %v10752_v54, 4  ;;  %v1518_v6 = vrot.slane %v1517_v36, 4  ;;  %10754 = vst [vmem:[#allocation7_spill] sm:$0xff] %v9817_v60  ;;  %v9819_v52 = vpop.f32.mrf.mxu0  ;;  %v10756_v56 = vld [vmem:[#allocation2_spill] sm:$0xff]  ;;  %v10757_v43 = vld [vmem:[#allocation3_spill] sm:$0xff]  ;;  %6947 = vmatprep.subr.bf16.mxu1 %v7674_v17 }
 0x612   :  { %10755 = vst [vmem:[#allocation10_spill] sm:$0xff] %v9819_v52  ;;  %v9822_v22 = vrot.slane %v5925_v5, %v10756_v56  ;;  %v9825_v27 = vrot.slane %v5925_v5, %v10757_v43  ;;  %v2202_v38 = vadd.f32 %v10760_v18, %v10759_v2  ;;  %v10764_v60 = vld [vmem:[#allocation8_spill] sm:$0xff]  ;;  %v10765_v52 = vld [vmem:[#allocation18_spill] sm:$0xff]  ;;  %v1498_v30 = vmax.f32 %v1496_v33, %v1497_v29  ;;  %v7675_v18 = vld [vmem:[%s10634_s4 + $0x68] sm:$0xff]   ;;  %v9848_v2 = vpop.f32.mrf.mxu1 }
 0x613   :  { %7160 = vset.pattern.permute.xlu1 %v7744_v26  ;;  %v1462_v26 = vrot.slane %v10753_v63, 4  ;;  %v1477_v21 = vmax.f32 %v1475_v9, %v1476_v42  ;;  %v2212_v37 = vadd.f32 %v10764_v60, %v10763_v10  ;;  %v2216_v3 = vadd.f32 %v10766_v12, %v10765_v52  ;;  %v7678_v33 = vld [vmem:[%s10634_s4 + $0xa0] sm:$0xff]   ;;  %v10772_v12 = vld [vmem:[#allocation4_spill] sm:$0xff] }
 0x614   :  { %677 = vperm.xlu1 %7160, %v671_v32   ;;  %v1452_v20 = vrot.slane %v1451_v19, 1  ;;  %v1458_v9 = vmax.f32 %v1456_v59, %v1457_v24  ;;  %v1491_v42 = vmax.f32 %v9187_v14, %v1490_v53  ;;  %v1471_v10 = vrot.slane %v1470_v45, 2  ;;  %v9850_v59 = vpop.f32.mrf.mxu0  ;;  %v7677_v14 = vld [vmem:[%s10634_s4 + $0xe8] sm:$0xff]   ;;  %v10769_v53 = vld [vmem:[#allocation13_spill] sm:$0xff]  ;;  %6948 = vmatpush3.bf16.msra.mxu1 %v7675_v18  ;;  %v7679_v17 = vld [vmem:[%s10634_s4 + $0x60] sm:$0xff]  }
 0x615   :  { %v1519_v52 = vmax.f32 %v1517_v36, %v1518_v6  ;;  %v1463_v60 = vmax.f32 %v10753_v63, %v1462_v26  ;;  %10768 = vst [vmem:[#allocation14_spill] sm:$0xff] %v9850_v59  ;;  %v1525_v29 = vrot.slane %v10769_v53, 4  ;;  %v10770_v36 = vld [vmem:[#allocation12_spill] sm:$0xff]  ;;  %v7680_v63 = vld [vmem:[%s10634_s4 + $0x120] sm:$0xff]   ;;  %v1478_v26 = vrot.slane %v1477_v21, 2  ;;  %6949 = vmatprep.subr.bf16.mxu1 %v7678_v33 }
 0x616   :  { %v9869_v59 = vrot.slane %v5925_v5, %v10772_v12  ;;  %v7681_v18 = vld [vmem:[%s10634_s4 + $0xe0] sm:$0xff]   ;;  %v1459_v8 = vrot.slane %v1458_v9, 1  ;;  %v1492_v47 = vrot.slane %v1491_v42, 2  ;;  %v1499_v58 = vrot.slane %v1498_v30, 2  ;;  %v9882_v33 = vpop.f32.mrf.mxu0 }
 0x617   :  { %v1520_v5 = vrot.slane %v1519_v52, 2  ;;  %10774 = vst [vmem:[#allocation15_spill] sm:$0xff] %v9882_v33  ;;  %v1526_v49 = vmax.f32 %v10769_v53, %v1525_v29  ;;  %v7685_v53 = vld [vmem:[%s10634_s4 + $0xd8] sm:$0xff]  }
 0x618   :  { %7161 = vset.pattern.permute.xlu1 %v10751_v44  ;;  %v10758_v44 = vld [vmem:[#allocation11_spill] sm:$0xff]  ;;  %6950 = vmatpush3.bf16.msra.mxu1 %v7679_v17 }
 0x619   :  { %680 = vperm.xlu1 %7161, %v671_v32   ;;  %v1483_v23 = vrot.slane %v10758_v44, 4  ;;  %v2206_v32 = vadd.f32 %v10762_v57, %v10761_v31  ;;  %v7676_v31 = vld [vmem:[%s10634_s4 + $0x128] sm:$0xff]   ;;  %v1512_v57 = vmax.f32 %v10752_v54, %v1511_v1  ;;  %10767 = vst [vmem:[#allocation11_spill] sm:$0xff] %v9848_v2  ;;  %v1504_v54 = vrot.slane %v10770_v36, 4  ;;  %v10771_v1 = vld [vmem:[#allocation16_spill] sm:$0xff] }
 0x61a   :  { %v2369_v6 = vrot.slane %v10771_v1, 4  ;;  %6969 = vmatprep.subr.bf16.mxu0 %v7676_v31  ;;  %v7682_v31 = vld [vmem:[%s10634_s4 + $0x98] sm:$0xff]   ;;  %v1453_v2 = vmax.f32 %v1451_v19, %v1452_v20  ;;  %v1527_v13 = vrot.slane %v1526_v49, 2 }
 0x61b   :  { %v1484_v24 = vmax.f32 %v10758_v44, %v1483_v23  ;;  %v2375_v44 = vmax.f32 %v2202_v38, %v2206_v32  ;;  %v2396_v23 = vmax.f32 %v2212_v37, %v2216_v3  ;;  %6970 = vmatpush3.bf16.msra.mxu0 %v7677_v14  ;;  %v7684_v38 = vld [vmem:[%s10634_s4 + $0x118] sm:$0xff]   ;;  %v1472_v37 = vmax.f32 %v1470_v45, %v1471_v10  ;;  %v9880_v14 = vpop.f32.mrf.mxu1 }
 0x61c   :  { %6971 = vmatprep.subr.bf16.mxu0 %v7680_v63  ;;  %v1513_v3 = vrot.slane %v1512_v57, 2  ;;  %v1464_v32 = vrot.slane %v1463_v60, 2  ;;  %10773 = vst [vmem:[#allocation5_spill] sm:$0xff] %v9880_v14  ;;  %v1505_v20 = vmax.f32 %v10770_v36, %v1504_v54  ;;  %v2370_v19 = vmax.f32 %v10771_v1, %v2369_v6  ;;  %v7683_v63 = vld [vmem:[%s10634_s4 + $0x58] sm:$0xff]   ;;  %6951 = vmatprep.subr.bf16.mxu1 %v7682_v31  ;;  %v9902_v14 = vpop.f32.mrf.mxu0 }
 0x61d   :  { %v1485_v55 = vrot.slane %v1484_v24, 2  ;;  %v1479_v45 = vmax.f32 %v1477_v21, %v1478_v26  ;;  %v2376_v10 = vrot.slane %v2375_v44, 4  ;;  %v2397_v11 = vrot.slane %v2396_v23, 4  ;;  %v9900_v31 = vpop.f32.mrf.mxu1  ;;  %10778 = vst [vmem:[#allocation8_spill] sm:$0xff] %v9902_v14  ;;  %6952 = vmatpush3.bf16.msra.mxu1 %v7683_v63 }
 0x61e   :  { %v9895_v29 = vadd.f32 %v9822_v22, %v1453_v2  ;;  %v1460_v36 = vmax.f32 %v1458_v9, %v1459_v8  ;;  %v1493_v54 = vmax.f32 %v1491_v42, %v1492_v47  ;;  %v1500_v1 = vmax.f32 %v1498_v30, %v1499_v58  ;;  %10777 = vst [vmem:[#allocation17_spill] sm:$0xff] %v9900_v31 }
 0x61f   :  { %6972 = vmatpush3.bf16.msra.mxu0 %v7681_v18  ;;  %v1473_v6 = vrot.slane %v1472_v37, 1  ;;  %v1514_v17 = vmax.f32 %v1512_v57, %v1513_v3  ;;  %v1521_v21 = vmax.f32 %v1519_v52, %v1520_v5  ;;  %v1465_v26 = vmax.f32 %v1463_v60, %v1464_v32  ;;  %v6102_v18 = vld [vmem:[%s10632_s5 + $0x5] ss:$8 sm:$0x7]  ;;  %v9913_v3 = vpop.f32.mrf.mxu1 }
 0x620   :  { %10776 = vst [vmem:[#allocation6_spill] sm:$0xff] %v9895_v29  ;;  %6973 = vmatprep.subr.bf16.mxu0 %v7684_v38  ;;  %v1486_v33 = vmax.f32 %v1484_v24, %v1485_v55  ;;  %v1506_v2 = vrot.slane %v1505_v20, 2  ;;  %v2371_v29 = vrot.slane %v2370_v19, 2  ;;  %v1480_v8 = vrot.slane %v1479_v45, 1  ;;  %10780 = vst [vmem:[#allocation18_spill] sm:$0xff] %v9913_v3 }
 0x621   :  { %v2377_v58 = vmax.f32 %v2375_v44, %v2376_v10  ;;  %v2391_v47 = vmax.f32 %v10775_v4, %v2390_v0  ;;  %v2398_v30 = vmax.f32 %v2396_v23, %v2397_v11  ;;  %v10779_v9 = vmov 0.0   ;;  %v9915_v0 = vpop.f32.mrf.mxu0 }
 0x622   :  { %7113 = vmatprep.subr.bf16.mxu1 %v10779_v9  ;;  %v1494_v42 = vrot.slane %v1493_v54, 1  ;;  %v1501_v57 = vrot.slane %v1500_v1, 1  ;;  %v9907_v52 = vrot.slane %v6102_v18, %v10756_v56  ;;  %v9910_v60 = vrot.slane %v6102_v18, %v10757_v43  ;;  %10781 = vst [vmem:[#allocation9_spill] sm:$0xff] %v9915_v0 }
 0x623   :  { %6974 = vmatpush3.bf16.msra.mxu0 %v7685_v53  ;;  %v1474_v55 = vmax.f32 %v1472_v37, %v1473_v6  ;;  %v1515_v24 = vrot.slane %v1514_v17, 1  ;;  %v1522_v38 = vrot.slane %v1521_v21, 1  ;;  %v1466_v44 = vrot.slane %v1465_v26, 1 }
 0x624   :  { %7133 = vmatprep.subr.bf16.mxu0 %v10779_v9  ;;  %v1487_v11 = vrot.slane %v1486_v33, 1  ;;  %v1528_v4 = vmax.f32 %v1526_v49, %v1527_v13  ;;  %v1507_v23 = vmax.f32 %v1505_v20, %v1506_v2  ;;  %v2372_v5 = vmax.f32 %v2370_v19, %v2371_v29  ;;  %v6279_v49 = vld [vmem:[%s10632_s5 + $0x6] ss:$8 sm:$0x7]  ;;  %v9929_v20 = vpop.f32.mrf.mxu1  ;;  %v9931_v19 = vpop.f32.mrf.mxu0 }
 0x625   :  { %v1481_v32 = vmax.f32 %v1479_v45, %v1480_v8  ;;  %v2378_v63 = vrot.slane %v2377_v58, 2  ;;  %v2392_v10 = vrot.slane %v2391_v47, 2  ;;  %v2399_v53 = vrot.slane %v2398_v30, 2 }
 0x626   :  { %v9918_v31 = vadd.f32 %v9825_v27, %v1460_v36  ;;  %v1495_v9 = vmax.f32 %v1493_v54, %v1494_v42  ;;  %v1502_v37 = vmax.f32 %v1500_v1, %v1501_v57  ;;  %v9921_v6 = vrot.slane %v6102_v18, %v10772_v12 }
 0x627   :  { %v9924_v3 = vadd.f32 %v9822_v22, %v1474_v55  ;;  %v1516_v0 = vmax.f32 %v1514_v17, %v1515_v24  ;;  %v1523_v14 = vmax.f32 %v1521_v21, %v1522_v38  ;;  %v1467_v13 = vmax.f32 %v1465_v26, %v1466_v44 }
 0x628   :  { %10782 = vst [vmem:[#allocation13_spill] sm:$0xff] %v9918_v31  ;;  %v1488_v45 = vmax.f32 %v1486_v33, %v1487_v11  ;;  %v1529_v29 = vrot.slane %v1528_v4, 1  ;;  %v1508_v36 = vrot.slane %v1507_v23, 1  ;;  %v2373_v54 = vrot.slane %v2372_v5, 1 }
 0x629   :  { %10783 = vst [vmem:[#allocation12_spill] sm:$0xff] %v9924_v3  ;;  %v9934_v1 = vadd.f32 %v9825_v27, %v1481_v32  ;;  %v2379_v18 = vmax.f32 %v2377_v58, %v2378_v63  ;;  %v2393_v2 = vmax.f32 %v2391_v47, %v2392_v10  ;;  %v2400_v17 = vmax.f32 %v2398_v30, %v2399_v53  ;;  %v9958_v30 = vpop.f32.mrf.mxu1 }
 0x62a   :  { %v9937_v21 = vadd.f32 %v9822_v22, %v1495_v9  ;;  %v9940_v26 = vadd.f32 %v9825_v27, %v1502_v37  ;;  %v2411_v8 = vrot.slane %v9538_v46, 4  ;;  %v9944_v42 = vrot.slane %v6279_v49, %v10756_v56  ;;  %10790 = vst [vmem:[#allocation82_spill] sm:$0xff] %v9958_v30  ;;  %v9960_v9 = vpop.f32.mrf.mxu0 }
 0x62b   :  { %10784 = vst [vmem:[#allocation16_spill] sm:$0xff] %v9934_v1  ;;  %v9947_v33 = vadd.f32 %v9822_v22, %v1516_v0  ;;  %v9950_v57 = vadd.f32 %v9825_v27, %v1523_v14  ;;  %v9953_v58 = vadd.f32 %v9869_v59, %v1467_v13  ;;  %v9956_v47 = vrot.slane %v6279_v49, %v10757_v43 }
 0x62c   :  { %10785 = vst [vmem:[#allocation19_spill] sm:$0xff] %v9937_v21  ;;  %10786 = vst [vmem:[#allocation78_spill] sm:$0xff] %v9940_v26  ;;  %v9963_v55 = vadd.f32 %v9869_v59, %v1488_v45  ;;  %v1530_v24 = vmax.f32 %v1528_v4, %v1529_v29  ;;  %v1509_v38 = vmax.f32 %v1507_v23, %v1508_v36  ;;  %v2380_v44 = vrot.slane %v2379_v18, 1  ;;  %v9976_v13 = vpop.f32.mrf.mxu0 }
 0x62d   :  { %10787 = vst [vmem:[#allocation79_spill] sm:$0xff] %v9947_v33  ;;  %10788 = vst [vmem:[#allocation80_spill] sm:$0xff] %v9950_v57  ;;  %v2374_v22 = vmax.f32 %v2372_v5, %v2373_v54  ;;  %v2394_v0 = vrot.slane %v2393_v2, 1  ;;  %v2401_v27 = vrot.slane %v2400_v17, 1  ;;  %v2418_v14 = vrot.slane %v9541_v62, 4  ;;  %v9974_v5 = vpop.f32.mrf.mxu1 }
 0x62e   :  { %10789 = vst [vmem:[#allocation81_spill] sm:$0xff] %v9953_v58  ;;  %10791 = vst [vmem:[#allocation83_spill] sm:$0xff] %v9963_v55  ;;  %v2412_v11 = vmax.f32 %v9538_v46, %v2411_v8  ;;  %v2432_v32 = vrot.slane %v9553_v35, 4  ;;  %v2439_v63 = vrot.slane %v9559_v7, 4  ;;  %v2404_v10 = vrot.slane %v9567_v34, 4 }
 0x62f   :  { %v2383_v53 = vrot.slane %v9569_v25, 4  ;;  %v2446_v37 = vrot.slane %v9577_v41, 4  ;;  %v2425_v4 = vrot.slane %v9584_v48, 4  ;;  %v3269_v23 = vrot.slane %v9589_v28, 4  ;;  %10792 = vst [vmem:[#allocation84_spill] sm:$0xff] %v9974_v5 }
 0x630   :  { %v9979_v46 = vadd.f32 %v9869_v59, %v1530_v24  ;;  %v9982_v45 = vadd.f32 %v9869_v59, %v1509_v38  ;;  %v9985_v29 = vadd.f32 %v9907_v52, %v2374_v22  ;;  %v9988_v36 = vrot.slane %v6279_v49, %v10772_v12 }
 0x631   :  { %v2381_v54 = vmax.f32 %v2379_v18, %v2380_v44  ;;  %v2395_v8 = vmax.f32 %v2393_v2, %v2394_v0  ;;  %v2402_v57 = vmax.f32 %v2400_v17, %v2401_v27  ;;  %v2419_v26 = vmax.f32 %v9541_v62, %v2418_v14  ;;  %v9998_v18 = vpop.f32.mrf.mxu1  ;;  %v10000_v2 = vpop.f32.mrf.mxu0 }
 0x632   :  { %10793 = vst [vmem:[#allocation85_spill] sm:$0xff] %v9979_v46  ;;  %10794 = vst [vmem:[#allocation86_spill] sm:$0xff] %v9982_v45  ;;  %v2413_v55 = vrot.slane %v2412_v11, 2  ;;  %v2433_v58 = vmax.f32 %v9553_v35, %v2432_v32  ;;  %v2440_v24 = vmax.f32 %v9559_v7, %v2439_v63  ;;  %v2405_v46 = vmax.f32 %v9567_v34, %v2404_v10 }
 0x633   :  { %10795 = vst [vmem:[#allocation87_spill] sm:$0xff] %v9985_v29  ;;  %v2384_v59 = vmax.f32 %v9569_v25, %v2383_v53  ;;  %v2447_v38 = vmax.f32 %v9577_v41, %v2446_v37  ;;  %v2426_v22 = vmax.f32 %v9584_v48, %v2425_v4  ;;  %v3270_v49 = vmax.f32 %v9589_v28, %v3269_v23  ;;  %v10015_v53 = vpop.f32.mrf.mxu1  ;;  %v10017_v37 = vpop.f32.mrf.mxu0 }
 0x634   :  { %10796 = vst [vmem:[#allocation88_spill] sm:$0xff] %v9998_v18  ;;  %v3276_v62 = vrot.slane %v9594_v50, 4  ;;  %v3290_v35 = vrot.slane %v9598_v15, 4  ;;  %v3297_v7 = vrot.slane %v9601_v61, 4  ;;  %v3311_v34 = vrot.slane %v9604_v16, 4  ;;  %10800 = vst [vmem:[#allocation92_spill] sm:$0xff] %v10015_v53 }
 0x635   :  { %v10007_v25 = vadd.f32 %v9910_v60, %v2381_v54  ;;  %v10010_v41 = vadd.f32 %v9907_v52, %v2395_v8  ;;  %v10013_v48 = vadd.f32 %v9910_v60, %v2402_v57  ;;  %v2420_v28 = vrot.slane %v2419_v26, 2  ;;  %10801 = vst [vmem:[#allocation93_spill] sm:$0xff] %v10017_v37 }
 0x636   :  { %v2414_v17 = vmax.f32 %v2412_v11, %v2413_v55  ;;  %v2434_v44 = vrot.slane %v2433_v58, 2  ;;  %v2441_v0 = vrot.slane %v2440_v24, 2  ;;  %v2406_v27 = vrot.slane %v2405_v46, 2 }
 0x637   :  { %10797 = vst [vmem:[#allocation89_spill] sm:$0xff] %v10007_v25  ;;  %10798 = vst [vmem:[#allocation90_spill] sm:$0xff] %v10010_v41  ;;  %v2385_v14 = vrot.slane %v2384_v59, 2  ;;  %v2448_v32 = vrot.slane %v2447_v38, 2  ;;  %v2427_v63 = vrot.slane %v2426_v22, 2  ;;  %v3271_v10 = vrot.slane %v3270_v49, 2 }
 0x638   :  { %10799 = vst [vmem:[#allocation91_spill] sm:$0xff] %v10013_v48  ;;  %v3277_v4 = vmax.f32 %v9594_v50, %v3276_v62  ;;  %v3291_v23 = vmax.f32 %v9598_v15, %v3290_v35  ;;  %v3298_v57 = vmax.f32 %v9601_v61, %v3297_v7  ;;  %v3312_v54 = vmax.f32 %v9604_v16, %v3311_v34  ;;  %v10026_v15 = vpop.f32.mrf.mxu1  ;;  %v10028_v61 = vpop.f32.mrf.mxu0 }
 0x639   :  { %v2421_v55 = vmax.f32 %v2419_v26, %v2420_v28  ;;  %v3318_v11 = vrot.slane %v9606_v51, 4  ;;  %v3332_v8 = vrot.slane %v9608_v39, 4  ;;  %v3339_v45 = vrot.slane %v9610_v40, 4  ;;  %10802 = vst [vmem:[#allocation94_spill] sm:$0xff] %v10026_v15 }
 0x63a   :  { %v2415_v48 = vrot.slane %v2414_v17, 1  ;;  %v2435_v1 = vmax.f32 %v2433_v58, %v2434_v44  ;;  %v2442_v33 = vmax.f32 %v2440_v24, %v2441_v0  ;;  %v2407_v21 = vmax.f32 %v2405_v46, %v2406_v27  ;;  %v10033_v27 = vpop.f32.mrf.mxu1 }
 0x63b   :  { %v2386_v25 = vmax.f32 %v2384_v59, %v2385_v14  ;;  %v2449_v31 = vmax.f32 %v2447_v38, %v2448_v32  ;;  %v2428_v50 = vmax.f32 %v2426_v22, %v2427_v63  ;;  %v3272_v62 = vmax.f32 %v3270_v49, %v3271_v10  ;;  %10803 = vst [vmem:[#allocation95_spill] sm:$0xff] %v10033_v27  ;;  %v10035_v14 = vpop.f32.mrf.mxu0 }
 0x63c   :  { %v3278_v16 = vrot.slane %v3277_v4, 2  ;;  %v3292_v26 = vrot.slane %v3291_v23, 2  ;;  %v3299_v35 = vrot.slane %v3298_v57, 2  ;;  %v3313_v7 = vrot.slane %v3312_v54, 2  ;;  %10804 = vst [vmem:[#allocation96_spill] sm:$0xff] %v10035_v14  ;;  %v10040_v5 = vpop.f32.mrf.mxu1 }
 0x63d   :  { %v2422_v34 = vrot.slane %v2421_v55, 1  ;;  %v3319_v28 = vmax.f32 %v9606_v51, %v3318_v11  ;;  %v3333_v41 = vmax.f32 %v9608_v39, %v3332_v8  ;;  %v3340_v58 = vmax.f32 %v9610_v40, %v3339_v45  ;;  %10806 = vst [vmem:[#allocation98_spill] sm:$0xff] %v10040_v5  ;;  %v10880_v5 = vld [vmem:[#allocation64_spill] sm:$0xff] }
 0x63e   :  { %v2416_v46 = vmax.f32 %v2414_v17, %v2415_v48  ;;  %v2436_v24 = vrot.slane %v2435_v1, 1  ;;  %v2443_v59 = vrot.slane %v2442_v33, 1  ;;  %v2408_v38 = vrot.slane %v2407_v21, 1 }
 0x63f   :  { %v2387_v22 = vrot.slane %v2386_v25, 1  ;;  %v2450_v49 = vrot.slane %v2449_v31, 1  ;;  %v2429_v44 = vrot.slane %v2428_v50, 1  ;;  %v3273_v0 = vrot.slane %v3272_v62, 1 }
 0x640   :  { %v3279_v32 = vmax.f32 %v3277_v4, %v3278_v16  ;;  %v3293_v63 = vmax.f32 %v3291_v23, %v3292_v26  ;;  %v3300_v10 = vmax.f32 %v3298_v57, %v3299_v35  ;;  %v3314_v51 = vmax.f32 %v3312_v54, %v3313_v7  ;;  %v10042_v4 = vpop.f32.mrf.mxu0  ;;  %v10807_v7 = vld [vmem:[#allocation20_spill] sm:$0xff] }
 0x641   :  { %v2423_v11 = vmax.f32 %v2421_v55, %v2422_v34  ;;  %v3320_v39 = vrot.slane %v3319_v28, 2  ;;  %v3334_v8 = vrot.slane %v3333_v41, 2  ;;  %v3341_v40 = vrot.slane %v3340_v58, 2 }
 0x642   :  { %v10038_v45 = vadd.f32 %v9907_v52, %v2416_v46  ;;  %v2437_v48 = vmax.f32 %v2435_v1, %v2436_v24  ;;  %v2444_v17 = vmax.f32 %v2442_v33, %v2443_v59  ;;  %v2409_v3 = vmax.f32 %v2407_v21, %v2408_v38  ;;  %v10819_v38 = vld [vmem:[#allocation38_spill] sm:$0xff] }
 0x643   :  { %v2388_v29 = vmax.f32 %v2386_v25, %v2387_v22  ;;  %v2451_v18 = vmax.f32 %v2449_v31, %v2450_v49  ;;  %v2430_v30 = vmax.f32 %v2428_v50, %v2429_v44  ;;  %v3274_v53 = vmax.f32 %v3272_v62, %v3273_v0  ;;  %v10820_v22 = vld [vmem:[#allocation23_spill] sm:$0xff]  ;;  %v10821_v44 = vld [vmem:[#allocation40_spill] sm:$0xff]  ;;  %v10822_v0 = vld [vmem:[#allocation25_spill] sm:$0xff] }
 0x644   :  { %10805 = vst [vmem:[#allocation97_spill] sm:$0xff] %v10038_v45  ;;  %v3280_v23 = vrot.slane %v3279_v32, 1  ;;  %v3294_v57 = vrot.slane %v3293_v63, 1  ;;  %v3301_v54 = vrot.slane %v3300_v10, 1  ;;  %v3315_v55 = vrot.slane %v3314_v51, 1 }
 0x645   :  { %v3321_v16 = vmax.f32 %v3319_v28, %v3320_v39  ;;  %v3335_v26 = vmax.f32 %v3333_v41, %v3334_v8  ;;  %v3342_v35 = vmax.f32 %v3340_v58, %v3341_v40  ;;  %v3283_v34 = vrot.slane %v10807_v7, 4  ;;  %v10071_v28 = vpop.f32.mrf.mxu0  ;;  %v10826_v39 = vld [vmem:[#allocation27_spill] sm:$0xff]  ;;  %v10827_v40 = vld [vmem:[#allocation44_spill] sm:$0xff] }
 0x646   :  { %v10046_v1 = vadd.f32 %v9910_v60, %v2423_v11  ;;  %v10049_v31 = vadd.f32 %v9907_v52, %v2437_v48  ;;  %v10052_v21 = vadd.f32 %v9910_v60, %v2444_v17  ;;  %v10055_v33 = vadd.f32 %v9921_v6, %v2409_v3  ;;  %v10069_v52 = vpop.f32.mrf.mxu1  ;;  %10817 = vst [vmem:[#allocation107_spill] sm:$0xff] %v10071_v28  ;;  %v10825_v11 = vld [vmem:[#allocation43_spill] sm:$0xff]  ;;  %v10828_v48 = vld [vmem:[#allocation28_spill] sm:$0xff] }
 0x647   :  { %v10058_v25 = vadd.f32 %v9921_v6, %v2388_v29  ;;  %v10061_v41 = vadd.f32 %v9921_v6, %v2451_v18  ;;  %v10064_v50 = vadd.f32 %v9921_v6, %v2430_v30  ;;  %v10067_v62 = vadd.f32 %v9944_v42, %v3274_v53  ;;  %10816 = vst [vmem:[#allocation106_spill] sm:$0xff] %v10069_v52  ;;  %v6456_v6 = vld [vmem:[%s10632_s5 + $0x7] ss:$8 sm:$0x7]  ;;  %v10818_v30 = vld [vmem:[#allocation21_spill] sm:$0xff] }
 0x648   :  { %10808 = vst [vmem:[#allocation20_spill] sm:$0xff] %v10046_v1  ;;  %10809 = vst [vmem:[#allocation99_spill] sm:$0xff] %v10049_v31  ;;  %v3281_v60 = vmax.f32 %v3279_v32, %v3280_v23  ;;  %v3295_v58 = vmax.f32 %v3293_v63, %v3294_v57  ;;  %v3302_v3 = vmax.f32 %v3300_v10, %v3301_v54  ;;  %v3322_v24 = vrot.slane %v3321_v16, 1  ;;  %v10823_v63 = vld [vmem:[#allocation41_spill] sm:$0xff]  ;;  %v10824_v10 = vld [vmem:[#allocation26_spill] sm:$0xff] }
 0x649   :  { %10810 = vst [vmem:[#allocation100_spill] sm:$0xff] %v10052_v21  ;;  %10811 = vst [vmem:[#allocation101_spill] sm:$0xff] %v10055_v33  ;;  %v3316_v46 = vmax.f32 %v3314_v51, %v3315_v55  ;;  %v3336_v29 = vrot.slane %v3335_v26, 1  ;;  %v3343_v59 = vrot.slane %v3342_v35, 1  ;;  %v3284_v18 = vmax.f32 %v10807_v7, %v3283_v34  ;;  %v10829_v23 = vld [vmem:[#allocation46_spill] sm:$0xff]  ;;  %v10830_v57 = vld [vmem:[#allocation29_spill] sm:$0xff] }
 0x64a   :  { %10812 = vst [vmem:[#allocation102_spill] sm:$0xff] %v10058_v25  ;;  %10813 = vst [vmem:[#allocation103_spill] sm:$0xff] %v10061_v41  ;;  %v3304_v53 = vrot.slane %v10818_v30, 4  ;;  %v4012_v49 = vadd.f32 %v10820_v22, %v10819_v38  ;;  %v4014_v32 = vadd.f32 %v10822_v0, %v10821_v44  ;;  %v4016_v51 = vadd.f32 %v10824_v10, %v10823_v63  ;;  %v10831_v55 = vld [vmem:[#allocation47_spill] sm:$0xff]  ;;  %v10832_v7 = vld [vmem:[#allocation30_spill] sm:$0xff]  ;;  %v10092_v41 = vpop.f32.mrf.mxu1  ;;  %v10094_v38 = vpop.f32.mrf.mxu0 }
 0x64b   :  { %10814 = vst [vmem:[#allocation104_spill] sm:$0xff] %v10064_v50  ;;  %10815 = vst [vmem:[#allocation105_spill] sm:$0xff] %v10067_v62  ;;  %v4020_v8 = vadd.f32 %v10826_v39, %v10825_v11  ;;  %v4022_v17 = vadd.f32 %v10828_v48, %v10827_v40  ;;  %v4024_v54 = vadd.f32 %v10830_v57, %v10829_v23  ;;  %v10835_v44 = vld [vmem:[#allocation22_spill] sm:$0xff]  ;;  %v3285_v48 = vrot.slane %v3284_v18, 2  ;;  %v10860_v1 = vld [vmem:[#allocation53_spill] sm:$0xff] }
 0x64c   :  { %v4026_v34 = vadd.f32 %v10832_v7, %v10831_v55  ;;  %10833 = vst [vmem:[#allocation21_spill] sm:$0xff] %v10094_v38  ;;  %v10097_v22 = vadd.f32 %v9956_v47, %v3281_v60  ;;  %v3325_v0 = vrot.slane %v10835_v44, 4  ;;  %v10101_v63 = vrot.slane %v6456_v6, %v10756_v56  ;;  %v10839_v55 = vld [vmem:[#allocation37_spill] sm:$0xff]  ;;  %v10859_v21 = vld [vmem:[#allocation50_spill] sm:$0xff]  ;;  %v10862_v31 = vld [vmem:[#allocation59_spill] sm:$0xff] }
 0x64d   :  { %v10104_v10 = vrot.slane %v6456_v6, %v10757_v43  ;;  %v3323_v11 = vmax.f32 %v3321_v16, %v3322_v24  ;;  %v3337_v39 = vmax.f32 %v3335_v26, %v3336_v29  ;;  %v3344_v40 = vmax.f32 %v3342_v35, %v3343_v59  ;;  %v10117_v16 = vpop.f32.mrf.mxu1  ;;  %v10119_v26 = vpop.f32.mrf.mxu0  ;;  %v10842_v24 = vld [vmem:[#allocation31_spill] sm:$0xff]  ;;  %v10843_v29 = vld [vmem:[#allocation52_spill] sm:$0xff]  ;;  %v10844_v59 = vld [vmem:[#allocation33_spill] sm:$0xff] }
 0x64e   :  { %10834 = vst [vmem:[#allocation38_spill] sm:$0xff] %v10097_v22  ;;  %v10107_v23 = vadd.f32 %v9944_v42, %v3295_v58  ;;  %v10110_v57 = vadd.f32 %v9956_v47, %v3302_v3  ;;  %v10113_v60 = vadd.f32 %v9944_v42, %v3316_v46  ;;  %v4189_v7 = vmax.f32 %v10839_v55, %v4014_v32  ;;  %v10841_v58 = vld [vmem:[#allocation49_spill] sm:$0xff]  ;;  %v10861_v22 = vld [vmem:[#allocation56_spill] sm:$0xff] }
 0x64f   :  { %v3305_v56 = vmax.f32 %v10818_v30, %v3304_v53  ;;  %v4196_v50 = vmax.f32 %v4012_v49, %v4016_v51  ;;  %v4210_v43 = vmax.f32 %v4020_v8, %v4024_v54  ;;  %v4217_v33 = vmax.f32 %v4022_v17, %v4026_v34  ;;  %10840 = vst [vmem:[#allocation41_spill] sm:$0xff] %v10119_v26  ;;  %v10849_v51 = vld [vmem:[#allocation24_spill] sm:$0xff]  ;;  %v10850_v17 = vld [vmem:[#allocation34_spill] sm:$0xff]  ;;  %v10864_v26 = vld [vmem:[#allocation45_spill] sm:$0xff] }
 0x650   :  { %10836 = vst [vmem:[#allocation23_spill] sm:$0xff] %v10107_v23  ;;  %10837 = vst [vmem:[#allocation40_spill] sm:$0xff] %v10110_v57  ;;  %v3326_v35 = vmax.f32 %v10835_v44, %v3325_v0  ;;  %v4030_v3 = vadd.f32 %v10842_v24, %v10841_v58  ;;  %v4034_v46 = vadd.f32 %v10844_v59, %v10843_v29  ;;  %v3346_v8 = vrot.slane %v10849_v51, 4  ;;  %v10851_v34 = vld [vmem:[#allocation36_spill] sm:$0xff]  ;;  %v10143_v24 = vpop.f32.mrf.mxu1  ;;  %v10855_v29 = vld [vmem:[#allocation54_spill] sm:$0xff] }
 0x651   :  { %10838 = vst [vmem:[#allocation25_spill] sm:$0xff] %v10113_v60  ;;  %v10127_v25 = vrot.slane %v6456_v6, %v10772_v12  ;;  %v10130_v30 = vadd.f32 %v9956_v47, %v3323_v11  ;;  %v10133_v53 = vadd.f32 %v9944_v42, %v3337_v39  ;;  %v10136_v49 = vadd.f32 %v9956_v47, %v3344_v40  ;;  %v10145_v42 = vpop.f32.mrf.mxu0  ;;  %v10853_v47 = vld [vmem:[#allocation51_spill] sm:$0xff]  ;;  %v10854_v40 = vld [vmem:[#allocation32_spill] sm:$0xff]  ;;  %v10879_v38 = vld [vmem:[#allocation61_spill] sm:$0xff] }
 0x652   :  { %v10138_v32 = vmax.f32 %v3284_v18, %v3285_v48  ;;  %v4169_v54 = vrot.slane %v10850_v17, 4  ;;  %v4176_v44 = vrot.slane %v10851_v34, 4  ;;  %v4190_v0 = vrot.slane %v4189_v7, 4  ;;  %10852 = vst [vmem:[#allocation28_spill] sm:$0xff] %v10145_v42  ;;  %v10856_v59 = vld [vmem:[#allocation35_spill] sm:$0xff] }
 0x653   :  { %10845 = vst [vmem:[#allocation26_spill] sm:$0xff] %v10127_v25  ;;  %10846 = vst [vmem:[#allocation43_spill] sm:$0xff] %v10130_v30  ;;  %v3306_v6 = vrot.slane %v3305_v56, 2  ;;  %v4197_v55 = vrot.slane %v4196_v50, 4  ;;  %v4211_v58 = vrot.slane %v4210_v43, 4  ;;  %v4218_v11 = vrot.slane %v4217_v33, 4  ;;  %v10161_v25 = vpop.f32.mrf.mxu1 }
 0x654   :  { %10847 = vst [vmem:[#allocation27_spill] sm:$0xff] %v10133_v53  ;;  %10848 = vst [vmem:[#allocation44_spill] sm:$0xff] %v10136_v49  ;;  %v3327_v39 = vrot.slane %v3326_v35, 2  ;;  %v4032_v18 = vadd.f32 %v10854_v40, %v10853_v47  ;;  %v4231_v48 = vmax.f32 %v4030_v3, %v4034_v46  ;;  %v4036_v12 = vadd.f32 %v10856_v59, %v10855_v29  ;;  %v10857_v30 = vld [vmem:[#allocation39_spill] sm:$0xff]  ;;  %v10858_v53 = vld [vmem:[#allocation42_spill] sm:$0xff] }
 0x655   :  { %v3287_v49 = vrot.slane %v10138_v32, 1  ;;  %v6859_v60 = vadd.f32 %v10858_v53, %v10857_v30  ;;  %v6865_v57 = vadd.f32 %v10860_v1, %v10859_v21  ;;  %v6868_v45 = vadd.f32 %v10862_v31, %v10861_v22  ;;  %v10163_v30 = vpop.f32.mrf.mxu0  ;;  %v10865_v31 = vld [vmem:[#allocation48_spill] sm:$0xff] }
 0x656   :  { %v3347_v23 = vmax.f32 %v10849_v51, %v3346_v8  ;;  %v4170_v62 = vmax.f32 %v10850_v17, %v4169_v54  ;;  %v4177_v3 = vmax.f32 %v10851_v34, %v4176_v44  ;;  %v4191_v46 = vmax.f32 %v4189_v7, %v4190_v0  ;;  %10863 = vst [vmem:[#allocation46_spill] sm:$0xff] %v10163_v30  ;;  %v10866_v51 = vld [vmem:[#allocation55_spill] sm:$0xff]  ;;  %v10867_v17 = vld [vmem:[#allocation58_spill] sm:$0xff]  ;;  %v10868_v34 = vld [vmem:[#allocation73_spill] sm:$0xff] }
 0x657   :  { %v3307_v47 = vmax.f32 %v3305_v56, %v3306_v6  ;;  %v4198_v40 = vmax.f32 %v4196_v50, %v4197_v55  ;;  %v4212_v29 = vmax.f32 %v4210_v43, %v4211_v58  ;;  %v4219_v59 = vmax.f32 %v4217_v33, %v4218_v11  ;;  %v10869_v7 = vld [vmem:[#allocation75_spill] sm:$0xff]  ;;  %v10870_v50 = vld [vmem:[#allocation77_spill] sm:$0xff]  ;;  %v10871_v43 = vld [vmem:[#allocation10_spill] sm:$0xff] }
 0x658   :  { %v3328_v53 = vmax.f32 %v3326_v35, %v3327_v39  ;;  %v4232_v1 = vrot.slane %v4231_v48, 4  ;;  %v4238_v21 = vmax.f32 %v4032_v18, %v4036_v12  ;;  %v6862_v22 = vadd.f32 %v10865_v31, %v10864_v26  ;;  %v10872_v11 = vld [vmem:[#allocation62_spill] sm:$0xff]  ;;  %v10873_v39 = vld [vmem:[#allocation65_spill] sm:$0xff]  ;;  %v10175_v18 = vpop.f32.mrf.mxu1 }
 0x659   :  { %v4146_v8 = vadd.f32 %v10866_v51, %v6865_v57  ;;  %v4149_v54 = vadd.f32 %v10867_v17, %v6868_v45  ;;  %v6877_v56 = vadd.f32 %v10869_v7, %v10868_v34  ;;  %v6880_v33 = vadd.f32 %v10871_v43, %v10870_v50  ;;  %v10177_v57 = vpop.f32.mrf.mxu0  ;;  %v10875_v51 = vld [vmem:[#allocation57_spill] sm:$0xff]  ;;  %v10876_v34 = vld [vmem:[#allocation68_spill] sm:$0xff]  ;;  %v10877_v7 = vld [vmem:[#allocation71_spill] sm:$0xff] }
 0x65a   :  { %v3348_v44 = vrot.slane %v3347_v23, 2  ;;  %v4171_v0 = vrot.slane %v4170_v62, 2  ;;  %v4178_v6 = vrot.slane %v4177_v3, 2  ;;  %v4192_v55 = vrot.slane %v4191_v46, 2  ;;  %10874 = vst [vmem:[#allocation29_spill] sm:$0xff] %v10177_v57  ;;  %v10878_v43 = vld [vmem:[#allocation60_spill] sm:$0xff]  ;;  %v10185_v30 = vpop.f32.mrf.mxu1 }
 0x65b   :  { %v4199_v35 = vrot.slane %v4198_v40, 2  ;;  %v4213_v58 = vrot.slane %v4212_v29, 2  ;;  %v4220_v12 = vrot.slane %v4219_v59, 2  ;;  %v6871_v26 = vadd.f32 %v10873_v39, %v10872_v11 }
 0x65c   :  { %v4233_v45 = vmax.f32 %v4231_v48, %v4232_v1  ;;  %v4239_v31 = vrot.slane %v4238_v21, 4  ;;  %v4138_v17 = vadd.f32 %v6859_v60, %v10875_v51  ;;  %v6874_v50 = vadd.f32 %v10877_v7, %v10876_v34  ;;  %v10187_v60 = vpop.f32.mrf.mxu0 }
 0x65d   :  { %v4141_v28 = vadd.f32 %v6862_v22, %v10878_v43  ;;  %v4203_v42 = vmax.f32 %v4146_v8, %v4149_v54  ;;  %v4162_v52 = vadd.f32 %v10879_v38, %v6877_v56  ;;  %v4165_v27 = vadd.f32 %v10880_v5, %v6880_v33  ;;  %v10881_v22 = vld [vmem:[#allocation63_spill] sm:$0xff]  ;;  %v10882_v54 = vld [vmem:[#allocation66_spill] sm:$0xff] }
 0x65e   :  { %v3349_v15 = vmax.f32 %v3347_v23, %v3348_v44  ;;  %v4172_v11 = vmax.f32 %v4170_v62, %v4171_v0  ;;  %v4179_v39 = vmax.f32 %v4177_v3, %v4178_v6  ;;  %v4193_v14 = vmax.f32 %v4191_v46, %v4192_v55  ;;  %v10192_v6 = vpop.f32.mrf.mxu1 }
 0x65f   :  { %v3308_v37 = vrot.slane %v3307_v47, 1  ;;  %v4200_v57 = vmax.f32 %v4198_v40, %v4199_v35  ;;  %v4214_v48 = vmax.f32 %v4212_v29, %v4213_v58  ;;  %v4221_v1 = vmax.f32 %v4219_v59, %v4220_v12 }
 0x660   :  { %v4234_v51 = vrot.slane %v4233_v45, 2  ;;  %v4240_v34 = vmax.f32 %v4238_v21, %v4239_v31  ;;  %v4154_v8 = vadd.f32 %v6871_v26, %v10881_v22  ;;  %v4157_v38 = vadd.f32 %v6874_v50, %v10882_v54  ;;  %v10194_v21 = vpop.f32.mrf.mxu0  ;;  %v6921_v43 = vpop.f32.mrf.mxu1 }
 0x661   :  { %v3329_v56 = vrot.slane %v3328_v53, 1  ;;  %v4182_v5 = vmax.f32 %v4138_v17, %v4141_v28  ;;  %v4204_v23 = vrot.slane %v4203_v42, 4  ;;  %v4245_v62 = vmax.f32 %v4162_v52, %v4165_v27 }
 0x662   :  { %v3350_v3 = vrot.slane %v3349_v15, 1  ;;  %v4173_v46 = vrot.slane %v4172_v11, 1  ;;  %v4180_v33 = vrot.slane %v4179_v39, 1  ;;  %v4194_v40 = vrot.slane %v4193_v14, 1 }
 0x663   :  { %v3288_v29 = vmax.f32 %v10138_v32, %v3287_v49  ;;  %v3309_v59 = vmax.f32 %v3307_v47, %v3308_v37  ;;  %v4201_v44 = vrot.slane %v4200_v57, 1  ;;  %v4215_v0 = vrot.slane %v4214_v48, 1 }
 0x664   :  { %v4222_v55 = vrot.slane %v4221_v1, 1  ;;  %v4235_v35 = vmax.f32 %v4233_v45, %v4234_v51  ;;  %v4241_v58 = vrot.slane %v4240_v34, 2  ;;  %v4224_v12 = vmax.f32 %v4154_v8, %v4157_v38  ;;  %v10202_v45 = vpop.f32.mrf.mxu0  ;;  %v10883_v38 = vld [vmem:[#allocation76_spill] sm:$0xff] }
 0x665   :  { %v3330_v28 = vmax.f32 %v3328_v53, %v3329_v56  ;;  %v4183_v26 = vrot.slane %v4182_v5, 4  ;;  %v4205_v27 = vmax.f32 %v4203_v42, %v4204_v23  ;;  %v4246_v52 = vrot.slane %v4245_v62, 4  ;;  %v10229_v23 = vpop.f32.mrf.mxu1 }
 0x666   :  { %v3351_v31 = vmax.f32 %v3349_v15, %v3350_v3  ;;  %v4174_v17 = vmax.f32 %v4172_v11, %v4173_v46  ;;  %v4181_v7 = vmax.f32 %v4179_v39, %v4180_v33  ;;  %v4195_v50 = vmax.f32 %v4193_v14, %v4194_v40 }
 0x667   :  { %v10197_v37 = vadd.f32 %v9988_v36, %v3288_v29  ;;  %v10200_v49 = vadd.f32 %v9988_v36, %v3309_v59  ;;  %v4202_v32 = vmax.f32 %v4200_v57, %v4201_v44  ;;  %v4216_v47 = vmax.f32 %v4214_v48, %v4215_v0  ;;  %v10885_v0 = vld [vmem:[#allocation14_spill] sm:$0xff] }
 0x668   :  { %v4223_v51 = vmax.f32 %v4221_v1, %v4222_v55  ;;  %v4236_v53 = vrot.slane %v4235_v35, 1  ;;  %v4242_v22 = vmax.f32 %v4240_v34, %v4241_v58  ;;  %v4225_v42 = vrot.slane %v4224_v12, 4  ;;  %v10886_v55 = vld [vmem:[#allocation67_spill] sm:$0xff] }
 0x669   :  { %v10205_v15 = vadd.f32 %v9988_v36, %v3330_v28  ;;  %v4184_v11 = vmax.f32 %v4182_v5, %v4183_v26  ;;  %v4206_v14 = vrot.slane %v4205_v27, 2  ;;  %v4247_v39 = vmax.f32 %v4245_v62, %v4246_v52  ;;  %v5053_v62 = vpop.f32.mrf.mxu0  ;;  %v10887_v28 = vld [vmem:[#allocation15_spill] sm:$0xff]  ;;  %v10889_v52 = vld [vmem:[#allocation8_spill] sm:$0xff] }
 0x66a   :  { %v10208_v8 = vadd.f32 %v9988_v36, %v3351_v31  ;;  %v10211_v54 = vadd.f32 %v10101_v63, %v4174_v17  ;;  %v10214_v57 = vadd.f32 %v10104_v10, %v4181_v7  ;;  %v10217_v48 = vadd.f32 %v10101_v63, %v4195_v50  ;;  %v10884_v36 = vld [vmem:[#allocation11_spill] sm:$0xff]  ;;  %v10891_v7 = vld [vmem:[#allocation9_spill] sm:$0xff] }
 0x66b   :  { %v10220_v1 = vadd.f32 %v10104_v10, %v4202_v32  ;;  %v10223_v34 = vadd.f32 %v10101_v63, %v4216_v47  ;;  %v4912_v56 = vadd.f32 %v10883_v38, %v9960_v9  ;;  %v4916_v5 = vadd.f32 %v10884_v36, %v10000_v2  ;;  %v10888_v9 = vld [vmem:[#allocation69_spill] sm:$0xff]  ;;  %v10890_v2 = vld [vmem:[#allocation70_spill] sm:$0xff]  ;;  %v10894_v47 = vld [vmem:[#allocation7_spill] sm:$0xff] }
 0x66c   :  { %v10232_v3 = vadd.f32 %v10104_v10, %v4223_v51  ;;  %v4237_v46 = vmax.f32 %v4235_v35, %v4236_v53  ;;  %v4243_v33 = vrot.slane %v4242_v22, 1  ;;  %v4226_v40 = vmax.f32 %v4224_v12, %v4225_v42  ;;  %v10892_v12 = vld [vmem:[#allocation72_spill] sm:$0xff]  ;;  %v6924_v42 = vpop.f32.mrf.mxu1 }
 0x66d   :  { %v4185_v29 = vrot.slane %v4184_v11, 2  ;;  %v4207_v59 = vmax.f32 %v4205_v27, %v4206_v14  ;;  %v4248_v44 = vrot.slane %v4247_v39, 2  ;;  %v4900_v58 = vadd.f32 %v10886_v55, %v10885_v0  ;;  %v10893_v27 = vld [vmem:[#allocation74_spill] sm:$0xff]  ;;  %v7112_v14 = vpop.f32.mrf.mxu0 }
 0x66e   :  { %v4902_v26 = vadd.f32 %v10888_v9, %v10887_v28  ;;  %v4904_v31 = vadd.f32 %v10890_v2, %v10889_v52  ;;  %v6913_v17 = vadd.f32 %v10117_v16, %v10092_v41  ;;  %v6916_v35 = vadd.f32 %v10161_v25, %v10143_v24  ;;  %v10895_v41 = vld [vmem:[#allocation17_spill] sm:$0xff]  ;;  %v6926_v2 = vpop.f32.mrf.mxu1 }
 0x66f   :  { %v4906_v50 = vadd.f32 %v10892_v12, %v10891_v7  ;;  %v4910_v32 = vadd.f32 %v10893_v27, %v9931_v19  ;;  %v4914_v51 = vadd.f32 %v10894_v47, %v9976_v13  ;;  %v5096_v53 = vmax.f32 %v4912_v56, %v4916_v5  ;;  %v10896_v56 = vld [vmem:[#allocation46_spill] sm:$0xff]  ;;  %v5056_v7 = vpop.f32.mrf.mxu0 }
 0x670   :  { %v10251_v38 = vadd.f32 %v10101_v63, %v4237_v46  ;;  %v4227_v36 = vrot.slane %v4226_v40, 2  ;;  %v4922_v16 = vadd.f32 %v10895_v41, %v10028_v61  ;;  %v4926_v25 = vadd.f32 %v9929_v20, %v10042_v4  ;;  %v10897_v4 = vld [vmem:[#allocation93_spill] sm:$0xff] }
 0x671   :  { %v4244_v24 = vmax.f32 %v4242_v22, %v4243_v33  ;;  %v4186_v0 = vmax.f32 %v4184_v11, %v4185_v29  ;;  %v4208_v55 = vrot.slane %v4207_v59, 1  ;;  %v4249_v19 = vmax.f32 %v4247_v39, %v4248_v44  ;;  %v10898_v22 = vld [vmem:[#allocation5_spill] sm:$0xff]  ;;  %v10899_v39 = vld [vmem:[#allocation96_spill] sm:$0xff]  ;;  %v10900_v33 = vld [vmem:[#allocation18_spill] sm:$0xff] }
 0x672   :  { %v6919_v13 = vadd.f32 %v10185_v30, %v10175_v18  ;;  %v5046_v5 = vadd.f32 %v10896_v56, %v6913_v17  ;;  %v6922_v28 = vadd.f32 %v6921_v43, %v10192_v6  ;;  %v5049_v63 = vadd.f32 %v10187_v60, %v6916_v35  ;;  %v10901_v43 = vld [vmem:[#allocation94_spill] sm:$0xff]  ;;  %v10902_v60 = vld [vmem:[#allocation95_spill] sm:$0xff] }
 0x673   :  { %v5068_v46 = vmax.f32 %v4900_v58, %v4904_v31  ;;  %v5075_v9 = vmax.f32 %v4902_v26, %v4906_v50  ;;  %v5089_v52 = vmax.f32 %v4910_v32, %v4914_v51  ;;  %v5097_v61 = vrot.slane %v5096_v53, 4  ;;  %v10903_v58 = vld [vmem:[#allocation98_spill] sm:$0xff]  ;;  %v6927_v51 = vpop.f32.mrf.mxu1 }
 0x674   :  { %v4228_v20 = vmax.f32 %v4226_v40, %v4227_v36  ;;  %v4920_v11 = vadd.f32 %v10898_v22, %v10897_v4  ;;  %v4924_v29 = vadd.f32 %v10900_v33, %v10899_v39  ;;  %v5117_v30 = vmax.f32 %v4922_v16, %v4926_v25  ;;  %v10904_v26 = vld [vmem:[#allocation106_spill] sm:$0xff]  ;;  %v10905_v25 = vld [vmem:[#allocation21_spill] sm:$0xff]  ;;  %v10907_v4 = vld [vmem:[#allocation28_spill] sm:$0xff] }
 0x675   :  { %v10267_v18 = vadd.f32 %v10104_v10, %v4244_v24  ;;  %v4187_v6 = vrot.slane %v4186_v0, 1  ;;  %v6907_v44 = vadd.f32 %v10902_v60, %v10901_v43  ;;  %v6910_v31 = vadd.f32 %v10904_v26, %v10903_v58  ;;  %v10906_v24 = vld [vmem:[#allocation84_spill] sm:$0xff]  ;;  %v10909_v33 = vld [vmem:[#allocation29_spill] sm:$0xff]  ;;  %v10910_v43 = vld [vmem:[#allocation107_spill] sm:$0xff] }
 0x676   :  { %v4209_v17 = vmax.f32 %v4207_v59, %v4208_v55  ;;  %v5103_v35 = vmax.f32 %v5046_v5, %v5049_v63  ;;  %v5054_v40 = vadd.f32 %v6919_v13, %v5053_v62  ;;  %v5057_v12 = vadd.f32 %v6922_v28, %v5056_v7  ;;  %v10908_v22 = vld [vmem:[#allocation92_spill] sm:$0xff]  ;;  %v10911_v60 = vld [vmem:[#allocation82_spill] sm:$0xff]  ;;  %v10912_v26 = vld [vmem:[#allocation41_spill] sm:$0xff] }
 0x677   :  { %v5069_v50 = vrot.slane %v5068_v46, 4  ;;  %v5076_v27 = vrot.slane %v5075_v9, 4  ;;  %v5090_v32 = vrot.slane %v5089_v52, 4  ;;  %v5098_v47 = vmax.f32 %v5096_v53, %v5097_v61 }
 0x678   :  { %v4229_v36 = vrot.slane %v4228_v20, 1  ;;  %v4250_v41 = vrot.slane %v4249_v19, 1  ;;  %v5110_v10 = vmax.f32 %v4920_v11, %v4924_v29  ;;  %v5118_v16 = vrot.slane %v5117_v30, 4 }
 0x679   :  { %v4932_v56 = vadd.f32 %v10906_v24, %v10905_v25  ;;  %v4936_v39 = vadd.f32 %v10908_v22, %v10907_v4  ;;  %v5038_v59 = vadd.f32 %v6907_v44, %v10909_v33  ;;  %v5041_v62 = vadd.f32 %v6910_v31, %v10194_v21  ;;  %v10913_v25 = vld [vmem:[#allocation88_spill] sm:$0xff] }
 0x67a   :  { %v5104_v55 = vrot.slane %v5103_v35, 4  ;;  %v6925_v13 = vadd.f32 %v6924_v42, %v10229_v23  ;;  %v6928_v5 = vadd.f32 %v6927_v51, %v6926_v2  ;;  %v5124_v53 = vmax.f32 %v5054_v40, %v5057_v12 }
 0x67b   :  { %v5070_v28 = vmax.f32 %v5068_v46, %v5069_v50  ;;  %v5077_v63 = vmax.f32 %v5075_v9, %v5076_v27  ;;  %v5091_v61 = vmax.f32 %v5089_v52, %v5090_v32  ;;  %v5099_v7 = vrot.slane %v5098_v47, 2 }
 0x67c   :  { %v5111_v11 = vrot.slane %v5110_v10, 4  ;;  %v5119_v29 = vmax.f32 %v5117_v30, %v5118_v16  ;;  %v4930_v58 = vadd.f32 %v10911_v60, %v10910_v43  ;;  %v4934_v24 = vadd.f32 %v10913_v25, %v10912_v26  ;;  %v10924_v43 = vld [vmem:[#allocation87_spill] sm:$0xff]  ;;  %v10925_v26 = vld [vmem:[#allocation12_spill] sm:$0xff] }
 0x67d   :  { %v4188_v44 = vmax.f32 %v4186_v0, %v4187_v6  ;;  %v4251_v4 = vmax.f32 %v4249_v19, %v4250_v41  ;;  %v5138_v21 = vmax.f32 %v4932_v56, %v4936_v39  ;;  %v5082_v31 = vmax.f32 %v5038_v59, %v5041_v62  ;;  %v10914_v0 = vld [vmem:[#allocation26_spill] sm:$0xff] }
 0x67e   :  { %v5105_v22 = vmax.f32 %v5103_v35, %v5104_v55  ;;  %v5062_v23 = vadd.f32 %v10202_v45, %v6925_v13  ;;  %v5065_v42 = vadd.f32 %v7112_v14, %v6928_v5  ;;  %v5125_v46 = vrot.slane %v5124_v53, 4 }
 0x67f   :  { %v4230_v9 = vmax.f32 %v4228_v20, %v4229_v36  ;;  %v5071_v52 = vrot.slane %v5070_v28, 2  ;;  %v5078_v2 = vrot.slane %v5077_v63, 2  ;;  %v5092_v40 = vrot.slane %v5091_v61, 2 }
 0x680   :  { %v10285_v30 = vmax.f32 %v5098_v47, %v5099_v7  ;;  %v10287_v12 = vmax.f32 %v5110_v10, %v5111_v11  ;;  %v5120_v50 = vrot.slane %v5119_v29, 2  ;;  %v10289_v27 = vmax.f32 %v4930_v58, %v4934_v24  ;;  %v10923_v11 = vld [vmem:[#allocation105_spill] sm:$0xff]  ;;  %v10926_v24 = vld [vmem:[#allocation23_spill] sm:$0xff] }
 0x681   :  { %v10292_v19 = vadd.f32 %v10914_v0, %v4188_v44  ;;  %v10295_v6 = vadd.f32 %v10914_v0, %v4209_v17  ;;  %v10298_v45 = vadd.f32 %v10914_v0, %v4251_v4  ;;  %v5139_v14 = vrot.slane %v5138_v21, 4  ;;  %v10927_v4 = vld [vmem:[#allocation90_spill] sm:$0xff] }
 0x682   :  { %v5106_v20 = vrot.slane %v5105_v22, 2  ;;  %v5083_v35 = vrot.slane %v5082_v31, 4  ;;  %v10300_v32 = vmax.f32 %v5062_v23, %v5065_v42  ;;  %v10302_v47 = vmax.f32 %v5124_v53, %v5125_v46  ;;  %v10929_v42 = vld [vmem:[#allocation99_spill] sm:$0xff] }
 0x683   :  { %v10305_v51 = vadd.f32 %v10914_v0, %v4230_v9  ;;  %v10307_v36 = vmax.f32 %v5070_v28, %v5071_v52  ;;  %v10309_v41 = vmax.f32 %v5077_v63, %v5078_v2  ;;  %v10311_v10 = vmax.f32 %v5091_v61, %v5092_v40  ;;  %v10922_v61 = vld [vmem:[#allocation6_spill] sm:$0xff] }
 0x684   :  { %v10315_v56 = vmax.f32 %v5119_v29, %v5120_v50  ;;  %v10320_v59 = vmax.f32 %v5138_v21, %v5139_v14  ;;  %v10331_v5 = vmax.f32 %v5105_v22, %v5106_v20  ;;  %v10333_v53 = vmax.f32 %v5082_v31, %v5083_v35  ;;  %v10928_v31 = vld [vmem:[#allocation97_spill] sm:$0xff]  ;;  %v10931_v14 = vld [vmem:[#allocation38_spill] sm:$0xff] }
 0x685   :  { %10915 = vst [vmem:[#allocation47_spill] sm:$0xff] %v10307_v36  ;;  %10916 = vst [vmem:[#allocation30_spill] sm:$0xff] %v10309_v41  ;;  %v10932_v20 = vld [vmem:[#allocation89_spill] sm:$0xff] }
 0x686   :  { %10917 = vst [vmem:[#allocation22_spill] sm:$0xff] %v10315_v56 }
 0x68a   :  { %v10318_v33 = vpop.permute.xlu1 %674 }
 0x68b   :  { %10918 = vst [vmem:[#allocation37_spill] sm:$0xff] %v10318_v33  ;;  %v10323_v62 = vrot.slane %v10318_v33, 1  ;;  %v10326_v55 = vrot.slane %v10318_v33, 2  ;;  %v10329_v13 = vrot.slane %v10318_v33, 3  ;;  %v1582_v7 = vmul.f32 %v10922_v61, %v10318_v33 }
 0x68c   :  { %v3382_v29 = vmul.f32 %v10923_v11, %v10318_v33  ;;  %v2482_v60 = vmul.f32 %v10924_v43, %v10318_v33  ;;  %v10345_v58 = vmul.f32 %v10211_v54, %v10318_v33  ;;  %v10934_v11 = vld [vmem:[#allocation79_spill] sm:$0xff] }
 0x68d   :  { %10919 = vst [vmem:[#allocation49_spill] sm:$0xff] %v10323_v62  ;;  %10920 = vst [vmem:[#allocation31_spill] sm:$0xff] %v10326_v55  ;;  %v1585_v25 = vmul.f32 %v10323_v62, %v10925_v26  ;;  %v3385_v44 = vmul.f32 %v10926_v24, %v10323_v62  ;;  %v2485_v21 = vmul.f32 %v10927_v4, %v10323_v62  ;;  %v10935_v26 = vld [vmem:[#allocation16_spill] sm:$0xff] }
 0x68e   :  { %10921 = vst [vmem:[#allocation52_spill] sm:$0xff] %v10329_v13  ;;  %v2488_v22 = vmul.f32 %v10928_v31, %v10326_v55  ;;  %v2491_v46 = vmul.f32 %v10929_v42, %v10329_v13  ;;  %v10361_v54 = vmul.f32 %v10217_v48, %v10323_v62  ;;  %v10365_v9 = vmul.f32 %v10223_v34, %v10326_v55  ;;  %v10930_v48 = vld [vmem:[#allocation13_spill] sm:$0xff]  ;;  %v10936_v31 = vld [vmem:[#allocation40_spill] sm:$0xff] }
 0x68f   :  { %v10355_v23 = vpop.permute.xlu1 %677  ;;  %v10369_v52 = vmul.f32 %v10251_v38, %v10329_v13  ;;  %v10933_v38 = vld [vmem:[#allocation19_spill] sm:$0xff]  ;;  %v10392_v43 = vmul.f32 %v10329_v13, %v10934_v11  ;;  %v10940_v11 = vld [vmem:[#allocation25_spill] sm:$0xff] }
 0x690   :  { %v10372_v2 = vrot.slane %v10355_v23, 1  ;;  %v10375_v40 = vrot.slane %v10355_v23, 2  ;;  %v10378_v50 = vrot.slane %v10355_v23, 3  ;;  %v1583_v0 = vmul.f32 %v10930_v48, %v10355_v23  ;;  %v10937_v48 = vld [vmem:[#allocation91_spill] sm:$0xff] }
 0x691   :  { %v3383_v34 = vmul.f32 %v10931_v14, %v10355_v23  ;;  %v2483_v35 = vmul.f32 %v10932_v20, %v10355_v23  ;;  %v10388_v61 = vmul.f32 %v10326_v55, %v10933_v38  ;;  %v10938_v20 = vld [vmem:[#allocation20_spill] sm:$0xff]  ;;  %v10406_v39 = vmul.f32 %v10940_v11, %v10326_v55 }
 0x692   :  { %v1586_v24 = vmul.f32 %v10372_v2, %v10935_v26  ;;  %v1594_v4 = vadd.f32 %v1583_v0, %v1582_v7  ;;  %v3386_v42 = vmul.f32 %v10936_v31, %v10372_v2  ;;  %v2486_v14 = vmul.f32 %v10937_v48, %v10372_v2  ;;  %v10939_v38 = vld [vmem:[#allocation100_spill] sm:$0xff]  ;;  %v10941_v48 = vld [vmem:[#allocation81_spill] sm:$0xff] }
 0x693   :  { %v3394_v17 = vadd.f32 %v3383_v34, %v3382_v29  ;;  %v2489_v16 = vmul.f32 %v10938_v20, %v10375_v40  ;;  %v2492_v63 = vmul.f32 %v10939_v38, %v10378_v50  ;;  %v2494_v26 = vadd.f32 %v2483_v35, %v2482_v60 }
 0x694   :  { %v10408_v28 = vpop.permute.xlu1 %680  ;;  %v1595_v7 = vadd.f32 %v1586_v24, %v1585_v25  ;;  %v3395_v0 = vadd.f32 %v3386_v42, %v3385_v44  ;;  %v2495_v31 = vadd.f32 %v2486_v14, %v2485_v21  ;;  %v10942_v25 = vld [vmem:[#allocation102_spill] sm:$0xff]  ;;  %v10943_v21 = vld [vmem:[#allocation27_spill] sm:$0xff] }
 0x695   :  { %v10411_v33 = vrot.slane %v10408_v28, 1  ;;  %v10414_v29 = vrot.slane %v10408_v28, 2  ;;  %v10417_v34 = vrot.slane %v10408_v28, 3  ;;  %v1584_v20 = vmul.f32 %v10941_v48, %v10408_v28  ;;  %v10944_v24 = vld [vmem:[#allocation83_spill] sm:$0xff]  ;;  %v10945_v48 = vld [vmem:[#allocation101_spill] sm:$0xff] }
 0x696   :  { %v3384_v38 = vmul.f32 %v10197_v37, %v10408_v28  ;;  %v2484_v44 = vmul.f32 %v10942_v25, %v10408_v28  ;;  %v2496_v60 = vadd.f32 %v2489_v16, %v2488_v22  ;;  %v10427_v35 = vmul.f32 %v10943_v21, %v10329_v13  ;;  %v10946_v37 = vld [vmem:[#allocation104_spill] sm:$0xff]  ;;  %v10947_v16 = vld [vmem:[#allocation103_spill] sm:$0xff] }
 0x697   :  { %v1587_v42 = vmul.f32 %v10411_v33, %v10944_v24  ;;  %v1598_v14 = vadd.f32 %v1594_v4, %v1584_v20  ;;  %v3387_v11 = vmul.f32 %v10200_v49, %v10411_v33  ;;  %v2487_v55 = vmul.f32 %v10945_v48, %v10411_v33 }
 0x698   :  { %v3398_v62 = vadd.f32 %v3394_v17, %v3384_v38  ;;  %v2490_v36 = vmul.f32 %v10946_v37, %v10414_v29  ;;  %v2493_v22 = vmul.f32 %v10947_v16, %v10417_v34  ;;  %v4283_v25 = vmul.f32 %v10214_v57, %v10355_v23 }
 0x699   :  { %v1599_v21 = vadd.f32 %v1595_v7, %v1587_v42  ;;  %v3399_v13 = vadd.f32 %v3395_v0, %v3387_v11  ;;  %v2497_v24 = vadd.f32 %v2492_v63, %v2491_v46  ;;  %v2498_v4 = vadd.f32 %v2494_v26, %v2484_v44  ;;  %v10948_v0 = vld [vmem:[#allocation78_spill] sm:$0xff] }
 0x69a   :  { %v2499_v20 = vadd.f32 %v2495_v31, %v2487_v55  ;;  %v2500_v41 = vadd.f32 %v2496_v60, %v2490_v36  ;;  %v4284_v49 = vmul.f32 %v10292_v19, %v10408_v28  ;;  %v4286_v17 = vmul.f32 %v10220_v1, %v10372_v2  ;;  %v10949_v44 = vld [vmem:[#allocation86_spill] sm:$0xff] }
 0x69b   :  { %v5206_v38 = vrot.slane %v1599_v21, 7  ;;  %v5228_v48 = vrot.slane %v3399_v13, 7  ;;  %v2501_v37 = vadd.f32 %v2497_v24, %v2493_v22  ;;  %v4287_v16 = vmul.f32 %v10295_v6, %v10411_v33 }
 0x69c   :  { %v5217_v56 = vrot.slane %v2499_v20, 7  ;;  %v5219_v57 = vrot.slane %v2500_v41, 6  ;;  %v4289_v63 = vmul.f32 %v10232_v3, %v10375_v40  ;;  %v4290_v36 = vmul.f32 %v10305_v51, %v10414_v29 }
 0x69d   :  { %v5207_v55 = vsel %vm168_vm2, %v5206_v38, %v1598_v14  ;;  %v10453_v19 = vsel %vm168_vm2, %v5228_v48, %v3398_v62  ;;  %v5221_v1 = vrot.slane %v2501_v37, 5  ;;  %v4292_v13 = vmul.f32 %v10267_v18, %v10378_v50  ;;  %v10953_v48 = vld [vmem:[#allocation44_spill] sm:$0xff] }
 0x69e   :  { %v5218_v46 = vsel %vm168_vm2, %v5217_v56, %v2498_v4  ;;  %v4293_v6 = vmul.f32 %v10298_v45, %v10417_v34  ;;  %v4294_v41 = vadd.f32 %v4283_v25, %v10345_v58  ;;  %v4295_v3 = vadd.f32 %v4286_v17, %v10361_v54  ;;  %v10950_v54 = vld [vmem:[#allocation80_spill] sm:$0xff]  ;;  %v10952_v25 = vld [vmem:[#allocation43_spill] sm:$0xff] }
 0x69f   :  { %v5220_v51 = vsel %vm170_vm11, %v5219_v57, %v5218_v46  ;;  %v4296_v7 = vadd.f32 %v4289_v63, %v10365_v9  ;;  %v4297_v62 = vadd.f32 %v4292_v13, %v10369_v52  ;;  %v1589_v26 = vmul.f32 %v10375_v40, %v10948_v0  ;;  %v10951_v9 = vld [vmem:[#allocation85_spill] sm:$0xff] }
 0x6a0   :  { %v5222_v18 = vsel %vm172_vm12, %v5221_v1, %v5220_v51  ;;  %v4298_v31 = vadd.f32 %v4294_v41, %v4284_v49  ;;  %v4299_v56 = vadd.f32 %v4295_v3, %v4287_v16  ;;  %v1590_v45 = vmul.f32 %v10414_v29, %v10949_v44 }
 0x6a1   :  { %v5343_v60 = vpack.c.bf16 %v5222_v18, %v5222_v18  ;;  %v4300_v58 = vadd.f32 %v4296_v7, %v4290_v36  ;;  %v4301_v42 = vadd.f32 %v4297_v62, %v4293_v6  ;;  %v1592_v14 = vmul.f32 %v10378_v50, %v10950_v54 }
 0x6a2   :  { %v5239_v11 = vrot.slane %v4299_v56, 7  ;;  %v1593_v52 = vmul.f32 %v10417_v34, %v10951_v9  ;;  %v1596_v22 = vadd.f32 %v1589_v26, %v10388_v61  ;;  %v3389_v21 = vmul.f32 %v10952_v25, %v10375_v40  ;;  %v10959_v9 = vld [vmem:[#allocation22_spill] sm:$0xff] }
 0x6a3   :  { %5619 = vmatprep.mubr.bf16.mxu1 %v5343_v60  ;;  %v5241_v24 = vrot.slane %v4300_v58, 6  ;;  %v5243_v4 = vrot.slane %v4301_v42, 5  ;;  %v1597_v20 = vadd.f32 %v1592_v14, %v10392_v43  ;;  %v3390_v49 = vmul.f32 %v10205_v15, %v10414_v29  ;;  %v6633_v60 = vld [vmem:[%s10632_s5 + $0x18] ss:$8 sm:$0x7] }
 0x6a4   :  { %v5240_v17 = vsel %vm168_vm2, %v5239_v11, %v4298_v31  ;;  %v1600_v38 = vadd.f32 %v1596_v22, %v1590_v45  ;;  %v3392_v37 = vmul.f32 %v10953_v48, %v10378_v50  ;;  %v3393_v61 = vmul.f32 %v10208_v8, %v10417_v34  ;;  %v7686_v31 = vld [vmem:[%s10634_s4 + $0x190] sm:$0xff]  }
 0x6a5   :  { %v10954_v16 = vrot.slane %v10300_v32, 4  ;;  %v5242_v63 = vsel %vm170_vm11, %v5241_v24, %v5240_v17  ;;  %v1601_v36 = vadd.f32 %v1597_v20, %v1593_v52  ;;  %v3396_v43 = vadd.f32 %v3389_v21, %v10406_v39  ;;  %v10963_v48 = vld [vmem:[#allocation4_spill] sm:$0xff] }
 0x6a6   :  { %v10955_v15 = vrot.slane %v10289_v27, 4  ;;  %v5244_v13 = vsel %vm172_vm12, %v5243_v4, %v5242_v63  ;;  %v5208_v46 = vrot.slane %v1600_v38, 6  ;;  %v3397_v6 = vadd.f32 %v3392_v37, %v10427_v35  ;;  %v10965_v63 = vld [vmem:[#allocation2_spill] sm:$0xff] }
 0x6a7   :  { %v5147_v57 = vmax.f32 %v10300_v32, %v10954_v16  ;;  %v5085_v8 = vrot.slane %v10333_v53, 2  ;;  %v5345_v41 = vpack.c.bf16 %v5244_v13, %v5244_v13  ;;  %v5210_v3 = vrot.slane %v1601_v36, 5  ;;  %v10964_v16 = vld [vmem:[#allocation47_spill] sm:$0xff] }
 0x6a8   :  { %v5133_v1 = vmax.f32 %v10289_v27, %v10955_v15  ;;  %v3400_v51 = vadd.f32 %v3396_v43, %v3390_v49  ;;  %v5141_v32 = vrot.slane %v10320_v59, 2  ;;  %v10956_v7 = vrot.slane %v10302_v47, 2  ;;  %v10962_v49 = vld [vmem:[#allocation3_spill] sm:$0xff] }
 0x6a9   :  { %v5209_v62 = vsel %vm170_vm11, %v5208_v46, %v5207_v55  ;;  %v3401_v0 = vadd.f32 %v3397_v6, %v3393_v61  ;;  %v5108_v27 = vrot.slane %v10331_v5, 1  ;;  %v5148_v26 = vrot.slane %v5147_v57, 2  ;;  %5659 = vmatprep.mubr.bf16.mxu0 %v5345_v41 }
 0x6aa   :  { %v5128_v39 = vmax.f32 %v10302_v47, %v10956_v7  ;;  %v5211_v35 = vsel %vm172_vm12, %v5210_v3, %v5209_v62  ;;  %v5230_v18 = vrot.slane %v3400_v51, 6  ;;  %v5094_v56 = vrot.slane %v10311_v10, 1 }
 0x6ab   :  { %v10957_v44 = vrot.slane %v10287_v12, 2  ;;  %v5342_v45 = vpack.c.bf16 %v5211_v35, %v5211_v35  ;;  %v5232_v55 = vrot.slane %v3401_v0, 5  ;;  %v10958_v58 = vrot.slane %v10285_v30, 1  ;;  %v7689_v35 = vld [vmem:[%s10634_s4 + $0x178] sm:$0xff]  }
 0x6ac   :  { %v5134_v54 = vrot.slane %v5133_v1, 2  ;;  %v5086_v14 = vmax.f32 %v10333_v53, %v5085_v8  ;;  %v5231_v11 = vsel %vm170_vm11, %v5230_v18, %v10453_v19  ;;  %v5122_v52 = vrot.slane %v10959_v9, 1  ;;  %v10961_v19 = vld [vmem:[#allocation30_spill] sm:$0xff]  ;;  %v10966_v18 = vld [vmem:[#allocation49_spill] sm:$0xff] }
 0x6ad   :  { %v5114_v47 = vmax.f32 %v10287_v12, %v10957_v44  ;;  %v5102_v42 = vmax.f32 %v10285_v30, %v10958_v58  ;;  %v5142_v12 = vmax.f32 %v10320_v59, %v5141_v32  ;;  %v5129_v22 = vrot.slane %v5128_v39, 1  ;;  %5620 = vmatmul.mubr.bf16.vlgmr.msra.gmra.mxu1 %v5342_v45  ;;  %v7687_v30 = vld [vmem:[%s10634_s4 + $0x188] sm:$0xff]  }
 0x6ae   :  { %v5233_v25 = vsel %vm172_vm12, %v5232_v55, %v5231_v11  ;;  %v5109_v21 = vmax.f32 %v10331_v5, %v5108_v27  ;;  %v5149_v24 = vmax.f32 %v5147_v57, %v5148_v26  ;;  %7114 = vmatpush3.bf16.msra.mxu1 %v7686_v31  ;;  %v10960_v53 = vmov 0.0  }
 0x6af   :  { %v5344_v4 = vpack.c.bf16 %v5233_v25, %v5233_v25  ;;  %7129 = vmatprep.mubr.msk.bf16.mxu1 %vm7742_vm14, %v10960_v53  ;;  %v5080_v20 = vrot.slane %v10961_v19, 1  ;;  %v5162_v59 = vrot.slane %v6633_v60, %v10962_v49  ;;  %v5115_v17 = vrot.slane %v5114_v47, 1  ;;  %7115 = vmatprep.subr.bf16.mxu1 %v10960_v53  ;;  %v10968_v25 = vld [vmem:[#allocation37_spill] sm:$0xff] }
 0x6b0   :  { %v5095_v38 = vmax.f32 %v10311_v10, %v5094_v56  ;;  %v5135_v5 = vmax.f32 %v5133_v1, %v5134_v54  ;;  %v5166_v37 = vrot.slane %v6633_v60, %v10963_v48  ;;  %v5087_v61 = vrot.slane %v5086_v14, 1  ;;  %v7688_v10 = vld [vmem:[%s10634_s4 + $0x180] sm:$0xff]  }
 0x6b1   :  { %5660 = vmatmul.mubr.bf16.vlgmr.msra.gmra.mxu0 %v5344_v4  ;;  %v5073_v57 = vrot.slane %v10964_v16, 1  ;;  %v5158_v36 = vrot.slane %v6633_v60, %v10965_v63  ;;  %v5123_v43 = vmax.f32 %v10959_v9, %v5122_v52  ;;  %v5130_v15 = vmax.f32 %v5128_v39, %v5129_v22  ;;  %v7694_v63 = vld [vmem:[%s10634_s4 + $0x1d0] sm:$0xff]  }
 0x6b2   :  { %7149 = vmatprep.mubr.msk.bf16.mxu0 %vm7742_vm14, %v10960_v53  ;;  %v5174_v13 = vadd.f32 %v5162_v59, %v5102_v42  ;;  %v5143_v46 = vrot.slane %v5142_v12, 1  ;;  %v5175_v6 = vadd.f32 %v5166_v37, %v5109_v21  ;;  %v5150_v8 = vrot.slane %v5149_v24, 1  ;;  %7116 = vmatpush3.bf16.msra.mxu1 %v7687_v30  ;;  %v10967_v42 = vld [vmem:[#allocation31_spill] sm:$0xff] }
 0x6b3   :  { %v5081_v1 = vmax.f32 %v10961_v19, %v5080_v20  ;;  %v5116_v41 = vmax.f32 %v5114_v47, %v5115_v17  ;;  %7117 = vmatprep.subr.bf16.mxu1 %v10960_v53  ;;  %v5173_v3 = vadd.f32 %v5158_v36, %v5095_v38  ;;  %v5136_v51 = vrot.slane %v5135_v5, 1  ;;  %v10969_v19 = vld [vmem:[#allocation52_spill] sm:$0xff]  ;;  %7134 = vmatpush3.bf16.msra.mxu0 %v7694_v63 }
 0x6b4   :  { %v5088_v32 = vmax.f32 %v5086_v14, %v5087_v61  ;;  %v5186_v7 = vmul.f32 %v5174_v13, %v10372_v2  ;;  %v5074_v39 = vmax.f32 %v10964_v16, %v5073_v57  ;;  %v5177_v62 = vadd.f32 %v5162_v59, %v5123_v43  ;;  %7135 = vmatprep.subr.bf16.mxu0 %v10960_v53  ;;  %v7696_v43 = vld [vmem:[%s10634_s4 + $0x1c0] sm:$0xff]   ;;  %v7698_v13 = vld [vmem:[%s10634_s4 + $0x1b0] sm:$0xff]  }
 0x6b5   :  { %v5178_v0 = vadd.f32 %v5166_v37, %v5130_v15  ;;  %v5144_v27 = vmax.f32 %v5142_v12, %v5143_v46  ;;  %v5151_v26 = vmax.f32 %v5149_v24, %v5150_v8  ;;  %v5185_v31 = vmul.f32 %v5173_v3, %v10966_v18  ;;  %v7697_v15 = vld [vmem:[%s10634_s4 + $0x1b8] sm:$0xff]   ;;  %v7699_v46 = vld [vmem:[%s10634_s4 + $0x1a8] sm:$0xff]  }
 0x6b6   :  { %7118 = vmatpush3.bf16.msra.mxu1 %v7688_v10  ;;  %v5187_v56 = vmul.f32 %v5175_v6, %v10411_v33  ;;  %v5176_v44 = vadd.f32 %v5158_v36, %v5116_v41  ;;  %v5189_v2 = vmul.f32 %v5177_v62, %v10375_v40  ;;  %v5171_v47 = vadd.f32 %v5162_v59, %v5081_v1  ;;  %v7690_v33 = vld [vmem:[%s10634_s4 + $0x170] sm:$0xff]   ;;  %v7700_v6 = vld [vmem:[%s10634_s4 + $0x1a0] sm:$0xff]   ;;  %v7701_v8 = vld [vmem:[%s10634_s4 + $0x198] sm:$0xff]  }
 0x6b7   :  { %7119 = vmatprep.subr.bf16.mxu1 %v10960_v53  ;;  %v5137_v45 = vmax.f32 %v5135_v5, %v5136_v51  ;;  %v5172_v55 = vadd.f32 %v5166_v37, %v5088_v32  ;;  %v5195_v60 = vadd.f32 %v5186_v7, %v5185_v31  ;;  %v5170_v58 = vadd.f32 %v5158_v36, %v5074_v39  ;;  %v5341_v62 = vld [vmem:[%s10632_s5 + $0x1d] ss:$0 sm:$0xff]  ;;  %v5340_v31 = vld [vmem:[%s10632_s5 + $0x1c] ss:$0 sm:$0xff] }
 0x6b8   :  { %v5188_v54 = vmul.f32 %v5176_v44, %v10967_v42  ;;  %v5190_v14 = vmul.f32 %v5178_v0, %v10414_v29  ;;  %v5180_v11 = vadd.f32 %v5162_v59, %v5144_v27  ;;  %v5181_v9 = vadd.f32 %v5166_v37, %v5151_v26  ;;  %v5339_v42 = vld [vmem:[%s10632_s5 + $0x1b] ss:$0 sm:$0xff] }
 0x6b9   :  { %v5183_v52 = vmul.f32 %v5171_v47, %v10355_v23  ;;  %v5199_v12 = vadd.f32 %v5195_v60, %v5187_v56  ;;  %v5179_v22 = vadd.f32 %v5158_v36, %v5137_v45  ;;  %v5182_v21 = vmul.f32 %v5170_v58, %v10968_v25  ;;  %v7691_v23 = vld [vmem:[%s10634_s4 + $0x168] sm:$0xff]  }
 0x6ba   :  { %7120 = vmatpush3.bf16.msra.mxu1 %v7689_v35  ;;  %v5196_v40 = vadd.f32 %v5189_v2, %v5188_v54  ;;  %v5184_v24 = vmul.f32 %v5172_v55, %v10408_v28  ;;  %v5192_v29 = vmul.f32 %v5180_v11, %v10378_v50  ;;  %v5193_v49 = vmul.f32 %v5181_v9, %v10417_v34  ;;  %v7692_v28 = vld [vmem:[%s10634_s4 + $0x160] sm:$0xff]   ;;  %v7693_v34 = vld [vmem:[%s10634_s4 + $0x158] sm:$0xff]   ;;  %v7695_v36 = vld [vmem:[%s10634_s4 + $0x1c8] sm:$0xff]  }
 0x6bb   :  { %7121 = vmatprep.subr.bf16.mxu1 %v10960_v53  ;;  %v5194_v30 = vadd.f32 %v5183_v52, %v5182_v21  ;;  %v5191_v20 = vmul.f32 %v5179_v22, %v10969_v19  ;;  %v5250_v59 = vrot.slane %v5199_v12, 7  ;;  %7136 = vmatpush3.bf16.msra.mxu0 %v7695_v36  ;;  %v5708_v0 = vadd.f32 1e-05, %v5341_v62  ;;  %v5338_v55 = vld [vmem:[%s10632_s5 + $0x1a] ss:$0 sm:$0xff] }
 0x6bc   :  { %v5200_v4 = vadd.f32 %v5196_v40, %v5190_v14  ;;  %7137 = vmatprep.subr.bf16.mxu0 %v10960_v53 }
 0x6bd   :  { %v5198_v17 = vadd.f32 %v5194_v30, %v5184_v24  ;;  %v5197_v38 = vadd.f32 %v5192_v29, %v5191_v20  ;;  %7730 = vrsqrt.f32 %v5708_v0 }
 0x6be   :  { %7122 = vmatpush3.bf16.msra.mxu1 %v7690_v33  ;;  %v5252_v5 = vrot.slane %v5200_v4, 6  ;;  %v5730_v33 = vld [vmem:[%s10632_s5 + $0x1e] ss:$0 sm:$0xff] }
 0x6bf   :  { %7123 = vmatprep.subr.bf16.mxu1 %v10960_v53  ;;  %v5201_v50 = vadd.f32 %v5197_v38, %v5193_v49  ;;  %v5251_v48 = vsel %vm168_vm2, %v5250_v59, %v5198_v17  ;;  %7138 = vmatpush3.bf16.msra.mxu0 %v7696_v43 }
 0x6c0   :  { %v5253_v37 = vsel %vm170_vm11, %v5252_v5, %v5251_v48  ;;  %7139 = vmatprep.subr.bf16.mxu0 %v10960_v53 }
 0x6c1   :  { %v5254_v61 = vrot.slane %v5201_v50, 5 }
 0x6c2   :  { %7124 = vmatpush3.bf16.msra.mxu1 %v7691_v23 }
 0x6c3   :  { %7125 = vmatprep.subr.bf16.mxu1 %v10960_v53  ;;  %v5255_v16 = vsel %vm172_vm12, %v5254_v61, %v5253_v37  ;;  %7140 = vmatpush3.bf16.msra.mxu0 %v7697_v15 }
 0x6c4   :  { %v5346_v57 = vpack.c.bf16 %v5255_v16, %v5255_v16  ;;  %7141 = vmatprep.subr.bf16.mxu0 %v10960_v53 }
 0x6c6   :  { %7126 = vmatpush3.bf16.msra.mxu1 %v7692_v28 }
 0x6c7   :  { %7127 = vmatprep.subr.bf16.mxu1 %v10960_v53  ;;  %7142 = vmatpush3.bf16.msra.mxu0 %v7698_v13 }
 0x6c8   :  { %7143 = vmatprep.subr.bf16.mxu0 %v10960_v53 }
 0x6ca   :  { %7128 = vmatpush3.bf16.msra.mxu1 %v7693_v34  ;;  %v7731_v2 = vpop.eup %7730 }
 0x6cb   :  { %7144 = vmatpush3.bf16.msra.mxu0 %v7699_v46 }
 0x6cc   :  { %7145 = vmatprep.subr.bf16.mxu0 %v10960_v53 }
 0x6cd   :  { %7130 = vmatmul.mubr.bf16.vlgmr.msra.gmra.mxu1 %v5346_v57 }
 0x6cf   :  { %7146 = vmatpush3.bf16.msra.mxu0 %v7700_v6 }
 0x6d0   :  { %7147 = vmatprep.subr.bf16.mxu0 %v10960_v53  ;;  %v5337_v53 = vld [vmem:[%s10632_s5 + $0x19] ss:$0 sm:$0xff] }
 0x6d3   :  { %7148 = vmatpush3.bf16.msra.mxu0 %v7701_v8 }
 0x76d   :  { %v6953_v10 = vpop.f32.mrf.mxu1 }
 0x76f   :  { %v6954_v1 = vpop.f32.mrf.mxu1 }
 0x770   :  { %v6955_v27 = vadd.f32 %v6954_v1, %v6953_v10 }
 0x771   :  { %v6975_v41 = vpop.f32.mrf.mxu0  ;;  %v6956_v3 = vpop.f32.mrf.mxu1 }
 0x772   :  { %v5622_v26 = vadd.f32 %v6955_v27, %v5337_v53 }
 0x773   :  { %v6976_v51 = vpop.f32.mrf.mxu0  ;;  %v6957_v32 = vpop.f32.mrf.mxu1 }
 0x774   :  { %v6977_v35 = vadd.f32 %v6976_v51, %v6975_v41 }
 0x775   :  { %v6978_v7 = vpop.f32.mrf.mxu0 }
 0x776   :  { %v5662_v18 = vadd.f32 %v6977_v35, %v5622_v26 }
 0x777   :  { %v6979_v39 = vpop.f32.mrf.mxu0 }
 0x78d   :  { %v5701_v56 = vpop.f32.mrf.mxu1 }
 0x78e   :  { %v5702_v44 = vadd.f32 %v5701_v56, %v5662_v18 }
 0x78f   :  { %v7131_v47 = vpop.f32.mrf.mxu1 }
 0x790   :  { %v5707_v45 = vsub.f32 %v5702_v44, %v5340_v31 }
 0x791   :  { %v5704_v60 = vpop.f32.mrf.mxu1 }
 0x792   :  { %v5710_v58 = vmul.f32 %v7731_v2, %v5707_v45 }
 0x793   :  { %v7132_v54 = vpop.f32.mrf.mxu1 }
 0x794   :  { %v5711_v14 = vmul.f32 %v5710_v58, %v5338_v55 }
 0x796   :  { %v5712_v11 = vadd.f32 %v5711_v14, %v5339_v42 }
 0x798   :  { %v5713_v9 = vmax.f32 %v5712_v11, 0.0 }
 0x79a   :  { %v5731_v52 = vpack.c.bf16 %v5713_v9, %v5713_v9 }
 0x79c   :  { %7150 = vmatmul.mubr.bf16.vlgmr.msra.gmra.mxu0 %v5731_v52 }
 0x85c   :  { %v5814_v12 = vpop.f32.mrf.mxu0 }
 0x85d   :  { %v5815_v40 = vadd.f32 %v5814_v12, %v5730_v33 }
 0x85e   :  { %v7151_v22 = vpop.f32.mrf.mxu0 }
 0x85f   :  { %v6682_v25 = vmul.f32 -1.442695, %v5815_v40 }
 0x860   :  { %v5817_v21 = vpop.f32.mrf.mxu0 }
 0x861   :  { %7732 = vpow2.f32 %v6682_v25 }
 0x862   :  { %v7152_v24 = vpop.f32.mrf.mxu0 }
 0x86e   :  { %v7733_v29 = vpop.eup %7732 }
 0x86f   :  { %v5823_v4 = vadd.f32 1.0, %v7733_v29 }
 0x871   :  { %7734 = vrcp.f32 %v5823_v4 }
 0x87e   :  { %v7735_v30 = vpop.eup %7734 }
 0x87f   :  { %5826 = vst [vmem:[%s10637_s6] sm:$0xf] %v7735_v30 }

</bundles_post_ra>
